<compile_context>
chip_gen: v6e
topology: v6e:2x2x1
jax: 0.10.0
libtpu: 0.0.40
codegen_flags: <defaults>
</compile_context>

<pallas_src>
import functools

import jax
import jax.numpy as jnp
from jax.experimental import pallas as pl
from jax.experimental.pallas import tpu as pltpu


# ---------------------------------------------------------------------------
# Small helpers
# ---------------------------------------------------------------------------
def _round_up(n, m):
    return ((n + m - 1) // m) * m


@functools.lru_cache(maxsize=None)
def _probe_roll_mode():
    """Classify pltpu.roll's rotation convention on this backend, once.

    pltpu.roll is documented to match jnp.roll; verifying it at runtime (and
    falling back to a slice-based jnp.roll if the XLU path will not lower)
    guarantees the im2col shift direction can never silently flip.
    Returns "jnp", "reversed" or "fallback".
    """
    shape = (1, 3, 8, 128)          # mirrors the real use: 4-D, roll axis=2

    def k(x_ref, o_ref):
        o_ref[...] = pltpu.roll(x_ref[...], 1, axis=2)

    try:
        x = jnp.arange(3 * 8 * 128, dtype=jnp.float32).reshape(shape)
        y = pl.pallas_call(k, out_shape=jax.ShapeDtypeStruct(shape, jnp.float32))(x)
        if bool(jnp.array_equal(y, jnp.roll(x, 1, axis=2))):
            return "jnp"
        if bool(jnp.array_equal(y, jnp.roll(x, -1, axis=2))):
            return "reversed"
    except Exception:
        pass
    return "fallback"


def _vmem_capacity_bytes():
    try:
        return int(pltpu.get_tpu_info().vmem_capacity_bytes)
    except Exception:
        return 64 << 20             # conservative (v7x-sized) if query unavailable


def _vmem_bytes_estimate(bt, H, W, cin, cout, in_it, out_it, cdt_it):
    """Rough per-grid-step VMEM footprint: double-buffered pipeline operands,
    padded scratch, and the in-kernel im2col intermediates (lane/sublane
    padding applied)."""
    Hp, Wp = H + 2, _round_up(W + 2, 8)
    lane_ci = _round_up(cin, 128)
    lane_3ci = _round_up(3 * cin, 128)
    lane_9ci = _round_up(9 * cin, 128)
    lane_co = _round_up(cout, 128)
    sub_w = _round_up(W, 8)

    in_blk = bt * H * sub_w * lane_ci * in_it
    out_blk = bt * H * sub_w * lane_co * out_it
    w_blk = _round_up(9 * cin, 8) * lane_co * cdt_it
    xp = bt * Hp * Wp * lane_ci * cdt_it          # padded scratch
    rolled = 2 * xp                               # two dx-shifted copies
    cols = bt * Hp * Wp * lane_3ci * cdt_it
    patch = bt * H * Wp * lane_9ci * cdt_it
    acc = _round_up(bt * H * Wp, 8) * lane_co * 4  # f32 accumulator
    return 2 * (in_blk + out_blk + w_blk) + xp + rolled + cols + patch + acc + (4 << 20)


def _choose_batch_block(B, H, W, cin, cout, in_it, out_it, cdt_it, budget):
    for bt in sorted((d for d in range(1, B + 1) if B % d == 0), reverse=True):
        if _vmem_bytes_estimate(bt, H, W, cin, cout, in_it, out_it, cdt_it) <= budget:
            return bt
    return None


# ---------------------------------------------------------------------------
# Kernel
# ---------------------------------------------------------------------------
def _conv3x3_kernel(x_ref, w_ref, b_ref, o_ref, xp_ref, *, apply_relu, roll_mode):
    """Bt images of a 3x3 same-padding conv as a single fused MXU matmul.

    x_ref : [Bt, H, W, Cin]        (VMEM block, NHWC)
    w_ref : [9*Cin, Cout]          (tap-major (dy, dx, ci) flattened weight)
    b_ref : [1, Cout]              (f32)
    o_ref : [Bt, H, W, Cout]
    xp_ref: [Bt, H+2, Wp, Cin]     (VMEM scratch; Wp = round_up(W+2, 8))
    """
    bt, Hp, Wp, cin = xp_ref.shape
    H = Hp - 2
    W = o_ref.shape[2]
    cout = o_ref.shape[3]
    cdt = xp_ref.dtype

    # Zero only the border strips -- the interior is fully overwritten below.
    # Done every step (cheap) so it stays correct when the "parallel" batch
    # axis is split across TensorCores (each core revisits its own scratch).
    xp_ref[:, 0:1, :, :] = jnp.zeros((bt, 1, Wp, cin), cdt)            # top row
    xp_ref[:, H + 1:H + 2, :, :] = jnp.zeros((bt, 1, Wp, cin), cdt)    # bottom row
    xp_ref[:, :, W:, :] = jnp.zeros((bt, Hp, Wp - W, cin), cdt)        # right pad cols
    # Image at rows [1, H+1), cols [0, W): sublane-offset-0 (aligned) store;
    # cast once into the compute dtype (bf16 patch when compute_dtype is set).
    xp_ref[:, 1:H + 1, :W, :] = x_ref[...].astype(cdt)

    xp = xp_ref[...]

    def shifted(dx):
        # Want shifted[..., c, :] == xp[..., (c + dx - 1) mod Wp, :].
        # The circular wrap to column Wp-1 (zeroed) supplies the LEFT padding,
        # column W (zeroed) supplies the RIGHT padding.
        s = (1 - dx) % Wp
        if s == 0:
            return xp
        if roll_mode == "jnp":            # pltpu.roll follows jnp.roll
            return pltpu.roll(xp, s, axis=2)
        if roll_mode == "reversed":       # opposite rotation convention
            return pltpu.roll(xp, (Wp - s) % Wp, axis=2)
        return jnp.roll(xp, s, axis=2)    # safe slice-based fallback

    # dx shifts run on the XLU (overlap the MXU); dy shifts are leading-axis
    # row slices (pure addressing).  K is laid out (dy, dx, ci) to match w_ref.
    cols = jnp.concatenate([shifted(0), shifted(1), shifted(2)], axis=-1)      # [Bt,H+2,Wp,3Cin]
    patch = jnp.concatenate([cols[:, dy:dy + H] for dy in range(3)], axis=-1)  # [Bt,H,  Wp,9Cin]

    lhs = patch.reshape(bt * H * Wp, 9 * cin)      # Wp % 8 == 0 -> layout-free merge
    acc = jnp.dot(lhs, w_ref[...], preferred_element_type=jnp.float32)
    acc = acc + b_ref[...].astype(jnp.float32)
    if apply_relu:                                  # use_relu=True branch
        acc = jnp.maximum(acc, 0.0)
    acc = acc.reshape(bt, H, Wp, cout)
    # Columns [W, Wp) are wrap/pad lanes of the flattened matmul; drop them.
    o_ref[...] = acc[:, :, :W, :].astype(o_ref.dtype)


# ---------------------------------------------------------------------------
# Wrappers
# ---------------------------------------------------------------------------
def conv3x3_same_nhwc(x_nhwc, weight, bias, *, use_relu=False,
                      compute_dtype=None, block_batch=None):
    """3x3 same-padding conv, NHWC in / NHWC out (the ODE-loop fast path).

    Keep the ODE state NHWC across the whole integration so no NCHW<->NHWC
    transpose (a full HBM round trip each) is paid per function evaluation.
    """
    B, H, W, cin = x_nhwc.shape
    cout = weight.shape[0]
    assert weight.shape == (cout, cin, 3, 3), weight.shape

    cdt = jnp.dtype(compute_dtype) if compute_dtype is not None else jnp.dtype(x_nhwc.dtype)
    in_it = jnp.dtype(x_nhwc.dtype).itemsize
    out_it = in_it
    cdt_it = cdt.itemsize

    cap = _vmem_capacity_bytes()
    budget = int(cap * 0.7)
    bt = (block_batch if block_batch is not None
          else _choose_batch_block(B, H, W, cin, cout, in_it, out_it, cdt_it, budget))
    if bt is None or B % bt != 0:
        # TODO(synk): H-tile grid axis with a 1-row halo for large H/W/C (v7x).
        raise NotImplementedError(
            f"no batch block fits the VMEM budget for shape {x_nhwc.shape} "
            f"(budget={budget} bytes); H-tiling with halo not implemented yet")
    est = _vmem_bytes_estimate(bt, H, W, cin, cout, in_it, out_it, cdt_it)
    vmem_limit = int(min(max(est, 16 << 20), cap * 3 // 4))

    Wp = _round_up(W + 2, 8)

    # Grid-invariant operands prepared once in the wrapper:
    #  * weight flattened tap-major (dy, dx, ci) -> [9*Cin, Cout], pre-cast to
    #    the MXU compute dtype (no per-step cast, half the DMA bytes for bf16)
    #  * bias kept f32 for the f32 epilogue (bias add / ReLU).
    w_cat = jnp.transpose(weight, (2, 3, 1, 0)).reshape(9 * cin, cout).astype(cdt)
    b2 = bias.reshape(1, cout).astype(jnp.float32)

    kernel = functools.partial(_conv3x3_kernel, apply_relu=use_relu,
                               roll_mode=_probe_roll_mode())

    return pl.pallas_call(
        kernel,
        out_shape=jax.ShapeDtypeStruct((B, H, W, cout), x_nhwc.dtype),
        grid_spec=pltpu.PrefetchScalarGridSpec(
            num_scalar_prefetch=0,
            grid=(B // bt,),
            in_specs=[
                pl.BlockSpec((bt, H, W, cin), lambda b: (b, 0, 0, 0)),
                pl.BlockSpec((9 * cin, cout), lambda b: (0, 0)),
                pl.BlockSpec((1, cout), lambda b: (0, 0)),
            ],
            out_specs=pl.BlockSpec((bt, H, W, cout), lambda b: (b, 0, 0, 0)),
            scratch_shapes=[pltpu.VMEM((bt, H + 2, Wp, cin), cdt)],
        ),
        compiler_params=pltpu.CompilerParams(
            dimension_semantics=("parallel",),
            vmem_limit_bytes=vmem_limit,
        ),
    )(x_nhwc, w_cat, b2)


def ode_func_wo_relu_forward(t, x_nchw, weight, bias, use_relu=False,
                             compute_dtype=None):
    """Pallas implementation of ODEFuncWORelu.forward(t, x) (NCHW API)."""
    del t  # t is unused by the module's forward
    x_nhwc = jnp.transpose(x_nchw, (0, 2, 3, 1))
    out_nhwc = conv3x3_same_nhwc(x_nhwc, weight, bias, use_relu=use_relu,
                                 compute_dtype=compute_dtype)
    return jnp.transpose(out_nhwc, (0, 3, 1, 2))


def _reference_forward(t, x_nchw, weight, bias):
    """Pure-JAX reference (matches torch Conv2d, padding=1)."""
    del t
    return jax.lax.conv_general_dilated(
        x_nchw, weight, window_strides=(1, 1), padding="SAME",
        dimension_numbers=("NCHW", "OIHW", "NCHW"),
    ) + bias.reshape(1, -1, 1, 1)


if __name__ == "__main__":
    key = jax.random.PRNGKey(0)
    k_x, k_w, k_b = jax.random.split(key, 3)

    B, C, H, W = 2, 4, 16, 16
    x = jax.random.normal(k_x, (B, C, H, W), dtype=jnp.float32)

    # Deterministic parameter init for func = Conv2d(C, C, 3, padding=1)
    fan_in = C * 3 * 3
    bound = 1.0 / (fan_in ** 0.5)
    weight = jax.random.uniform(k_w, (C, C, 3, 3), jnp.float32, -bound, bound)
    bias = jax.random.uniform(k_b, (C,), jnp.float32, -bound, bound)

    t = jnp.float32(0.0)  # unused by the forward; mirrors the torch signature

    ref = jax.block_until_ready(_reference_forward(t, x, weight, bias))

    out = jax.block_until_ready(
        ode_func_wo_relu_forward(t, x, weight, bias, use_relu=False))
    assert out.shape == (B, C, H, W)
    assert jnp.allclose(out, ref, atol=1e-4, rtol=1e-4), \
        float(jnp.max(jnp.abs(out - ref)))

    # Optional ReLU branch of the module.
    out_relu = jax.block_until_ready(
        ode_func_wo_relu_forward(t, x, weight, bias, use_relu=True))
    assert jnp.allclose(out_relu, jnp.maximum(ref, 0.0), atol=1e-4, rtol=1e-4)

    # NHWC fast path with block_batch=1: exercises a multi-step grid and the
    # per-step border re-zeroing / scratch reuse.
    x_nhwc = jnp.transpose(x, (0, 2, 3, 1))
    ref_nhwc = jnp.transpose(ref, (0, 2, 3, 1))
    out_bt1 = jax.block_until_ready(
        conv3x3_same_nhwc(x_nhwc, weight, bias, block_batch=1))
    assert jnp.allclose(out_bt1, ref_nhwc, atol=1e-4, rtol=1e-4)

    print("KERNEL_OK")
</pallas_src>

<mosaic_0001>
module attributes {stable_mosaic.version = 11 : i64} {
  func.func @k(%arg0: memref<1x3x8x128xf32, #tpu.memory_space<vmem>>, %arg1: memref<1x3x8x128xf32, #tpu.memory_space<vmem>>) attributes {dimension_semantics = [], scalar_prefetch = 0 : i64, scratch_operands = 0 : i64, tpu.core_type = #tpu.core_type<tc>} {
    %c0 = arith.constant 0 : index
    %c0_0 = arith.constant 0 : index
    %c0_1 = arith.constant 0 : index
    %c0_2 = arith.constant 0 : index
    %0 = vector.load %arg0[%c0, %c0_0, %c0_1, %c0_2] : memref<1x3x8x128xf32, #tpu.memory_space<vmem>>, vector<1x3x8x128xf32>
    %c1_i32 = arith.constant 1 : i32
    %1 = tpu.dynamic_rotate %0 by %c1_i32 dim 2 : vector<1x3x8x128xf32>, i32 -> vector<1x3x8x128xf32>
    %c0_3 = arith.constant 0 : index
    %c0_4 = arith.constant 0 : index
    %c0_5 = arith.constant 0 : index
    %c0_6 = arith.constant 0 : index
    %2 = vector.load %arg1[%c0_3, %c0_4, %c0_5, %c0_6] : memref<1x3x8x128xf32, #tpu.memory_space<vmem>>, vector<1x3x8x128xf32>
    tpu.vector_store %arg1[%c0_3, %c0_4, %c0_5, %c0_6], %1 {strides = array<i32>} : memref<1x3x8x128xf32, #tpu.memory_space<vmem>>, vector<1x3x8x128xf32>,
    return
  }
}

module attributes {stable_mosaic.version = 11 : i64} {
  func.func @_conv3x3_kernel(%arg0: i32, %arg1: memref<2x16x16x4xf32, #tpu.memory_space<vmem>>, %arg2: memref<36x4xf32, #tpu.memory_space<vmem>>, %arg3: memref<1x4xf32, #tpu.memory_space<vmem>>, %arg4: memref<2x16x16x4xf32, #tpu.memory_space<vmem>>, %arg5: memref<2x18x24x4xf32, #tpu.memory_space<vmem>>) attributes {dimension_semantics = [#tpu.dimension_semantics<parallel>], iteration_bounds = array<i64: 1>, scalar_prefetch = 0 : i64, scratch_operands = 1 : i64, tpu.core_type = #tpu.core_type<tc>, window_params = [{transform_indices = @transform_0, window_bounds = array<i64: 2, 16, 16, 4>}, {pipeline_mode = #tpu.pipeline_mode<synchronous>, transform_indices = @transform_1, window_bounds = array<i64: 36, 4>}, {pipeline_mode = #tpu.pipeline_mode<synchronous>, transform_indices = @transform_2, window_bounds = array<i64: 1, 4>}, {transform_indices = @transform_3, window_bounds = array<i64: 2, 16, 16, 4>}]} {
    %cst = arith.constant 0.000000e+00 : f32
    %0 = vector.broadcast %cst : f32 to vector<2x1x24x4xf32>
    %c0 = arith.constant 0 : index
    %c0_0 = arith.constant 0 : index
    %c0_1 = arith.constant 0 : index
    %c0_2 = arith.constant 0 : index
    %1 = vector.load %arg5[%c0, %c0_0, %c0_1, %c0_2] : memref<2x18x24x4xf32, #tpu.memory_space<vmem>>, vector<2x1x24x4xf32>
    tpu.vector_store %arg5[%c0, %c0_0, %c0_1, %c0_2], %0 {strides = array<i32>} : memref<2x18x24x4xf32, #tpu.memory_space<vmem>>, vector<2x1x24x4xf32>,
    %cst_3 = arith.constant 0.000000e+00 : f32
    %2 = vector.broadcast %cst_3 : f32 to vector<2x1x24x4xf32>
    %c0_4 = arith.constant 0 : index
    %c17 = arith.constant 17 : index
    %c0_5 = arith.constant 0 : index
    %c0_6 = arith.constant 0 : index
    %3 = vector.load %arg5[%c0_4, %c17, %c0_5, %c0_6] : memref<2x18x24x4xf32, #tpu.memory_space<vmem>>, vector<2x1x24x4xf32>
    tpu.vector_store %arg5[%c0_4, %c17, %c0_5, %c0_6], %2 {strides = array<i32>} : memref<2x18x24x4xf32, #tpu.memory_space<vmem>>, vector<2x1x24x4xf32>,
    %cst_7 = arith.constant 0.000000e+00 : f32
    %4 = vector.broadcast %cst_7 : f32 to vector<2x18x8x4xf32>
    %c0_8 = arith.constant 0 : index
    %c0_9 = arith.constant 0 : index
    %c16 = arith.constant 16 : index
    %c0_10 = arith.constant 0 : index
    %5 = vector.load %arg5[%c0_8, %c0_9, %c16, %c0_10] : memref<2x18x24x4xf32, #tpu.memory_space<vmem>>, vector<2x18x8x4xf32>
    tpu.vector_store %arg5[%c0_8, %c0_9, %c16, %c0_10], %4 {strides = array<i32>} : memref<2x18x24x4xf32, #tpu.memory_space<vmem>>, vector<2x18x8x4xf32>,
    %c0_11 = arith.constant 0 : index
    %c0_12 = arith.constant 0 : index
    %c0_13 = arith.constant 0 : index
    %c0_14 = arith.constant 0 : index
    %6 = vector.load %arg1[%c0_11, %c0_12, %c0_13, %c0_14] : memref<2x16x16x4xf32, #tpu.memory_space<vmem>>, vector<2x16x16x4xf32>
    %c0_15 = arith.constant 0 : index
    %c1 = arith.constant 1 : index
    %c0_16 = arith.constant 0 : index
    %c0_17 = arith.constant 0 : index
    %7 = vector.load %arg5[%c0_15, %c1, %c0_16, %c0_17] : memref<2x18x24x4xf32, #tpu.memory_space<vmem>>, vector<2x16x16x4xf32>
    tpu.vector_store %arg5[%c0_15, %c1, %c0_16, %c0_17], %6 {strides = array<i32>} : memref<2x18x24x4xf32, #tpu.memory_space<vmem>>, vector<2x16x16x4xf32>,
    %c0_18 = arith.constant 0 : index
    %c0_19 = arith.constant 0 : index
    %c0_20 = arith.constant 0 : index
    %c0_21 = arith.constant 0 : index
    %8 = vector.load %arg5[%c0_18, %c0_19, %c0_20, %c0_21] : memref<2x18x24x4xf32, #tpu.memory_space<vmem>>, vector<2x18x24x4xf32>
    %9 = vector.extract_strided_slice %8 {offsets = [0, 0, 23, 0], sizes = [2, 18, 1, 4], strides = [1, 1, 1, 1]} : vector<2x18x24x4xf32> to vector<2x18x1x4xf32>
    %10 = vector.extract_strided_slice %8 {offsets = [0, 0, 0, 0], sizes = [2, 18, 23, 4], strides = [1, 1, 1, 1]} : vector<2x18x24x4xf32> to vector<2x18x23x4xf32>
    %11 = tpu.concatenate %9, %10 in 2 : vector<2x18x1x4xf32>, vector<2x18x23x4xf32> -> vector<2x18x24x4xf32>
    %12 = vector.extract_strided_slice %8 {offsets = [0, 0, 1, 0], sizes = [2, 18, 23, 4], strides = [1, 1, 1, 1]} : vector<2x18x24x4xf32> to vector<2x18x23x4xf32>
    %13 = vector.extract_strided_slice %8 {offsets = [0, 0, 0, 0], sizes = [2, 18, 1, 4], strides = [1, 1, 1, 1]} : vector<2x18x24x4xf32> to vector<2x18x1x4xf32>
    %14 = tpu.concatenate %12, %13 in 2 : vector<2x18x23x4xf32>, vector<2x18x1x4xf32> -> vector<2x18x24x4xf32>
    %15 = tpu.concatenate %11, %8, %14 in 3 : vector<2x18x24x4xf32>, vector<2x18x24x4xf32>, vector<2x18x24x4xf32> -> vector<2x18x24x12xf32>
    %16 = vector.extract_strided_slice %15 {offsets = [0, 0, 0, 0], sizes = [2, 16, 24, 12], strides = [1, 1, 1, 1]} : vector<2x18x24x12xf32> to vector<2x16x24x12xf32>
    %17 = vector.extract_strided_slice %15 {offsets = [0, 1, 0, 0], sizes = [2, 16, 24, 12], strides = [1, 1, 1, 1]} : vector<2x18x24x12xf32> to vector<2x16x24x12xf32>
    %18 = vector.extract_strided_slice %15 {offsets = [0, 2, 0, 0], sizes = [2, 16, 24, 12], strides = [1, 1, 1, 1]} : vector<2x18x24x12xf32> to vector<2x16x24x12xf32>
    %19 = tpu.concatenate %16, %17, %18 in 3 : vector<2x16x24x12xf32>, vector<2x16x24x12xf32>, vector<2x16x24x12xf32> -> vector<2x16x24x36xf32>
    %20 = vector.shape_cast %19 : vector<2x16x24x36xf32> to vector<768x36xf32>
    %c0_22 = arith.constant 0 : index
    %c0_23 = arith.constant 0 : index
    %21 = vector.load %arg2[%c0_22, %c0_23] : memref<36x4xf32, #tpu.memory_space<vmem>>, vector<36x4xf32>
    %cst_24 = arith.constant dense<0.000000e+00> : vector<768x4xf32>
    %22 = tpu.matmul %20, %21, %cst_24 {dimension_numbers = #tpu.dot_dimension_numbers<[1], [0], [0], [1], [0, 0, 1, 1], [], []>} : vector<768x36xf32>, vector<36x4xf32>, vector<768x4xf32> -> vector<768x4xf32>
    %c0_25 = arith.constant 0 : index
    %c0_26 = arith.constant 0 : index
    %23 = vector.load %arg3[%c0_25, %c0_26] : memref<1x4xf32, #tpu.memory_space<vmem>>, vector<1x4xf32>
    %24 = vector.broadcast %23 : vector<1x4xf32> to vector<768x4xf32>
    %25 = arith.addf %22, %24 : vector<768x4xf32>
    %26 = vector.shape_cast %25 : vector<768x4xf32> to vector<2x16x24x4xf32>
    %27 = vector.extract_strided_slice %26 {offsets = [0, 0, 0, 0], sizes = [2, 16, 16, 4], strides = [1, 1, 1, 1]} : vector<2x16x24x4xf32> to vector<2x16x16x4xf32>
    %c0_27 = arith.constant 0 : index
    %c0_28 = arith.constant 0 : index
    %c0_29 = arith.constant 0 : index
    %c0_30 = arith.constant 0 : index
    %28 = vector.load %arg4[%c0_27, %c0_28, %c0_29, %c0_30] : memref<2x16x16x4xf32, #tpu.memory_space<vmem>>, vector<2x16x16x4xf32>
    tpu.vector_store %arg4[%c0_27, %c0_28, %c0_29, %c0_30], %27 {strides = array<i32>} : memref<2x16x16x4xf32, #tpu.memory_space<vmem>>, vector<2x16x16x4xf32>,
    return
  }
  func.func @transform_0(%arg0: i32) -> (i32, i32, i32, i32) {
    %c0_i32 = arith.constant 0 : i32
    %c0_i32_0 = arith.constant 0 : i32
    %c0_i32_1 = arith.constant 0 : i32
    %c0_i32_2 = arith.constant 0 : i32
    return %arg0, %c0_i32, %c0_i32_0, %c0_i32_1 : i32, i32, i32, i32
  }
  func.func @transform_1(%arg0: i32) -> (i32, i32) {
    %c0_i32 = arith.constant 0 : i32
    %c0_i32_0 = arith.constant 0 : i32
    %c0_i32_1 = arith.constant 0 : i32
    return %c0_i32, %c0_i32_0 : i32, i32
  }
  func.func @transform_2(%arg0: i32) -> (i32, i32) {
    %c0_i32 = arith.constant 0 : i32
    %c0_i32_0 = arith.constant 0 : i32
    %c0_i32_1 = arith.constant 0 : i32
    return %c0_i32, %c0_i32_0 : i32, i32
  }
  func.func @transform_3(%arg0: i32) -> (i32, i32, i32, i32) {
    %c0_i32 = arith.constant 0 : i32
    %c0_i32_0 = arith.constant 0 : i32
    %c0_i32_1 = arith.constant 0 : i32
    %c0_i32_2 = arith.constant 0 : i32
    return %arg0, %c0_i32, %c0_i32_0, %c0_i32_1 : i32, i32, i32, i32
  }
}

</mosaic_0001>

<bundles_post_ra>
// kernel: tpu_custom_call.1
= control target key start
LH: loop header
LB: loop body
LE: loop exit
PB: predicated region body
PF: predicated region fallthrough
CT: control target
= control target key end

     0   :  { %6 = vsyncpa [#allocation3], 0  ;;  %s117_s0 = inlined_call_operand.hbm [shape: f32[1,3,8,128], index: 0, kind: input, shape index: {}]   ;;  %s118_s1 = inlined_call_operand.hbm [shape: f32[1,3,8,128], index: 1, kind: output, shape index: {}]  }
   0x1   :  { %7 = vsyncpa [#allocation4], 0  ;;  %s97_s6 = smov [#allocation2]  }
   0x2   :  { %s13_s7 = sshll.u32 %s97_s6, 4  ;;  %s14_s7 = int_to_ptr.vmem [resolvable:$true] %s13_s7 }
   0x3   :  { %s61_s8 = scalar_lea.vmem %s14_s7, 384  ;;  %p66_p1 = scmp.lt.s32.totalorder %s14_s7, %s14_s7 }
   0x4   :  { %p62_p0 = scmp.ne.s32.totalorder %s14_s7, %s61_s8  ;;  %p67_p2 = scmp.lt.s32.totalorder %s61_s8, %s61_s8 }
   0x6   :  { %p68_p3 = por %p67_p2, %p66_p1 }
   0x8   :  { %p69_p4 = pnand %p68_p3, %p62_p0 }
   0xa   :  { %72 = shalt.err (!%p69_p4)
}
   0xb   :  { %s98_s9 = smov 128   ;;  %s99_s10 = smov 8  }
   0xc   :  { %19 = dma.hbm_to_vmem [thread:$0]  %s117_s0, 384, %s14_s7, [#allocation3], %s98_s9, %s98_s9, %s99_s10  }
   0xd   :  { %93 = dma.done.wait [#allocation3], 384  }
   0xe   :  { %94 = vsyncadd [#allocation3], 4294966912  ;;  %s100_s13 = smov [#allocation5]   ;;  %v23_v0 = vld [vmem:[#allocation2] sm:$0xff]  ;;  %v24_v1 = vld [vmem:[#allocation2 + $0x8] sm:$0xff] }
   0xf   :  { %s37_s14 = sshll.u32 %s100_s13, 4  ;;  %v25_v2 = vld [vmem:[#allocation2 + $0x10] sm:$0xff]  ;;  %v26_v3 = vrot.slane %v23_v0, 7  ;;  %v27_v4 = vrot.slane %v24_v1, 7  ;;  %s38_s14 = int_to_ptr.vmem [resolvable:$true] %s37_s14 }
  0x10   :  { %v28_v5 = vrot.slane %v25_v2, 7  ;;  %s73_s15 = scalar_lea.vmem %s38_s14, 384  ;;  %p78_p6 = scmp.lt.s32.totalorder %s38_s14, %s38_s14 }
  0x11   :  { %29 = vst [vmem:[#allocation5] sm:$0xff] %v26_v3  ;;  %30 = vst [vmem:[#allocation5 + $0x8] sm:$0xff] %v27_v4  ;;  %p74_p5 = scmp.ne.s32.totalorder %s38_s14, %s73_s15  ;;  %p79_p7 = scmp.lt.s32.totalorder %s73_s15, %s73_s15 }
  0x12   :  { %31 = vst [vmem:[#allocation5 + $0x10] sm:$0xff] %v28_v5 }
  0x13   :  { %p80_p8 = por %p79_p7, %p78_p6 }
  0x15   :  { %p81_p9 = pnand %p80_p8, %p74_p5 }
  0x17   :  { %84 = shalt.err (!%p81_p9)
}
  0x18   :  { %43 = dma.vmem_to_hbm [thread:$0]  %s38_s14, 384, %s118_s1, [#allocation4], %s98_s9, %s98_s9, %s99_s10  }
  0x19   :  { %95 = dma.done.wait [#allocation4], 384  }
  0x1a   :  { %96 = vsyncadd [#allocation4], 4294966912 }
  0x1b   :  { %47 = vsyncpa [#allocation3], 1 }
  0x1c   :  { %48 = vsyncpa [#allocation4], 1 }

// kernel: tpu_custom_call.1
= control target key start
LH: loop header
LB: loop body
LE: loop exit
PB: predicated region body
PF: predicated region fallthrough
CT: control target
= control target key end

     0   :  { %vm14_vm0 = vcmask 31744   ;;  %v4148_v0 = vmov 0.0   ;;  %s4149_s27 = smov 4   ;;  %vm481_vm1 = vcmask 1040384   ;;  %vm770_vm2 = vcmask 1046528   ;;  %s7960_s0 = inlined_call_operand.vmem [shape: f32[2,16,16,4], index: 0, kind: input, shape index: {}]   ;;  %s7961_s1 = inlined_call_operand.vmem [shape: f32[36,4], index: 1, kind: input, shape index: {}]   ;;  %s7962_s2 = inlined_call_operand.vmem [shape: f32[1,4], index: 2, kind: input, shape index: {}]   ;;  %s7963_s3 = inlined_call_operand.vmem [shape: f32[2,16,16,4], index: 3, kind: output, shape index: {}]  }
   0x1   :  { %29 = vst.msk [vmem:[#allocation2 + $0x28] sm:$0xff] %vm14_vm0, %v4148_v0  ;;  %15 = vst.msk [vmem:[#allocation2] sm:$0xff] %vm14_vm0, %v4148_v0  ;;  %v65_v1 = vld [vmem:[%s7960_s0 + $0x8] sm:$0xff]  ;;  %v64_v2 = vld [vmem:[%s7960_s0] sm:$0xff]  ;;  %vm1851_vm3 = vcmask 64512   ;;  %vm3133_vm4 = vcmask 1043456  }
   0x2   :  { %16 = vst.msk [vmem:[#allocation2 + $0x8] sm:$0xff] %vm14_vm0, %v4148_v0  ;;  %17 = vst.msk [vmem:[#allocation2 + $0x10] sm:$0xff] %vm14_vm0, %v4148_v0  ;;  %v66_v3 = vld [vmem:[%s7960_s0 + $0x10] sm:$0xff]  ;;  %v67_v4 = vld [vmem:[%s7960_s0 + $0x18] sm:$0xff]  ;;  %vm2638_vm5 = vcmask 97280   ;;  %vm2735_vm6 = vcmask 195584  }
   0x3   :  { %18 = vst.msk [vmem:[#allocation2 + $0x1b0] sm:$0xff] %vm14_vm0, %v4148_v0  ;;  %19 = vst.msk [vmem:[#allocation2 + $0x1b8] sm:$0xff] %vm14_vm0, %v4148_v0  ;;  %v68_v5 = vld [vmem:[%s7960_s0 + $0x20] sm:$0xff]  ;;  %v69_v6 = vld [vmem:[%s7960_s0 + $0x28] sm:$0xff]  ;;  %vm2844_vm7 = vcmask 293888  }
   0x4   :  { %20 = vst.msk [vmem:[#allocation2 + $0x1c0] sm:$0xff] %vm14_vm0, %v4148_v0  ;;  %22 = vst.msk [vmem:[#allocation2 + $0x198] sm:$0xff] %vm14_vm0, %v4148_v0  ;;  %v70_v7 = vld [vmem:[%s7960_s0 + $0x30] sm:$0xff]  ;;  %v71_v8 = vld [vmem:[%s7960_s0 + $0x38] sm:$0xff] }
   0x5   :  { %23 = vst.msk [vmem:[#allocation2 + $0x1a0] sm:$0xff] %vm14_vm0, %v4148_v0  ;;  %24 = vst.msk [vmem:[#allocation2 + $0x1a8] sm:$0xff] %vm14_vm0, %v4148_v0  ;;  %v72_v9 = vld [vmem:[%s7960_s0 + $0x40] sm:$0xff]  ;;  %v73_v10 = vld [vmem:[%s7960_s0 + $0x48] sm:$0xff] }
   0x6   :  { %25 = vst.msk [vmem:[#allocation2 + $0x348] sm:$0xff] %vm14_vm0, %v4148_v0  ;;  %26 = vst.msk [vmem:[#allocation2 + $0x350] sm:$0xff] %vm14_vm0, %v4148_v0  ;;  %v74_v11 = vld [vmem:[%s7960_s0 + $0x50] sm:$0xff]  ;;  %v75_v12 = vld [vmem:[%s7960_s0 + $0x58] sm:$0xff] }
   0x7   :  { %27 = vst.msk [vmem:[#allocation2 + $0x358] sm:$0xff] %vm14_vm0, %v4148_v0  ;;  %30 = vst.msk [vmem:[#allocation2 + $0x40] sm:$0xff] %vm14_vm0, %v4148_v0  ;;  %v76_v13 = vld [vmem:[%s7960_s0 + $0x60] sm:$0xff]  ;;  %v77_v14 = vld [vmem:[%s7960_s0 + $0x68] sm:$0xff] }
   0x8   :  { %31 = vst.msk [vmem:[#allocation2 + $0x58] sm:$0xff] %vm14_vm0, %v4148_v0  ;;  %32 = vst.msk [vmem:[#allocation2 + $0x70] sm:$0xff] %vm14_vm0, %v4148_v0  ;;  %v78_v15 = vld [vmem:[%s7960_s0 + $0x70] sm:$0xff]  ;;  %v79_v16 = vld [vmem:[%s7960_s0 + $0x78] sm:$0xff] }
   0x9   :  { %33 = vst.msk [vmem:[#allocation2 + $0x88] sm:$0xff] %vm14_vm0, %v4148_v0  ;;  %34 = vst.msk [vmem:[#allocation2 + $0xa0] sm:$0xff] %vm14_vm0, %v4148_v0  ;;  %v80_v17 = vld [vmem:[%s7960_s0 + $0x80] sm:$0xff]  ;;  %v81_v18 = vld [vmem:[%s7960_s0 + $0x88] sm:$0xff] }
   0xa   :  { %35 = vst.msk [vmem:[#allocation2 + $0xb8] sm:$0xff] %vm14_vm0, %v4148_v0  ;;  %36 = vst.msk [vmem:[#allocation2 + $0xd0] sm:$0xff] %vm14_vm0, %v4148_v0  ;;  %v82_v19 = vld [vmem:[%s7960_s0 + $0x90] sm:$0xff]  ;;  %v83_v20 = vld [vmem:[%s7960_s0 + $0x98] sm:$0xff] }
   0xb   :  { %37 = vst.msk [vmem:[#allocation2 + $0xe8] sm:$0xff] %vm14_vm0, %v4148_v0  ;;  %38 = vst.msk [vmem:[#allocation2 + $0x100] sm:$0xff] %vm14_vm0, %v4148_v0  ;;  %v84_v21 = vld [vmem:[%s7960_s0 + $0xa0] sm:$0xff]  ;;  %v4302_v22 = vld [vmem:[#allocation2 + $0x28] sm:$0xff] }
   0xc   :  { %39 = vst.msk [vmem:[#allocation2 + $0x118] sm:$0xff] %vm14_vm0, %v4148_v0  ;;  %40 = vst.msk [vmem:[#allocation2 + $0x130] sm:$0xff] %vm14_vm0, %v4148_v0  ;;  %v4304_v23 = vld [vmem:[#allocation2] sm:$0xff]  ;;  %1069 = vrot.lane.b32.xlu1 %v4302_v22, %s4149_s27  ;;  %v4315_v25 = vld [vmem:[#allocation2 + $0x8] sm:$0xff]  ;;  %v338_v30 = vrot.slane %v4302_v22, 7 }
   0xd   :  { %41 = vst.msk [vmem:[#allocation2 + $0x148] sm:$0xff] %vm14_vm0, %v4148_v0  ;;  %42 = vst.msk [vmem:[#allocation2 + $0x160] sm:$0xff] %vm14_vm0, %v4148_v0  ;;  %1059 = vrot.lane.b32.xlu0 %v4304_v23, %s4149_s27  ;;  %v482_v31 = vrot.slane %v4304_v23, 7  ;;  %v483_v36 = vrot.slane %v4315_v25, 7  ;;  %v85_v38 = vld [vmem:[%s7960_s0 + $0xa8] sm:$0xff]  ;;  %v86_v43 = vld [vmem:[%s7960_s0 + $0xb0] sm:$0xff] }
   0xe   :  { %43 = vst.msk [vmem:[#allocation2 + $0x178] sm:$0xff] %vm14_vm0, %v4148_v0  ;;  %44 = vst.msk [vmem:[#allocation2 + $0x190] sm:$0xff] %vm14_vm0, %v4148_v0  ;;  %v4341_v34 = vld [vmem:[#allocation2 + $0x40] sm:$0xff]  ;;  %v87_v47 = vld [vmem:[%s7960_s0 + $0xb8] sm:$0xff] }
   0xf   :  { %47 = vst.msk [vmem:[#allocation2 + $0x1d8] sm:$0xff] %vm14_vm0, %v4148_v0  ;;  %48 = vst.msk [vmem:[#allocation2 + $0x1f0] sm:$0xff] %vm14_vm0, %v4148_v0  ;;  %v339_v41 = vrot.slane %v4341_v34, 7  ;;  %v4357_v42 = vld [vmem:[#allocation2 + $0x58] sm:$0xff]  ;;  %v88_v48 = vld [vmem:[%s7960_s0 + $0xc0] sm:$0xff]  ;;  %v4392_v54 = vsel %vm481_vm1, %v482_v31, %v483_v36 }
  0x10   :  { %49 = vst.msk [vmem:[#allocation2 + $0x208] sm:$0xff] %vm14_vm0, %v4148_v0  ;;  %50 = vst.msk [vmem:[#allocation2 + $0x220] sm:$0xff] %vm14_vm0, %v4148_v0  ;;  %v340_v46 = vrot.slane %v4357_v42, 7  ;;  %v89_v51 = vld [vmem:[%s7960_s0 + $0xc8] sm:$0xff]  ;;  %v90_v52 = vld [vmem:[%s7960_s0 + $0xd0] sm:$0xff] }
  0x11   :  { %51 = vst.msk [vmem:[#allocation2 + $0x238] sm:$0xff] %vm14_vm0, %v4148_v0  ;;  %52 = vst.msk [vmem:[#allocation2 + $0x250] sm:$0xff] %vm14_vm0, %v4148_v0  ;;  %1061 = vrot.lane.b32.xlu0 %v4315_v25, %s4149_s27  ;;  %v91_v55 = vld [vmem:[%s7960_s0 + $0xd8] sm:$0xff]  ;;  %v92_v56 = vld [vmem:[%s7960_s0 + $0xe0] sm:$0xff] }
  0x12   :  { %53 = vst.msk [vmem:[#allocation2 + $0x268] sm:$0xff] %vm14_vm0, %v4148_v0  ;;  %54 = vst.msk [vmem:[#allocation2 + $0x280] sm:$0xff] %vm14_vm0, %v4148_v0  ;;  %v93_v59 = vld [vmem:[%s7960_s0 + $0xe8] sm:$0xff]  ;;  %v94_v60 = vld [vmem:[%s7960_s0 + $0xf0] sm:$0xff] }
  0x13   :  { %55 = vst.msk [vmem:[#allocation2 + $0x298] sm:$0xff] %vm14_vm0, %v4148_v0  ;;  %56 = vst.msk [vmem:[#allocation2 + $0x2b0] sm:$0xff] %vm14_vm0, %v4148_v0 }
  0x14   :  { %57 = vst.msk [vmem:[#allocation2 + $0x2c8] sm:$0xff] %vm14_vm0, %v4148_v0  ;;  %58 = vst.msk [vmem:[#allocation2 + $0x2e0] sm:$0xff] %vm14_vm0, %v4148_v0 }
  0x15   :  { %59 = vst.msk [vmem:[#allocation2 + $0x2f8] sm:$0xff] %vm14_vm0, %v4148_v0  ;;  %60 = vst.msk [vmem:[#allocation2 + $0x310] sm:$0xff] %vm14_vm0, %v4148_v0 }
  0x16   :  { %61 = vst.msk [vmem:[#allocation2 + $0x328] sm:$0xff] %vm14_vm0, %v4148_v0  ;;  %62 = vst.msk [vmem:[#allocation2 + $0x340] sm:$0xff] %vm14_vm0, %v4148_v0 }
  0x17   :  { %28 = vst.msk [vmem:[#allocation2 + $0x10] sm:$0xff] %vm14_vm0, %v4148_v0  ;;  %45 = vst.msk [vmem:[#allocation2 + $0x1a8] sm:$0xff] %vm14_vm0, %v4148_v0 }
  0x18   :  { %46 = vst.msk [vmem:[#allocation2 + $0x1c0] sm:$0xff] %vm14_vm0, %v4148_v0  ;;  %63 = vst.msk [vmem:[#allocation2 + $0x358] sm:$0xff] %vm14_vm0, %v4148_v0 }
  0x19   :  { %130 = vst.msk [vmem:[#allocation2 + $0x20] sm:$0xff] %vm14_vm0, %v65_v1  ;;  %129 = vst.msk [vmem:[#allocation2 + $0x18] sm:$0xff] %vm14_vm0, %v64_v2  ;;  %v95_v1 = vld [vmem:[%s7960_s0 + $0xf8] sm:$0xff] }
  0x1a   :  { %131 = vst.msk [vmem:[#allocation2 + $0x30] sm:$0xff] %vm14_vm0, %v66_v3  ;;  %132 = vst.msk [vmem:[#allocation2 + $0x38] sm:$0xff] %vm14_vm0, %v67_v4  ;;  %v4450_v4 = vld [vmem:[#allocation2 + $0x70] sm:$0xff] }
  0x1b   :  { %133 = vst.msk [vmem:[#allocation2 + $0x48] sm:$0xff] %vm14_vm0, %v68_v5  ;;  %134 = vst.msk [vmem:[#allocation2 + $0x50] sm:$0xff] %vm14_vm0, %v69_v6 }
  0x1c   :  { %135 = vst.msk [vmem:[#allocation2 + $0x60] sm:$0xff] %vm14_vm0, %v70_v7  ;;  %136 = vst.msk [vmem:[#allocation2 + $0x68] sm:$0xff] %vm14_vm0, %v71_v8 }
  0x1d   :  { %137 = vst.msk [vmem:[#allocation2 + $0x78] sm:$0xff] %vm14_vm0, %v72_v9  ;;  %138 = vst.msk [vmem:[#allocation2 + $0x80] sm:$0xff] %vm14_vm0, %v73_v10  ;;  %v341_v9 = vrot.slane %v4450_v4, 7 }
  0x1e   :  { %139 = vst.msk [vmem:[#allocation2 + $0x90] sm:$0xff] %vm14_vm0, %v74_v11  ;;  %140 = vst.msk [vmem:[#allocation2 + $0x98] sm:$0xff] %vm14_vm0, %v75_v12  ;;  %v4313_v24 = vld [vmem:[#allocation2 + $0x10] sm:$0xff]  ;;  %v4460_v11 = vld [vmem:[#allocation2 + $0x88] sm:$0xff] }
  0x1f   :  { %141 = vst.msk [vmem:[#allocation2 + $0xa8] sm:$0xff] %vm14_vm0, %v76_v13  ;;  %142 = vst.msk [vmem:[#allocation2 + $0xb0] sm:$0xff] %vm14_vm0, %v77_v14  ;;  %1063 = vrot.lane.b32.xlu1 %v4313_v24, %s4149_s27  ;;  %v337_v32 = vrot.slane %v4313_v24, 7  ;;  %v342_v14 = vrot.slane %v4460_v11, 7 }
  0x20   :  { %143 = vst.msk [vmem:[#allocation2 + $0xc0] sm:$0xff] %vm14_vm0, %v78_v15  ;;  %144 = vst.msk [vmem:[#allocation2 + $0xc8] sm:$0xff] %vm14_vm0, %v79_v16  ;;  %v4321_v26 = vld [vmem:[#allocation2 + $0x20] sm:$0xff]  ;;  %v4323_v27 = vld [vmem:[#allocation2 + $0x18] sm:$0xff] }
  0x21   :  { %145 = vst.msk [vmem:[#allocation2 + $0xd8] sm:$0xff] %vm14_vm0, %v80_v17  ;;  %146 = vst.msk [vmem:[#allocation2 + $0xe0] sm:$0xff] %vm14_vm0, %v81_v18  ;;  %1067 = vrot.lane.b32.xlu0 %v4321_v26, %s4149_s27  ;;  %v4329_v28 = vld [vmem:[#allocation2 + $0x30] sm:$0xff]  ;;  %v4331_v29 = vld [vmem:[#allocation2 + $0x38] sm:$0xff]  ;;  %v487_v33 = vrot.slane %v4321_v26, 7  ;;  %v486_v37 = vrot.slane %v4323_v27, 7  ;;  %v4378_v50 = vsel %vm481_vm1, %v337_v32, %v482_v31  ;;  %v4389_v53 = vsel %vm481_vm1, %v483_v36, %v337_v32 }
  0x22   :  { %147 = vst.msk [vmem:[#allocation2 + $0xf0] sm:$0xff] %vm14_vm0, %v82_v19  ;;  %148 = vst.msk [vmem:[#allocation2 + $0xf8] sm:$0xff] %vm14_vm0, %v83_v20  ;;  %v4343_v35 = vld [vmem:[#allocation2 + $0x48] sm:$0xff]  ;;  %v490_v39 = vrot.slane %v4329_v28, 7  ;;  %v491_v40 = vrot.slane %v4331_v29, 7  ;;  %v4364_v45 = vld [vmem:[#allocation2 + $0x50] sm:$0xff] }
  0x23   :  { %149 = vst.msk [vmem:[#allocation2 + $0x108] sm:$0xff] %vm14_vm0, %v84_v21  ;;  %1065 = vrot.lane.b32.xlu1 %v4323_v27, %s4149_s27  ;;  %150 = vst.msk [vmem:[#allocation2 + $0x110] sm:$0xff] %vm14_vm0, %v85_v38  ;;  %v494_v44 = vrot.slane %v4343_v35, 7  ;;  %v4375_v49 = vsel %vm481_vm1, %v487_v33, %v338_v30  ;;  %v4403_v57 = vsel %vm481_vm1, %v486_v37, %v487_v33  ;;  %v4426_v63 = vld [vmem:[#allocation2 + $0x60] sm:$0xff]  ;;  %v4428_v0 = vld [vmem:[#allocation2 + $0x68] sm:$0xff]  ;;  %v495_v6 = vrot.slane %v4364_v45, 7 }
  0x24   :  { %151 = vst.msk [vmem:[#allocation2 + $0x120] sm:$0xff] %vm14_vm0, %v86_v43  ;;  %8057 = vst [vmem:[#allocation3_spill] sm:$0xff] %v4375_v49  ;;  %v4406_v58 = vsel %vm481_vm1, %v338_v30, %v486_v37  ;;  %v4421_v61 = vsel %vm481_vm1, %v339_v41, %v490_v39  ;;  %v4424_v62 = vsel %vm481_vm1, %v490_v39, %v491_v40  ;;  %v4452_v5 = vld [vmem:[#allocation2 + $0x78] sm:$0xff]  ;;  %v498_v7 = vrot.slane %v4426_v63, 7  ;;  %v4458_v10 = vld [vmem:[#allocation2 + $0x80] sm:$0xff] }
  0x25   :  { %1071 = vrot.lane.b32.xlu0 %v4329_v28, %s4149_s27  ;;  %8058 = vst [vmem:[#allocation4_spill] sm:$0xff] %v4378_v50  ;;  %152 = vst.msk [vmem:[#allocation2 + $0x128] sm:$0xff] %vm14_vm0, %v87_v47  ;;  %v4436_v2 = vsel %vm481_vm1, %v491_v40, %v339_v41  ;;  %v4443_v3 = vsel %vm481_vm1, %v340_v46, %v494_v44  ;;  %v499_v8 = vrot.slane %v4428_v0, 7  ;;  %v4462_v12 = vld [vmem:[#allocation2 + $0x90] sm:$0xff]  ;;  %v502_v13 = vrot.slane %v4452_v5, 7  ;;  %v4470_v15 = vld [vmem:[#allocation2 + $0x98] sm:$0xff] }
  0x26   :  { %153 = vst.msk [vmem:[#allocation2 + $0x138] sm:$0xff] %vm14_vm0, %v88_v48  ;;  %8059 = vst [vmem:[#allocation5_spill] sm:$0xff] %v4389_v53  ;;  %v4472_v16 = vld [vmem:[#allocation2 + $0xa0] sm:$0xff]  ;;  %v4474_v17 = vld [vmem:[#allocation2 + $0xa8] sm:$0xff]  ;;  %v503_v18 = vrot.slane %v4458_v10, 7  ;;  %v506_v19 = vrot.slane %v4462_v12, 7  ;;  %v4509_v47 = vsel %vm481_vm1, %v494_v44, %v495_v6  ;;  %v4514_v48 = vsel %vm481_vm1, %v495_v6, %v340_v46 }
  0x27   :  { %1073 = vrot.lane.b32.xlu1 %v4331_v29, %s4149_s27  ;;  %8060 = vst [vmem:[#allocation6_spill] sm:$0xff] %v4392_v54  ;;  %154 = vst.msk [vmem:[#allocation2 + $0x140] sm:$0xff] %vm14_vm0, %v89_v51  ;;  %v507_v20 = vrot.slane %v4470_v15, 7  ;;  %v4479_v21 = vld [vmem:[#allocation2 + $0xb0] sm:$0xff]  ;;  %v4481_v30 = vld [vmem:[#allocation2 + $0xb8] sm:$0xff]  ;;  %v343_v32 = vrot.slane %v4472_v16, 7  ;;  %v4517_v51 = vsel %vm481_vm1, %v341_v9, %v498_v7 }
  0x28   :  { %155 = vst.msk [vmem:[#allocation2 + $0x150] sm:$0xff] %vm14_vm0, %v90_v52  ;;  %8061 = vst [vmem:[#allocation7_spill] sm:$0xff] %v4403_v57  ;;  %v4483_v31 = vld [vmem:[#allocation2 + $0xc0] sm:$0xff]  ;;  %v510_v33 = vrot.slane %v4474_v17, 7  ;;  %v344_v36 = vrot.slane %v4481_v30, 7  ;;  %v4488_v37 = vld [vmem:[#allocation2 + $0xc8] sm:$0xff]  ;;  %v4520_v52 = vsel %vm481_vm1, %v498_v7, %v499_v8 }
  0x29   :  { %1075 = vrot.lane.b32.xlu0 %v4341_v34, %s4149_s27  ;;  %8062 = vst [vmem:[#allocation8_spill] sm:$0xff] %v4406_v58  ;;  %156 = vst.msk [vmem:[#allocation2 + $0x158] sm:$0xff] %vm14_vm0, %v91_v55  ;;  %v96_v38 = vld [vmem:[%s7960_s0 + $0x100] sm:$0xff]  ;;  %v97_v39 = vld [vmem:[%s7960_s0 + $0x108] sm:$0xff]  ;;  %v511_v44 = vrot.slane %v4479_v21, 7  ;;  %v514_v55 = vrot.slane %v4483_v31, 7  ;;  %v4573_v53 = vsel %vm481_vm1, %v343_v32, %v506_v19 }
  0x2a   :  { %157 = vst.msk [vmem:[#allocation2 + $0x168] sm:$0xff] %vm14_vm0, %v92_v56  ;;  %8063 = vst [vmem:[#allocation9_spill] sm:$0xff] %v4421_v61  ;;  %v4496_v40 = vld [vmem:[#allocation2 + $0xd0] sm:$0xff]  ;;  %v99_v43 = vld [vmem:[%s7960_s0 + $0x118] sm:$0xff]  ;;  %v515_v6 = vrot.slane %v4488_v37, 7  ;;  %v4590_v54 = vsel %vm481_vm1, %v344_v36, %v510_v33  ;;  %v791_v61 = vrot.slane %v4426_v63, 1 }
  0x2b   :  { %1077 = vrot.lane.b32.xlu1 %v4343_v35, %s4149_s27  ;;  %8064 = vst [vmem:[#allocation10_spill] sm:$0xff] %v4424_v62  ;;  %158 = vst.msk [vmem:[#allocation2 + $0x170] sm:$0xff] %vm14_vm0, %v93_v59  ;;  %v98_v41 = vld [vmem:[%s7960_s0 + $0x110] sm:$0xff]  ;;  %v4528_v56 = vld [vmem:[#allocation2 + $0xd8] sm:$0xff]  ;;  %v345_v7 = vrot.slane %v4496_v40, 7 }
  0x2c   :  { %159 = vst.msk [vmem:[#allocation2 + $0x180] sm:$0xff] %vm14_vm0, %v94_v60  ;;  %8065 = vst [vmem:[#allocation11_spill] sm:$0xff] %v4436_v2  ;;  %v100_v46 = vld [vmem:[%s7960_s0 + $0x120] sm:$0xff]  ;;  %v101_v59 = vld [vmem:[%s7960_s0 + $0x128] sm:$0xff]  ;;  %v4539_v60 = vsel %vm481_vm1, %v499_v8, %v341_v9  ;;  %v4557_v9 = vsel %vm481_vm1, %v502_v13, %v503_v18 }
  0x2d   :  { %1079 = vrot.lane.b32.xlu0 %v4364_v45, %s4149_s27  ;;  %8066 = vst [vmem:[#allocation12_spill] sm:$0xff] %v4443_v3  ;;  %160 = vst.msk [vmem:[#allocation2 + $0x188] sm:$0xff] %vm14_vm0, %v95_v1  ;;  %v4542_v1 = vsel %vm481_vm1, %v342_v14, %v502_v13  ;;  %v103_v8 = vld [vmem:[%s7960_s0 + $0x138] sm:$0xff]  ;;  %v105_v13 = vld [vmem:[%s7960_s0 + $0x148] sm:$0xff] }
  0x2e   :  { %161 = vst.msk [vmem:[#allocation2 + $0x1c8] sm:$0xff] %vm14_vm0, %v96_v38  ;;  %162 = vst.msk [vmem:[#allocation2 + $0x1d0] sm:$0xff] %vm14_vm0, %v97_v39  ;;  %v4546_v38 = vld [vmem:[#allocation2 + $0xe8] sm:$0xff]  ;;  %v102_v39 = vld [vmem:[%s7960_s0 + $0x130] sm:$0xff] }
  0x2f   :  { %1081 = vrot.lane.b32.xlu1 %v4357_v42, %s4149_s27  ;;  %8067 = vst [vmem:[#allocation13_spill] sm:$0xff] %v4509_v47  ;;  %8068 = vst [vmem:[#allocation14_spill] sm:$0xff] %v4514_v48  ;;  %v4898_v47 = vld [vmem:[#allocation2 + $0x190] sm:$0xff]  ;;  %v4900_v3 = vld [vmem:[#allocation2 + $0x198] sm:$0xff] }
  0x30   :  { %8069 = vst [vmem:[#allocation15_spill] sm:$0xff] %v4517_v51  ;;  %8070 = vst [vmem:[#allocation16_spill] sm:$0xff] %v4520_v52  ;;  %v781_v51 = vrot.slane %v4329_v28, 1  ;;  %v786_v28 = vrot.slane %v4343_v35, 1  ;;  %v789_v35 = vrot.slane %v4357_v42, 1  ;;  %v4931_v62 = vld [vmem:[#allocation2 + $0x1b8] sm:$0xff] }
  0x31   :  { %1083 = vrot.lane.b32.xlu0 %v4426_v63, %s4149_s27  ;;  %163 = vst.msk [vmem:[#allocation2 + $0x1e0] sm:$0xff] %vm14_vm0, %v98_v41  ;;  %164 = vst.msk [vmem:[#allocation2 + $0x1e8] sm:$0xff] %vm14_vm0, %v99_v43  ;;  %v4560_v41 = vsel %vm481_vm1, %v503_v18, %v342_v14  ;;  %v518_v43 = vrot.slane %v4528_v56, 7  ;;  %v4576_v14 = vsel %vm481_vm1, %v506_v19, %v507_v20  ;;  %v106_v18 = vld [vmem:[%s7960_s0 + $0x150] sm:$0xff]  ;;  %v108_v19 = vld [vmem:[%s7960_s0 + $0x160] sm:$0xff]  ;;  %v792_v42 = vrot.slane %v4428_v0, 1 }
  0x32   :  { %8071 = vst [vmem:[#allocation17_spill] sm:$0xff] %v4539_v60  ;;  %8072 = vst [vmem:[#allocation18_spill] sm:$0xff] %v4542_v1  ;;  %v123_v1 = vld [vmem:[%s7960_s0 + $0x1d8] sm:$0xff]  ;;  %v4940_v49 = vsel %vm770_vm2, %v789_v35, %v786_v28  ;;  %v4946_v58 = vld [vmem:[#allocation2 + $0x1c0] sm:$0xff]  ;;  %v796_v63 = vrot.slane %v4452_v5, 1 }
  0x33   :  { %1085 = vrot.lane.b32.xlu1 %v4428_v0, %s4149_s27  ;;  %165 = vst.msk [vmem:[#allocation2 + $0x1f8] sm:$0xff] %vm14_vm0, %v100_v46  ;;  %166 = vst.msk [vmem:[#allocation2 + $0x200] sm:$0xff] %vm14_vm0, %v101_v59  ;;  %v346_v46 = vrot.slane %v4546_v38, 7  ;;  %v104_v59 = vld [vmem:[%s7960_s0 + $0x140] sm:$0xff]  ;;  %v797_v0 = vrot.slane %v4458_v10, 1 }
  0x34   :  { %8073 = vst [vmem:[#allocation19_spill] sm:$0xff] %v4557_v9  ;;  %8074 = vst [vmem:[#allocation20_spill] sm:$0xff] %v4560_v41  ;;  %v122_v9 = vld [vmem:[%s7960_s0 + $0x1d0] sm:$0xff]  ;;  %v4883_v52 = vld [vmem:[#allocation2 + $0x188] sm:$0xff] }
  0x35   :  { %1087 = vrot.lane.b32.xlu0 %v4450_v4, %s4149_s27  ;;  %167 = vst.msk [vmem:[#allocation2 + $0x210] sm:$0xff] %vm14_vm0, %v102_v39  ;;  %168 = vst.msk [vmem:[#allocation2 + $0x218] sm:$0xff] %vm14_vm0, %v103_v8  ;;  %v107_v39 = vld [vmem:[%s7960_s0 + $0x158] sm:$0xff]  ;;  %v4587_v8 = vsel %vm481_vm1, %v507_v20, %v343_v32  ;;  %v109_v20 = vld [vmem:[%s7960_s0 + $0x168] sm:$0xff]  ;;  %v4605_v32 = vsel %vm481_vm1, %v510_v33, %v511_v44  ;;  %v4622_v33 = vsel %vm481_vm1, %v514_v55, %v515_v6 }
  0x36   :  { %8075 = vst [vmem:[#allocation21_spill] sm:$0xff] %v4573_v53  ;;  %8076 = vst [vmem:[#allocation22_spill] sm:$0xff] %v4576_v14  ;;  %v115_v14 = vld [vmem:[%s7960_s0 + $0x198] sm:$0xff]  ;;  %v4948_v57 = vld [vmem:[#allocation2 + $0x1c8] sm:$0xff] }
  0x37   :  { %1089 = vrot.lane.b32.xlu1 %v4452_v5, %s4149_s27  ;;  %169 = vst.msk [vmem:[#allocation2 + $0x228] sm:$0xff] %vm14_vm0, %v104_v59  ;;  %170 = vst.msk [vmem:[#allocation2 + $0x230] sm:$0xff] %vm14_vm0, %v105_v13  ;;  %v4608_v59 = vsel %vm481_vm1, %v511_v44, %v344_v36  ;;  %v110_v13 = vld [vmem:[%s7960_s0 + $0x170] sm:$0xff]  ;;  %v4627_v36 = vsel %vm481_vm1, %v515_v6, %v345_v7  ;;  %v4630_v44 = vsel %vm481_vm1, %v346_v46, %v518_v43 }
  0x38   :  { %8077 = vst [vmem:[#allocation23_spill] sm:$0xff] %v4587_v8  ;;  %8078 = vst [vmem:[#allocation24_spill] sm:$0xff] %v4590_v54  ;;  %v4664_v54 = vld [vmem:[#allocation2 + $0x110] sm:$0xff] }
  0x39   :  { %1091 = vrot.lane.b32.xlu0 %v4458_v10, %s4149_s27  ;;  %171 = vst.msk [vmem:[#allocation2 + $0x240] sm:$0xff] %vm14_vm0, %v106_v18  ;;  %172 = vst.msk [vmem:[#allocation2 + $0x248] sm:$0xff] %vm14_vm0, %v107_v39  ;;  %v111_v18 = vld [vmem:[%s7960_s0 + $0x178] sm:$0xff]  ;;  %v4619_v39 = vsel %vm481_vm1, %v345_v7, %v514_v55  ;;  %v114_v8 = vld [vmem:[%s7960_s0 + $0x190] sm:$0xff]  ;;  %v799_v10 = vrot.slane %v4460_v11, 1 }
  0x3a   :  { %8079 = vst [vmem:[#allocation25_spill] sm:$0xff] %v4605_v32  ;;  %8080 = vst [vmem:[#allocation26_spill] sm:$0xff] %v4608_v59  ;;  %v112_v59 = vld [vmem:[%s7960_s0 + $0x180] sm:$0xff]  ;;  %v113_v32 = vld [vmem:[%s7960_s0 + $0x188] sm:$0xff] }
  0x3b   :  { %1093 = vrot.lane.b32.xlu1 %v4460_v11, %s4149_s27  ;;  %173 = vst.msk [vmem:[#allocation2 + $0x258] sm:$0xff] %vm14_vm0, %v108_v19  ;;  %174 = vst.msk [vmem:[#allocation2 + $0x260] sm:$0xff] %vm14_vm0, %v109_v20  ;;  %v4636_v19 = vld [vmem:[#allocation2 + $0xe0] sm:$0xff]  ;;  %v4639_v20 = vld [vmem:[#allocation2 + $0xf0] sm:$0xff] }
  0x3c   :  { %8081 = vst [vmem:[#allocation27_spill] sm:$0xff] %v4619_v39  ;;  %8082 = vst [vmem:[#allocation28_spill] sm:$0xff] %v4622_v33  ;;  %v519_v55 = vrot.slane %v4636_v19, 7  ;;  %v522_v6 = vrot.slane %v4639_v20, 7  ;;  %v4654_v33 = vld [vmem:[#allocation2 + $0x118] sm:$0xff] }
  0x3d   :  { %1095 = vrot.lane.b32.xlu0 %v4462_v12, %s4149_s27  ;;  %175 = vst.msk [vmem:[#allocation2 + $0x270] sm:$0xff] %vm14_vm0, %v110_v13  ;;  %176 = vst.msk [vmem:[#allocation2 + $0x278] sm:$0xff] %vm14_vm0, %v111_v18  ;;  %v4641_v13 = vld [vmem:[#allocation2 + $0xf8] sm:$0xff]  ;;  %v4643_v18 = vld [vmem:[#allocation2 + $0x100] sm:$0xff]  ;;  %v348_v50 = vrot.slane %v4654_v33, 7 }
  0x3e   :  { %8083 = vst [vmem:[#allocation29_spill] sm:$0xff] %v4627_v36  ;;  %8084 = vst [vmem:[#allocation30_spill] sm:$0xff] %v4630_v44  ;;  %v523_v7 = vrot.slane %v4641_v13, 7  ;;  %v347_v44 = vrot.slane %v4643_v18, 7  ;;  %v4652_v36 = vld [vmem:[#allocation2 + $0x108] sm:$0xff]  ;;  %v4675_v53 = vsel %vm481_vm1, %v518_v43, %v519_v55  ;;  %v4678_v41 = vsel %vm481_vm1, %v519_v55, %v346_v46  ;;  %v116_v43 = vld [vmem:[%s7960_s0 + $0x1a0] sm:$0xff] }
  0x3f   :  { %1097 = vrot.lane.b32.xlu1 %v4470_v15, %s4149_s27  ;;  %v526_v39 = vrot.slane %v4652_v36, 7  ;;  %177 = vst.msk [vmem:[#allocation2 + $0x288] sm:$0xff] %vm14_vm0, %v112_v59  ;;  %178 = vst.msk [vmem:[#allocation2 + $0x290] sm:$0xff] %vm14_vm0, %v113_v32  ;;  %v527_v32 = vrot.slane %v4664_v54, 7  ;;  %v117_v55 = vld [vmem:[%s7960_s0 + $0x1a8] sm:$0xff] }
  0x40   :  { %8085 = vst [vmem:[#allocation31_spill] sm:$0xff] %v4675_v53  ;;  %8086 = vst [vmem:[#allocation32_spill] sm:$0xff] %v4678_v41  ;;  %v4691_v59 = vsel %vm481_vm1, %v347_v44, %v522_v6  ;;  %v4694_v46 = vsel %vm481_vm1, %v522_v6, %v523_v7  ;;  %v119_v6 = vld [vmem:[%s7960_s0 + $0x1b8] sm:$0xff] }
  0x41   :  { %1099 = vrot.lane.b32.xlu0 %v4472_v16, %s4149_s27  ;;  %179 = vst.msk [vmem:[#allocation2 + $0x2a0] sm:$0xff] %vm14_vm0, %v114_v8  ;;  %180 = vst.msk [vmem:[#allocation2 + $0x2a8] sm:$0xff] %vm14_vm0, %v115_v14  ;;  %v4702_v14 = vsel %vm481_vm1, %v523_v7, %v347_v44  ;;  %v118_v8 = vld [vmem:[%s7960_s0 + $0x1b0] sm:$0xff]  ;;  %v120_v44 = vld [vmem:[%s7960_s0 + $0x1c0] sm:$0xff] }
  0x42   :  { %8087 = vst [vmem:[#allocation33_spill] sm:$0xff] %v4691_v59  ;;  %8088 = vst [vmem:[#allocation34_spill] sm:$0xff] %v4694_v46  ;;  %v4711_v46 = vsel %vm481_vm1, %v348_v50, %v526_v39  ;;  %v121_v7 = vld [vmem:[%s7960_s0 + $0x1c8] sm:$0xff] }
  0x43   :  { %1101 = vrot.lane.b32.xlu1 %v4474_v17, %s4149_s27  ;;  %181 = vst.msk [vmem:[#allocation2 + $0x2b8] sm:$0xff] %vm14_vm0, %v116_v43  ;;  %182 = vst.msk [vmem:[#allocation2 + $0x2c0] sm:$0xff] %vm14_vm0, %v117_v55  ;;  %v4727_v43 = vsel %vm481_vm1, %v526_v39, %v527_v32  ;;  %v4731_v55 = vsel %vm481_vm1, %v527_v32, %v348_v50  ;;  %v4746_v50 = vld [vmem:[#allocation2 + $0x138] sm:$0xff]  ;;  %v4748_v32 = vld [vmem:[#allocation2 + $0x148] sm:$0xff] }
  0x44   :  { %8089 = vst [vmem:[#allocation35_spill] sm:$0xff] %v4702_v14  ;;  %8090 = vst [vmem:[#allocation36_spill] sm:$0xff] %v4711_v46  ;;  %v350_v46 = vrot.slane %v4748_v32, 7  ;;  %v4752_v14 = vld [vmem:[#allocation2 + $0x140] sm:$0xff] }
  0x45   :  { %1103 = vrot.lane.b32.xlu0 %v4479_v21, %s4149_s27  ;;  %183 = vst.msk [vmem:[#allocation2 + $0x2d0] sm:$0xff] %vm14_vm0, %v118_v8  ;;  %184 = vst.msk [vmem:[#allocation2 + $0x2d8] sm:$0xff] %vm14_vm0, %v119_v6  ;;  %v4733_v8 = vld [vmem:[#allocation2 + $0x120] sm:$0xff]  ;;  %v4735_v6 = vld [vmem:[#allocation2 + $0x128] sm:$0xff]  ;;  %v535_v59 = vrot.slane %v4752_v14, 7 }
  0x46   :  { %185 = vst.msk [vmem:[#allocation2 + $0x2e8] sm:$0xff] %vm14_vm0, %v120_v44  ;;  %8091 = vst [vmem:[#allocation37_spill] sm:$0xff] %v4727_v43  ;;  %v4737_v44 = vld [vmem:[#allocation2 + $0x130] sm:$0xff]  ;;  %v530_v39 = vrot.slane %v4733_v8, 7  ;;  %v531_v43 = vrot.slane %v4735_v6, 7 }
  0x47   :  { %1105 = vrot.lane.b32.xlu1 %v4481_v30, %s4149_s27  ;;  %186 = vst.msk [vmem:[#allocation2 + $0x2f0] sm:$0xff] %vm14_vm0, %v121_v7  ;;  %8092 = vst [vmem:[#allocation38_spill] sm:$0xff] %v4731_v55  ;;  %v349_v7 = vrot.slane %v4737_v44, 7  ;;  %v534_v55 = vrot.slane %v4746_v50, 7 }
  0x48   :  { %v4763_v53 = vsel %vm481_vm1, %v530_v39, %v531_v43  ;;  %187 = vst.msk [vmem:[#allocation2 + $0x300] sm:$0xff] %vm14_vm0, %v122_v9  ;;  %188 = vst.msk [vmem:[#allocation2 + $0x308] sm:$0xff] %vm14_vm0, %v123_v1  ;;  %v4794_v9 = vld [vmem:[#allocation2 + $0x150] sm:$0xff] }
  0x49   :  { %1107 = vrot.lane.b32.xlu0 %v4483_v31, %s4149_s27  ;;  %v4760_v41 = vsel %vm481_vm1, %v349_v7, %v530_v39  ;;  %8094 = vst [vmem:[#allocation40_spill] sm:$0xff] %v4763_v53  ;;  %v4772_v60 = vsel %vm481_vm1, %v531_v43, %v349_v7  ;;  %v124_v39 = vld [vmem:[%s7960_s0 + $0x1e0] sm:$0xff]  ;;  %v4780_v53 = vsel %vm481_vm1, %v350_v46, %v534_v55  ;;  %8098 = vst [vmem:[#allocation44_spill] sm:$0xff] %v4794_v9  ;;  %v4796_v43 = vld [vmem:[#allocation2 + $0x158] sm:$0xff] }
  0x4a   :  { %8093 = vst [vmem:[#allocation39_spill] sm:$0xff] %v4760_v41  ;;  %8095 = vst [vmem:[#allocation41_spill] sm:$0xff] %v4772_v60  ;;  %v125_v41 = vld [vmem:[%s7960_s0 + $0x1e8] sm:$0xff]  ;;  %v4791_v1 = vsel %vm481_vm1, %v534_v55, %v535_v59  ;;  %v7965_v7 = vrot.slane %v4794_v9, 7  ;;  %v126_v60 = vld [vmem:[%s7960_s0 + $0x1f0] sm:$0xff] }
  0x4b   :  { %1109 = vrot.lane.b32.xlu1 %v4488_v37, %s4149_s27  ;;  %8096 = vst [vmem:[#allocation42_spill] sm:$0xff] %v4780_v53  ;;  %189 = vst.msk [vmem:[#allocation2 + $0x318] sm:$0xff] %vm14_vm0, %v124_v39  ;;  %v7964_v39 = vrot.slane %v4796_v43, 7  ;;  %v4801_v53 = vsel %vm481_vm1, %v535_v59, %v350_v46  ;;  %v127_v55 = vld [vmem:[%s7960_s0 + $0x1f8] sm:$0xff]  ;;  %v4826_v59 = vld [vmem:[#allocation2 + $0x170] sm:$0xff]  ;;  %s4150_s0 = smov 8  }
  0x4c   :  { %8097 = vst [vmem:[#allocation43_spill] sm:$0xff] %v4791_v1  ;;  %190 = vst.msk [vmem:[#allocation2 + $0x320] sm:$0xff] %vm14_vm0, %v125_v41  ;;  %v7966_v46 = vrot.slane %v4826_v59, 7 }
  0x4d   :  { %1111 = vrot.lane.b32.xlu0 %v4496_v40, %s4149_s27  ;;  %8099 = vst [vmem:[#allocation45_spill] sm:$0xff] %v4796_v43  ;;  %8100 = vst [vmem:[#allocation46_spill] sm:$0xff] %v4801_v53  ;;  %v4820_v41 = vsel %vm481_vm1, %v7965_v7, %v7964_v39  ;;  %v771_v7 = vrot.slane %v4304_v23, 1  ;;  %v772_v53 = vrot.slane %v4315_v25, 1  ;;  %v779_v25 = vrot.slane %v4302_v22, 1 }
  0x4e   :  { %191 = vst.msk [vmem:[#allocation2 + $0x330] sm:$0xff] %vm14_vm0, %v126_v60  ;;  %192 = vst.msk [vmem:[#allocation2 + $0x338] sm:$0xff] %vm14_vm0, %v127_v55  ;;  %v4829_v60 = vld [vmem:[#allocation2 + $0x168] sm:$0xff]  ;;  %v782_v22 = vrot.slane %v4331_v29, 1  ;;  %v787_v29 = vrot.slane %v4364_v45, 1 }
  0x4f   :  { %1113 = vrot.lane.b32.xlu1 %v4528_v56, %s4149_s27  ;;  %8101 = vst [vmem:[#allocation47_spill] sm:$0xff] %v4820_v41  ;;  %8102 = vst [vmem:[#allocation48_spill] sm:$0xff] %v4826_v59  ;;  %v7967_v55 = vrot.slane %v4829_v60, 7  ;;  %v774_v41 = vrot.slane %v4313_v24, 1  ;;  %v4859_v1 = vsel %vm770_vm2, %v771_v7, %v772_v53  ;;  %v4868_v24 = vld [vmem:[#allocation2 + $0x178] sm:$0xff] }
  0x50   :  { %8103 = vst [vmem:[#allocation49_spill] sm:$0xff] %v4829_v60  ;;  %v4923_v2 = vsel %vm770_vm2, %v786_v28, %v787_v29  ;;  %8107 = vst [vmem:[#allocation53_spill] sm:$0xff] %v4931_v62 }
  0x51   :  { %1115 = vrot.lane.b32.xlu0 %v4636_v19, %s4149_s27  ;;  %v4841_v39 = vsel %vm481_vm1, %v7967_v55, %v7966_v46  ;;  %v4854_v46 = vld [vmem:[#allocation2 + $0x160] sm:$0xff]  ;;  %v777_v55 = vrot.slane %v4321_v26, 1  ;;  %v4862_v23 = vsel %vm770_vm2, %v772_v53, %v774_v41  ;;  %v4872_v26 = vsel %vm770_vm2, %v774_v41, %v771_v7  ;;  %8108 = vst [vmem:[#allocation54_spill] sm:$0xff] %v4946_v58 }
  0x52   :  { %8104 = vst [vmem:[#allocation50_spill] sm:$0xff] %v4841_v39  ;;  %v776_v39 = vrot.slane %v4323_v27, 1  ;;  %v4881_v53 = vld [vmem:[#allocation2 + $0x180] sm:$0xff]  ;;  %v784_v7 = vrot.slane %v4341_v34, 1  ;;  %v4905_v34 = vsel %vm770_vm2, %v781_v51, %v782_v22  ;;  %8109 = vst [vmem:[#allocation55_spill] sm:$0xff] %v4948_v57 }
  0x53   :  { %1117 = vrot.lane.b32.xlu1 %v4546_v38, %s4149_s27  ;;  %v4889_v41 = vsel %vm770_vm2, %v777_v55, %v779_v25 }
  0x54   :  { %v4875_v27 = vsel %vm770_vm2, %v776_v39, %v777_v55  ;;  %v4892_v48 = vsel %vm770_vm2, %v779_v25, %v776_v39  ;;  %v4908_v39 = vsel %vm770_vm2, %v782_v22, %v784_v7  ;;  %v4914_v55 = vld [vmem:[#allocation2 + $0x1a0] sm:$0xff]  ;;  %v4916_v25 = vld [vmem:[#allocation2 + $0x1a8] sm:$0xff]  ;;  %v4920_v45 = vsel %vm770_vm2, %v784_v7, %v781_v51  ;;  %v4929_v22 = vld [vmem:[#allocation2 + $0x1b0] sm:$0xff] }
  0x55   :  { %1119 = vrot.lane.b32.xlu0 %v4639_v20, %s4149_s27  ;;  %8105 = vst [vmem:[#allocation51_spill] sm:$0xff] %v4916_v25  ;;  %8106 = vst [vmem:[#allocation52_spill] sm:$0xff] %v4929_v22  ;;  %v794_v51 = vrot.slane %v4450_v4, 1  ;;  %v4937_v7 = vsel %vm770_vm2, %v787_v29, %v789_v35  ;;  %v4953_v4 = vsel %vm770_vm2, %v791_v61, %v792_v42  ;;  %v4962_v29 = vld [vmem:[#allocation2 + $0x1d0] sm:$0xff]  ;;  %v4964_v35 = vld [vmem:[#allocation2 + $0x1d8] sm:$0xff] }
  0x56   :  { %8110 = vst [vmem:[#allocation56_spill] sm:$0xff] %v4962_v29  ;;  %8111 = vst [vmem:[#allocation57_spill] sm:$0xff] %v4964_v35 }
  0x57   :  { %1121 = vrot.lane.b32.xlu1 %v4641_v13, %s4149_s27  ;;  %v4956_v28 = vsel %vm770_vm2, %v792_v42, %v794_v51  ;;  %v4975_v42 = vsel %vm770_vm2, %v796_v63, %v797_v0 }
  0x59   :  { %1123 = vrot.lane.b32.xlu0 %v4643_v18, %s4149_s27 }
  0x5b   :  { %1125 = vrot.lane.b32.xlu1 %v4652_v36, %s4149_s27 }
  0x5d   :  { %1127 = vrot.lane.b32.xlu0 %v4664_v54, %s4149_s27 }
  0x5f   :  { %1129 = vrot.lane.b32.xlu1 %v4654_v33, %s4149_s27 }
  0x61   :  { %1131 = vrot.lane.b32.xlu0 %v4733_v8, %s4149_s27 }
  0x63   :  { %1133 = vrot.lane.b32.xlu1 %v4735_v6, %s4149_s27 }
  0x65   :  { %1135 = vrot.lane.b32.xlu0 %v4737_v44, %s4149_s27 }
  0x67   :  { %1137 = vrot.lane.b32.xlu1 %v4746_v50, %s4149_s27 }
  0x69   :  { %1139 = vrot.lane.b32.xlu0 %v4752_v14, %s4149_s27 }
  0x6b   :  { %1141 = vrot.lane.b32.xlu1 %v4748_v32, %s4149_s27 }
  0x6d   :  { %1143 = vrot.lane.b32.xlu0 %v4794_v9, %s4149_s27 }
  0x6f   :  { %1145 = vrot.lane.b32.xlu1 %v4796_v43, %s4149_s27 }
  0x71   :  { %1147 = vrot.lane.b32.xlu0 %v4854_v46, %s4149_s27 }
  0x73   :  { %1149 = vrot.lane.b32.xlu1 %v4829_v60, %s4149_s27 }
  0x75   :  { %1151 = vrot.lane.b32.xlu0 %v4826_v59, %s4149_s27 }
  0x77   :  { %1153 = vrot.lane.b32.xlu1 %v4868_v24, %s4149_s27 }
  0x79   :  { %1155 = vrot.lane.b32.xlu0 %v4881_v53, %s4149_s27 }
  0x7b   :  { %1157 = vrot.lane.b32.xlu1 %v4883_v52, %s4149_s27 }
  0x7d   :  { %1159 = vrot.lane.b32.xlu0 %v4898_v47, %s4149_s27 }
  0x7f   :  { %1161 = vrot.lane.b32.xlu1 %v4900_v3, %s4149_s27  ;;  %v4968_v5 = vpop.permute.xlu0 %1059 }
  0x80   :  { %8113 = vst [vmem:[#allocation59_spill] sm:$0xff] %v4968_v5  ;;  %v801_v5 = vrot.slane %v4462_v12, 1  ;;  %v5002_v12 = vld [vmem:[#allocation2 + $0x1f0] sm:$0xff] }
  0x81   :  { %1163 = vrot.lane.b32.xlu0 %v4914_v55, %s4149_s27  ;;  %8118 = vst [vmem:[#allocation64_spill] sm:$0xff] %v5002_v12 }
  0x83   :  { %1165 = vrot.lane.b32.xlu1 %v4916_v25, %s4149_s27  ;;  %v4988_v11 = vpop.permute.xlu0 %1061  ;;  %v4993_v25 = vsel %vm770_vm2, %v797_v0, %v799_v10  ;;  %v807_v0 = vrot.slane %v4479_v21, 1  ;;  %v809_v21 = vrot.slane %v4481_v30, 1 }
  0x84   :  { %8117 = vst [vmem:[#allocation63_spill] sm:$0xff] %v4988_v11 }
  0x85   :  { %1167 = vrot.lane.b32.xlu0 %v4929_v22, %s4149_s27  ;;  %v4972_v22 = vsel %vm770_vm2, %v794_v51, %v791_v61  ;;  %v802_v61 = vrot.slane %v4470_v15, 1  ;;  %v804_v51 = vrot.slane %v4472_v16, 1  ;;  %v806_v16 = vrot.slane %v4474_v17, 1 }
  0x87   :  { %1169 = vrot.lane.b32.xlu1 %v4931_v62, %s4149_s27  ;;  %v4966_v62 = vpop.permute.xlu1 %1069 }
  0x88   :  { %8112 = vst [vmem:[#allocation58_spill] sm:$0xff] %v4966_v62 }
  0x89   :  { %1171 = vrot.lane.b32.xlu0 %v4946_v58, %s4149_s27  ;;  %v4983_v58 = vld [vmem:[#allocation2 + $0x1e8] sm:$0xff] }
  0x8a   :  { %8115 = vst [vmem:[#allocation61_spill] sm:$0xff] %v4983_v58 }
  0x8b   :  { %1173 = vrot.lane.b32.xlu1 %v4948_v57, %s4149_s27  ;;  %v4981_v57 = vld [vmem:[#allocation2 + $0x1e0] sm:$0xff] }
  0x8c   :  { %8114 = vst [vmem:[#allocation60_spill] sm:$0xff] %v4981_v57 }
  0x8d   :  { %1175 = vrot.lane.b32.xlu0 %v4962_v29, %s4149_s27  ;;  %v4996_v29 = vsel %vm770_vm2, %v799_v10, %v796_v63  ;;  %v5013_v63 = vsel %vm770_vm2, %v801_v5, %v802_v61  ;;  %v5016_v10 = vsel %vm770_vm2, %v802_v61, %v804_v51  ;;  %v5035_v61 = vsel %vm770_vm2, %v806_v16, %v807_v0 }
  0x8f   :  { %1177 = vrot.lane.b32.xlu1 %v4964_v35, %s4149_s27  ;;  %v5053_v35 = vsel %vm770_vm2, %v807_v0, %v809_v21  ;;  %v817_v0 = vrot.slane %v4636_v19, 1  ;;  %v819_v19 = vrot.slane %v4546_v38, 1 }
  0x91   :  { %v4986_v62 = vpop.permute.xlu1 %1063  ;;  %1179 = vrot.lane.b32.xlu0 %v4981_v57, %s4149_s27  ;;  %v5032_v57 = vsel %vm770_vm2, %v804_v51, %v801_v5  ;;  %v812_v5 = vrot.slane %v4488_v37, 1  ;;  %v814_v51 = vrot.slane %v4496_v40, 1  ;;  %v816_v40 = vrot.slane %v4528_v56, 1 }
  0x92   :  { %8116 = vst [vmem:[#allocation62_spill] sm:$0xff] %v4986_v62  ;;  %v5004_v62 = vld [vmem:[#allocation2 + $0x1f8] sm:$0xff] }
  0x93   :  { %1181 = vrot.lane.b32.xlu1 %v4983_v58, %s4149_s27  ;;  %8119 = vst [vmem:[#allocation65_spill] sm:$0xff] %v5004_v62  ;;  %v5006_v11 = vpop.permute.xlu0 %1067  ;;  %v5022_v58 = vld [vmem:[#allocation2 + $0x200] sm:$0xff] }
  0x94   :  { %8120 = vst [vmem:[#allocation66_spill] sm:$0xff] %v5006_v11  ;;  %8122 = vst [vmem:[#allocation68_spill] sm:$0xff] %v5022_v58  ;;  %v5024_v11 = vld [vmem:[#allocation2 + $0x208] sm:$0xff] }
  0x95   :  { %v5008_v15 = vpop.permute.xlu1 %1065  ;;  %1183 = vrot.lane.b32.xlu0 %v5002_v12, %s4149_s27  ;;  %8123 = vst [vmem:[#allocation69_spill] sm:$0xff] %v5024_v11  ;;  %v5043_v12 = vld [vmem:[#allocation2 + $0x218] sm:$0xff] }
  0x96   :  { %8121 = vst [vmem:[#allocation67_spill] sm:$0xff] %v5008_v15  ;;  %8127 = vst [vmem:[#allocation73_spill] sm:$0xff] %v5043_v12 }
  0x97   :  { %1185 = vrot.lane.b32.xlu1 %v5004_v62, %s4149_s27  ;;  %v5026_v15 = vpop.permute.xlu0 %1071  ;;  %v5041_v62 = vld [vmem:[#allocation2 + $0x210] sm:$0xff] }
  0x98   :  { %8124 = vst [vmem:[#allocation70_spill] sm:$0xff] %v5026_v15  ;;  %8126 = vst [vmem:[#allocation72_spill] sm:$0xff] %v5041_v62 }
  0x99   :  { %v5028_v17 = vpop.permute.xlu1 %1073  ;;  %1187 = vrot.lane.b32.xlu0 %v5022_v58, %s4149_s27  ;;  %v5056_v58 = vsel %vm770_vm2, %v809_v21, %v806_v16  ;;  %v5076_v21 = vsel %vm770_vm2, %v812_v5, %v814_v51 }
  0x9a   :  { %8125 = vst [vmem:[#allocation71_spill] sm:$0xff] %v5028_v17  ;;  %v811_v17 = vrot.slane %v4483_v31, 1  ;;  %v5062_v31 = vld [vmem:[#allocation2 + $0x220] sm:$0xff] }
  0x9b   :  { %1189 = vrot.lane.b32.xlu1 %v5024_v11, %s4149_s27  ;;  %v5046_v15 = vpop.permute.xlu0 %1075  ;;  %8130 = vst [vmem:[#allocation76_spill] sm:$0xff] %v5062_v31  ;;  %v5113_v11 = vsel %vm770_vm2, %v817_v0, %v819_v19 }
  0x9c   :  { %8128 = vst [vmem:[#allocation74_spill] sm:$0xff] %v5046_v15  ;;  %v5064_v15 = vld [vmem:[#allocation2 + $0x228] sm:$0xff]  ;;  %v5073_v16 = vsel %vm770_vm2, %v811_v17, %v812_v5  ;;  %v5095_v5 = vsel %vm770_vm2, %v816_v40, %v817_v0  ;;  %v827_v0 = vrot.slane %v4664_v54, 1  ;;  %v829_v54 = vrot.slane %v4654_v33, 1 }
  0x9d   :  { %v5048_v30 = vpop.permute.xlu1 %1077  ;;  %1191 = vrot.lane.b32.xlu0 %v5041_v62, %s4149_s27  ;;  %8131 = vst [vmem:[#allocation77_spill] sm:$0xff] %v5064_v15  ;;  %v5092_v62 = vsel %vm770_vm2, %v814_v51, %v811_v17  ;;  %v822_v17 = vrot.slane %v4641_v13, 1  ;;  %v824_v51 = vrot.slane %v4643_v18, 1  ;;  %v826_v18 = vrot.slane %v4652_v36, 1 }
  0x9e   :  { %8129 = vst [vmem:[#allocation75_spill] sm:$0xff] %v5048_v30 }
  0x9f   :  { %1193 = vrot.lane.b32.xlu1 %v5043_v12, %s4149_s27  ;;  %v5066_v30 = vpop.permute.xlu0 %1079  ;;  %v5082_v12 = vld [vmem:[#allocation2 + $0x230] sm:$0xff] }
  0xa0   :  { %8132 = vst [vmem:[#allocation78_spill] sm:$0xff] %v5066_v30  ;;  %8134 = vst [vmem:[#allocation80_spill] sm:$0xff] %v5082_v12  ;;  %v5084_v30 = vld [vmem:[#allocation2 + $0x238] sm:$0xff] }
  0xa1   :  { %v5068_v37 = vpop.permute.xlu1 %1081  ;;  %1195 = vrot.lane.b32.xlu0 %v5062_v31, %s4149_s27  ;;  %8135 = vst [vmem:[#allocation81_spill] sm:$0xff] %v5084_v30  ;;  %v5103_v31 = vld [vmem:[#allocation2 + $0x248] sm:$0xff] }
  0xa2   :  { %8133 = vst [vmem:[#allocation79_spill] sm:$0xff] %v5068_v37  ;;  %8139 = vst [vmem:[#allocation85_spill] sm:$0xff] %v5103_v31 }
  0xa3   :  { %1197 = vrot.lane.b32.xlu1 %v5064_v15, %s4149_s27  ;;  %v5086_v37 = vpop.permute.xlu0 %1083  ;;  %v5101_v15 = vld [vmem:[#allocation2 + $0x240] sm:$0xff] }
  0xa4   :  { %8136 = vst [vmem:[#allocation82_spill] sm:$0xff] %v5086_v37  ;;  %8138 = vst [vmem:[#allocation84_spill] sm:$0xff] %v5101_v15 }
  0xa5   :  { %v5088_v56 = vpop.permute.xlu1 %1085  ;;  %1199 = vrot.lane.b32.xlu0 %v5082_v12, %s4149_s27  ;;  %v5116_v12 = vsel %vm770_vm2, %v819_v19, %v816_v40  ;;  %v5136_v19 = vsel %vm770_vm2, %v822_v17, %v824_v51 }
  0xa6   :  { %8137 = vst [vmem:[#allocation83_spill] sm:$0xff] %v5088_v56  ;;  %v821_v56 = vrot.slane %v4639_v20, 1  ;;  %v5122_v20 = vld [vmem:[#allocation2 + $0x250] sm:$0xff] }
  0xa7   :  { %1201 = vrot.lane.b32.xlu1 %v5084_v30, %s4149_s27  ;;  %v5106_v37 = vpop.permute.xlu0 %1087  ;;  %8142 = vst [vmem:[#allocation88_spill] sm:$0xff] %v5122_v20  ;;  %v5173_v30 = vsel %vm770_vm2, %v827_v0, %v829_v54 }
  0xa8   :  { %8140 = vst [vmem:[#allocation86_spill] sm:$0xff] %v5106_v37  ;;  %v5124_v37 = vld [vmem:[#allocation2 + $0x258] sm:$0xff]  ;;  %v5133_v40 = vsel %vm770_vm2, %v821_v56, %v822_v17  ;;  %v5155_v17 = vsel %vm770_vm2, %v826_v18, %v827_v0  ;;  %v837_v0 = vrot.slane %v4752_v14, 1  ;;  %v839_v14 = vrot.slane %v4748_v32, 1 }
  0xa9   :  { %v5108_v38 = vpop.permute.xlu1 %1089  ;;  %1203 = vrot.lane.b32.xlu0 %v5101_v15, %s4149_s27  ;;  %8143 = vst [vmem:[#allocation89_spill] sm:$0xff] %v5124_v37  ;;  %v5152_v15 = vsel %vm770_vm2, %v824_v51, %v821_v56  ;;  %v831_v56 = vrot.slane %v4733_v8, 1  ;;  %v832_v51 = vrot.slane %v4735_v6, 1  ;;  %v836_v6 = vrot.slane %v4746_v50, 1 }
  0xaa   :  { %8141 = vst [vmem:[#allocation87_spill] sm:$0xff] %v5108_v38 }
  0xab   :  { %1205 = vrot.lane.b32.xlu1 %v5103_v31, %s4149_s27  ;;  %v5126_v38 = vpop.permute.xlu0 %1091  ;;  %v5142_v31 = vld [vmem:[#allocation2 + $0x260] sm:$0xff] }
  0xac   :  { %8144 = vst [vmem:[#allocation90_spill] sm:$0xff] %v5126_v38  ;;  %8146 = vst [vmem:[#allocation92_spill] sm:$0xff] %v5142_v31  ;;  %v5144_v38 = vld [vmem:[#allocation2 + $0x268] sm:$0xff] }
  0xad   :  { %v5128_v13 = vpop.permute.xlu1 %1093  ;;  %1207 = vrot.lane.b32.xlu0 %v5122_v20, %s4149_s27  ;;  %8147 = vst [vmem:[#allocation93_spill] sm:$0xff] %v5144_v38  ;;  %v5163_v20 = vld [vmem:[#allocation2 + $0x278] sm:$0xff] }
  0xae   :  { %8145 = vst [vmem:[#allocation91_spill] sm:$0xff] %v5128_v13  ;;  %8151 = vst [vmem:[#allocation97_spill] sm:$0xff] %v5163_v20 }
  0xaf   :  { %1209 = vrot.lane.b32.xlu1 %v5124_v37, %s4149_s27  ;;  %v5146_v13 = vpop.permute.xlu0 %1095  ;;  %v5161_v37 = vld [vmem:[#allocation2 + $0x270] sm:$0xff] }
  0xb0   :  { %8148 = vst [vmem:[#allocation94_spill] sm:$0xff] %v5146_v13  ;;  %8150 = vst [vmem:[#allocation96_spill] sm:$0xff] %v5161_v37 }
  0xb1   :  { %v5148_v36 = vpop.permute.xlu1 %1097  ;;  %1211 = vrot.lane.b32.xlu0 %v5142_v31, %s4149_s27  ;;  %v5176_v31 = vsel %vm770_vm2, %v829_v54, %v826_v18  ;;  %v5193_v18 = vsel %vm770_vm2, %v831_v56, %v832_v51 }
  0xb2   :  { %8149 = vst [vmem:[#allocation95_spill] sm:$0xff] %v5148_v36  ;;  %v834_v36 = vrot.slane %v4737_v44, 1  ;;  %v5182_v44 = vld [vmem:[#allocation2 + $0x280] sm:$0xff] }
  0xb3   :  { %1213 = vrot.lane.b32.xlu1 %v5144_v38, %s4149_s27  ;;  %v5166_v13 = vpop.permute.xlu0 %1099  ;;  %8154 = vst [vmem:[#allocation100_spill] sm:$0xff] %v5182_v44  ;;  %v8176_v38 = vrot.slane %v4829_v60, 1 }
  0xb4   :  { %8152 = vst [vmem:[#allocation98_spill] sm:$0xff] %v5166_v13  ;;  %v5184_v13 = vld [vmem:[#allocation2 + $0x288] sm:$0xff]  ;;  %v5196_v54 = vsel %vm770_vm2, %v832_v51, %v834_v36  ;;  %v5215_v51 = vsel %vm770_vm2, %v836_v6, %v837_v0 }
  0xb5   :  { %v5168_v33 = vpop.permute.xlu1 %1101  ;;  %1215 = vrot.lane.b32.xlu0 %v5161_v37, %s4149_s27  ;;  %8155 = vst [vmem:[#allocation101_spill] sm:$0xff] %v5184_v13  ;;  %v5212_v37 = vsel %vm770_vm2, %v834_v36, %v831_v56  ;;  %v5232_v56 = vsel %vm770_vm2, %v837_v0, %v839_v14 }
  0xb6   :  { %8153 = vst [vmem:[#allocation99_spill] sm:$0xff] %v5168_v33 }
  0xb7   :  { %1217 = vrot.lane.b32.xlu1 %v5163_v20, %s4149_s27  ;;  %v5186_v33 = vpop.permute.xlu0 %1103  ;;  %v5202_v20 = vld [vmem:[#allocation2 + $0x290] sm:$0xff] }
  0xb8   :  { %8156 = vst [vmem:[#allocation102_spill] sm:$0xff] %v5186_v33  ;;  %8158 = vst [vmem:[#allocation104_spill] sm:$0xff] %v5202_v20  ;;  %v5204_v33 = vld [vmem:[#allocation2 + $0x298] sm:$0xff] }
  0xb9   :  { %v5188_v8 = vpop.permute.xlu1 %1105  ;;  %1219 = vrot.lane.b32.xlu0 %v5182_v44, %s4149_s27  ;;  %8159 = vst [vmem:[#allocation105_spill] sm:$0xff] %v5204_v33  ;;  %v5223_v44 = vld [vmem:[#allocation2 + $0x2a8] sm:$0xff] }
  0xba   :  { %8157 = vst [vmem:[#allocation103_spill] sm:$0xff] %v5188_v8  ;;  %8163 = vst [vmem:[#allocation109_spill] sm:$0xff] %v5223_v44 }
  0xbb   :  { %1221 = vrot.lane.b32.xlu1 %v5184_v13, %s4149_s27  ;;  %v5206_v8 = vpop.permute.xlu0 %1107  ;;  %v5221_v13 = vld [vmem:[#allocation2 + $0x2a0] sm:$0xff] }
  0xbc   :  { %8160 = vst [vmem:[#allocation106_spill] sm:$0xff] %v5206_v8  ;;  %8162 = vst [vmem:[#allocation108_spill] sm:$0xff] %v5221_v13 }
  0xbd   :  { %v5208_v50 = vpop.permute.xlu1 %1109  ;;  %1223 = vrot.lane.b32.xlu0 %v5202_v20, %s4149_s27  ;;  %v5235_v20 = vsel %vm770_vm2, %v839_v14, %v836_v6  ;;  %v8169_v6 = vrot.slane %v4796_v43, 1  ;;  %v8170_v14 = vrot.slane %v4794_v9, 1 }
  0xbe   :  { %8161 = vst [vmem:[#allocation107_spill] sm:$0xff] %v5208_v50 }
  0xbf   :  { %1225 = vrot.lane.b32.xlu1 %v5204_v33, %s4149_s27  ;;  %v5225_v8 = vpop.permute.xlu0 %1111  ;;  %v5241_v33 = vld [vmem:[#allocation2 + $0x2b0] sm:$0xff] }
  0xc0   :  { %8164 = vst [vmem:[#allocation110_spill] sm:$0xff] %v5225_v8  ;;  %v5243_v8 = vld [vmem:[#allocation2 + $0x2b8] sm:$0xff] }
  0xc1   :  { %v5227_v50 = vpop.permute.xlu1 %1113  ;;  %1227 = vrot.lane.b32.xlu0 %v5221_v13, %s4149_s27  ;;  %8166 = vst [vmem:[#allocation112_spill] sm:$0xff] %v5243_v8  ;;  %v5256_v13 = vsel %vm770_vm2, %v8170_v14, %v8169_v6  ;;  %v5281_v14 = vld [vmem:[#allocation2 + $0x2d0] sm:$0xff] }
  0xc2   :  { %8165 = vst [vmem:[#allocation111_spill] sm:$0xff] %v5227_v50  ;;  %8177 = vst [vmem:[#allocation119_spill] sm:$0xff] %v5281_v14 }
  0xc3   :  { %1229 = vrot.lane.b32.xlu1 %v5223_v44, %s4149_s27  ;;  %v5245_v50 = vpop.permute.xlu0 %1115  ;;  %v8175_v44 = vrot.slane %v4826_v59, 1 }
  0xc4   :  { %8167 = vst [vmem:[#allocation113_spill] sm:$0xff] %v5245_v50  ;;  %v5262_v50 = vld [vmem:[#allocation2 + $0x2c0] sm:$0xff] }
  0xc5   :  { %v5247_v32 = vpop.permute.xlu1 %1117  ;;  %1231 = vrot.lane.b32.xlu0 %v5241_v33, %s4149_s27  ;;  %8171 = vst [vmem:[#allocation115_spill] sm:$0xff] %v5262_v50  ;;  %v5275_v6 = vsel %vm770_vm2, %v8176_v38, %v8175_v44  ;;  %v5293_v38 = vld [vmem:[#allocation2 + $0x2e0] sm:$0xff]  ;;  %v5295_v44 = vld [vmem:[#allocation2 + $0x2e8] sm:$0xff] }
  0xc6   :  { %8168 = vst [vmem:[#allocation114_spill] sm:$0xff] %v5247_v32  ;;  %v5264_v32 = vld [vmem:[#allocation2 + $0x2c8] sm:$0xff]  ;;  %8181 = vst [vmem:[#allocation123_spill] sm:$0xff] %v5293_v38 }
  0xc7   :  { %1233 = vrot.lane.b32.xlu1 %v5243_v8, %s4149_s27  ;;  %8172 = vst [vmem:[#allocation116_spill] sm:$0xff] %v5264_v32  ;;  %v5266_v0 = vpop.permute.xlu0 %1119  ;;  %v5283_v8 = vld [vmem:[#allocation2 + $0x2d8] sm:$0xff]  ;;  %8182 = vst [vmem:[#allocation124_spill] sm:$0xff] %v5295_v44 }
  0xc8   :  { %8173 = vst [vmem:[#allocation117_spill] sm:$0xff] %v5266_v0  ;;  %8178 = vst [vmem:[#allocation120_spill] sm:$0xff] %v5283_v8 }
  0xc9   :  { %v5268_v36 = vpop.permute.xlu1 %1121  ;;  %1235 = vrot.lane.b32.xlu0 %v5262_v50, %s4149_s27 }
  0xca   :  { %8174 = vst [vmem:[#allocation118_spill] sm:$0xff] %v5268_v36 }
  0xcb   :  { %1237 = vrot.lane.b32.xlu1 %v5264_v32, %s4149_s27  ;;  %v5285_v0 = vpop.permute.xlu0 %1123 }
  0xcc   :  { %8179 = vst [vmem:[#allocation121_spill] sm:$0xff] %v5285_v0  ;;  %v5307_v0 = vld [vmem:[#allocation2 + $0x2f8] sm:$0xff] }
  0xcd   :  { %v5287_v36 = vpop.permute.xlu1 %1125  ;;  %1239 = vrot.lane.b32.xlu0 %v5281_v14, %s4149_s27  ;;  %8186 = vst [vmem:[#allocation128_spill] sm:$0xff] %v5307_v0 }
  0xce   :  { %8180 = vst [vmem:[#allocation122_spill] sm:$0xff] %v5287_v36  ;;  %v5305_v36 = vld [vmem:[#allocation2 + $0x2f0] sm:$0xff] }
  0xcf   :  { %1241 = vrot.lane.b32.xlu1 %v5283_v8, %s4149_s27  ;;  %v5297_v50 = vpop.permute.xlu0 %1127  ;;  %8185 = vst [vmem:[#allocation127_spill] sm:$0xff] %v5305_v36 }
  0xd0   :  { %8183 = vst [vmem:[#allocation125_spill] sm:$0xff] %v5297_v50  ;;  %v5319_v50 = vld [vmem:[#allocation2 + $0x308] sm:$0xff] }
  0xd1   :  { %v5299_v32 = vpop.permute.xlu1 %1129  ;;  %1243 = vrot.lane.b32.xlu0 %v5293_v38, %s4149_s27  ;;  %8190 = vst [vmem:[#allocation132_spill] sm:$0xff] %v5319_v50 }
  0xd2   :  { %8184 = vst [vmem:[#allocation126_spill] sm:$0xff] %v5299_v32  ;;  %v5317_v32 = vld [vmem:[#allocation2 + $0x300] sm:$0xff] }
  0xd3   :  { %1245 = vrot.lane.b32.xlu1 %v5295_v44, %s4149_s27  ;;  %v5309_v14 = vpop.permute.xlu0 %1131  ;;  %8189 = vst [vmem:[#allocation131_spill] sm:$0xff] %v5317_v32 }
  0xd4   :  { %8187 = vst [vmem:[#allocation129_spill] sm:$0xff] %v5309_v14  ;;  %v5331_v14 = vld [vmem:[#allocation2 + $0x318] sm:$0xff] }
  0xd5   :  { %v5311_v8 = vpop.permute.xlu1 %1133  ;;  %1247 = vrot.lane.b32.xlu0 %v5305_v36, %s4149_s27  ;;  %8194 = vst [vmem:[#allocation136_spill] sm:$0xff] %v5331_v14 }
  0xd6   :  { %8188 = vst [vmem:[#allocation130_spill] sm:$0xff] %v5311_v8  ;;  %v5329_v8 = vld [vmem:[#allocation2 + $0x310] sm:$0xff] }
  0xd7   :  { %1249 = vrot.lane.b32.xlu1 %v5307_v0, %s4149_s27  ;;  %v5321_v38 = vpop.permute.xlu0 %1135  ;;  %8193 = vst [vmem:[#allocation135_spill] sm:$0xff] %v5329_v8 }
  0xd8   :  { %8191 = vst [vmem:[#allocation133_spill] sm:$0xff] %v5321_v38  ;;  %v5343_v38 = vld [vmem:[#allocation2 + $0x328] sm:$0xff] }
  0xd9   :  { %v5323_v44 = vpop.permute.xlu1 %1137  ;;  %1251 = vrot.lane.b32.xlu0 %v5317_v32, %s4149_s27  ;;  %8198 = vst [vmem:[#allocation140_spill] sm:$0xff] %v5343_v38 }
  0xda   :  { %8192 = vst [vmem:[#allocation134_spill] sm:$0xff] %v5323_v44  ;;  %v5341_v44 = vld [vmem:[#allocation2 + $0x320] sm:$0xff] }
  0xdb   :  { %1253 = vrot.lane.b32.xlu1 %v5319_v50, %s4149_s27  ;;  %v5333_v36 = vpop.permute.xlu0 %1139  ;;  %8197 = vst [vmem:[#allocation139_spill] sm:$0xff] %v5341_v44 }
  0xdc   :  { %8195 = vst [vmem:[#allocation137_spill] sm:$0xff] %v5333_v36  ;;  %v5355_v36 = vld [vmem:[#allocation2 + $0x338] sm:$0xff] }
  0xdd   :  { %v5335_v0 = vpop.permute.xlu1 %1141  ;;  %1255 = vrot.lane.b32.xlu0 %v5329_v8, %s4149_s27  ;;  %8202 = vst [vmem:[#allocation144_spill] sm:$0xff] %v5355_v36 }
  0xde   :  { %8196 = vst [vmem:[#allocation138_spill] sm:$0xff] %v5335_v0  ;;  %v5353_v0 = vld [vmem:[#allocation2 + $0x330] sm:$0xff] }
  0xdf   :  { %1257 = vrot.lane.b32.xlu1 %v5331_v14, %s4149_s27  ;;  %v5345_v32 = vpop.permute.xlu0 %1143  ;;  %8201 = vst [vmem:[#allocation143_spill] sm:$0xff] %v5353_v0 }
  0xe0   :  { %8199 = vst [vmem:[#allocation141_spill] sm:$0xff] %v5345_v32  ;;  %v5367_v32 = vld [vmem:[#allocation2 + $0x348] sm:$0xff] }
  0xe1   :  { %v5347_v50 = vpop.permute.xlu1 %1145  ;;  %1259 = vrot.lane.b32.xlu0 %v5341_v44, %s4149_s27 }
  0xe2   :  { %8200 = vst [vmem:[#allocation142_spill] sm:$0xff] %v5347_v50  ;;  %v5365_v50 = vld [vmem:[#allocation2 + $0x340] sm:$0xff] }
  0xe3   :  { %1261 = vrot.lane.b32.xlu1 %v5343_v38, %s4149_s27  ;;  %v5357_v8 = vpop.permute.xlu0 %1147 }
  0xe4   :  { %8203 = vst [vmem:[#allocation145_spill] sm:$0xff] %v5357_v8  ;;  %v5379_v8 = vld [vmem:[#allocation2 + $0x358] sm:$0xff] }
  0xe5   :  { %v5359_v14 = vpop.permute.xlu1 %1149  ;;  %1263 = vrot.lane.b32.xlu0 %v5353_v0, %s4149_s27 }
  0xe6   :  { %8204 = vst [vmem:[#allocation146_spill] sm:$0xff] %v5359_v14  ;;  %v5377_v14 = vld [vmem:[#allocation2 + $0x350] sm:$0xff] }
  0xe7   :  { %1265 = vrot.lane.b32.xlu1 %v5355_v36, %s4149_s27  ;;  %v5369_v44 = vpop.permute.xlu0 %1151 }
  0xe8   :  { %8205 = vst [vmem:[#allocation147_spill] sm:$0xff] %v5369_v44 }
  0xe9   :  { %v5371_v38 = vpop.permute.xlu1 %1153  ;;  %1267 = vrot.lane.b32.xlu0 %v5365_v50, %s4149_s27 }
  0xea   :  { %8206 = vst [vmem:[#allocation148_spill] sm:$0xff] %v5371_v38 }
  0xeb   :  { %1269 = vrot.lane.b32.xlu1 %v5367_v32, %s4149_s27  ;;  %v5381_v0 = vpop.permute.xlu0 %1155 }
  0xec   :  { %8207 = vst [vmem:[#allocation149_spill] sm:$0xff] %v5381_v0 }
  0xed   :  { %v5383_v36 = vpop.permute.xlu1 %1157  ;;  %1271 = vrot.lane.b32.xlu0 %v5377_v14, %s4149_s27 }
  0xee   :  { %8208 = vst [vmem:[#allocation150_spill] sm:$0xff] %v5383_v36 }
  0xef   :  { %1273 = vrot.lane.b32.xlu1 %v5379_v8, %s4149_s27  ;;  %v5389_v38 = vpop.permute.xlu0 %1159  ;;  %s4151_s27 = smov 12  }
  0xf0   :  { %8209 = vst [vmem:[#allocation151_spill] sm:$0xff] %v5389_v38 }
  0xf1   :  { %v5391_v44 = vpop.permute.xlu1 %1161  ;;  %1419 = vrot.lane.b32.xlu0 %v4859_v1, %s4150_s0 }
  0xf2   :  { %8210 = vst [vmem:[#allocation152_spill] sm:$0xff] %v5391_v44 }
  0xf3   :  { %1421 = vrot.lane.b32.xlu1 %v4862_v23, %s4150_s0  ;;  %v5397_v0 = vpop.permute.xlu0 %1163 }
  0xf4   :  { %8211 = vst [vmem:[#allocation153_spill] sm:$0xff] %v5397_v0 }
  0xf5   :  { %v5399_v36 = vpop.permute.xlu1 %1165  ;;  %1423 = vrot.lane.b32.xlu0 %v4872_v26, %s4150_s0 }
  0xf6   :  { %8212 = vst [vmem:[#allocation154_spill] sm:$0xff] %v5399_v36 }
  0xf7   :  { %1425 = vrot.lane.b32.xlu1 %v4875_v27, %s4150_s0  ;;  %v5405_v38 = vpop.permute.xlu0 %1167 }
  0xf8   :  { %8213 = vst [vmem:[#allocation155_spill] sm:$0xff] %v5405_v38  ;;  %v8289_v38 = vld [vmem:[#allocation115_spill] sm:$0xff] }
  0xf9   :  { %v5407_v44 = vpop.permute.xlu1 %1169  ;;  %1427 = vrot.lane.b32.xlu0 %v4889_v41, %s4150_s0 }
  0xfa   :  { %8214 = vst [vmem:[#allocation156_spill] sm:$0xff] %v5407_v44  ;;  %v8284_v44 = vld [vmem:[#allocation108_spill] sm:$0xff] }
  0xfb   :  { %1429 = vrot.lane.b32.xlu1 %v4892_v48, %s4150_s0  ;;  %v5413_v1 = vpop.permute.xlu0 %1171 }
  0xfc   :  { %8215 = vst [vmem:[#allocation157_spill] sm:$0xff] %v5413_v1  ;;  %v8282_v1 = vld [vmem:[#allocation104_spill] sm:$0xff] }
  0xfd   :  { %v5415_v23 = vpop.permute.xlu1 %1173  ;;  %1431 = vrot.lane.b32.xlu0 %v4905_v34, %s4150_s0 }
  0xff   :  { %1433 = vrot.lane.b32.xlu1 %v4908_v39, %s4150_s0  ;;  %v5421_v26 = vpop.permute.xlu0 %1175 }
 0x101   :  { %v5423_v27 = vpop.permute.xlu1 %1177  ;;  %1435 = vrot.lane.b32.xlu0 %v4920_v45, %s4150_s0 }
 0x103   :  { %1437 = vrot.lane.b32.xlu1 %v4923_v2, %s4150_s0  ;;  %v5429_v48 = vpop.permute.xlu0 %1179 }
 0x105   :  { %v5431_v41 = vpop.permute.xlu1 %1181  ;;  %1439 = vrot.lane.b32.xlu0 %v4937_v7, %s4150_s0 }
 0x107   :  { %1441 = vrot.lane.b32.xlu1 %v4940_v49, %s4150_s0  ;;  %v5437_v34 = vpop.permute.xlu0 %1183 }
 0x109   :  { %v5439_v39 = vpop.permute.xlu1 %1185  ;;  %1443 = vrot.lane.b32.xlu0 %v4953_v4, %s4150_s0 }
 0x10b   :  { %1445 = vrot.lane.b32.xlu1 %v4956_v28, %s4150_s0  ;;  %v5445_v2 = vpop.permute.xlu0 %1187 }
 0x10d   :  { %v5447_v45 = vpop.permute.xlu1 %1189  ;;  %1447 = vrot.lane.b32.xlu0 %v4972_v22, %s4150_s0 }
 0x10f   :  { %1449 = vrot.lane.b32.xlu1 %v4975_v42, %s4150_s0  ;;  %v5453_v49 = vpop.permute.xlu0 %1191 }
 0x111   :  { %v5455_v7 = vpop.permute.xlu1 %1193  ;;  %1451 = vrot.lane.b32.xlu0 %v4993_v25, %s4150_s0 }
 0x113   :  { %1453 = vrot.lane.b32.xlu1 %v4996_v29, %s4150_s0  ;;  %v5461_v4 = vpop.permute.xlu0 %1195 }
 0x115   :  { %v5463_v28 = vpop.permute.xlu1 %1197  ;;  %1455 = vrot.lane.b32.xlu0 %v5013_v63, %s4150_s0 }
 0x117   :  { %1457 = vrot.lane.b32.xlu1 %v5016_v10, %s4150_s0  ;;  %v5469_v22 = vpop.permute.xlu0 %1199 }
 0x119   :  { %v5471_v42 = vpop.permute.xlu1 %1201  ;;  %1459 = vrot.lane.b32.xlu0 %v5032_v57, %s4150_s0 }
 0x11b   :  { %1461 = vrot.lane.b32.xlu1 %v5035_v61, %s4150_s0  ;;  %v5477_v25 = vpop.permute.xlu0 %1203 }
 0x11d   :  { %v5479_v29 = vpop.permute.xlu1 %1205  ;;  %1463 = vrot.lane.b32.xlu0 %v5053_v35, %s4150_s0 }
 0x11f   :  { %1465 = vrot.lane.b32.xlu1 %v5056_v58, %s4150_s0  ;;  %v5485_v63 = vpop.permute.xlu0 %1207 }
 0x121   :  { %v5487_v10 = vpop.permute.xlu1 %1209  ;;  %1467 = vrot.lane.b32.xlu0 %v5073_v16, %s4150_s0 }
 0x123   :  { %1469 = vrot.lane.b32.xlu1 %v5076_v21, %s4150_s0  ;;  %v5493_v57 = vpop.permute.xlu0 %1211 }
 0x125   :  { %v5495_v61 = vpop.permute.xlu1 %1213  ;;  %1471 = vrot.lane.b32.xlu0 %v5092_v62, %s4150_s0 }
 0x127   :  { %1473 = vrot.lane.b32.xlu1 %v5095_v5, %s4150_s0  ;;  %v5501_v58 = vpop.permute.xlu0 %1215 }
 0x128   :  { %8216 = vst [vmem:[#allocation158_spill] sm:$0xff] %v5501_v58 }
 0x129   :  { %v5503_v35 = vpop.permute.xlu1 %1217  ;;  %1475 = vrot.lane.b32.xlu0 %v5113_v11, %s4150_s0 }
 0x12a   :  { %8217 = vst [vmem:[#allocation159_spill] sm:$0xff] %v5503_v35  ;;  %v8285_v35 = vld [vmem:[#allocation109_spill] sm:$0xff] }
 0x12b   :  { %1477 = vrot.lane.b32.xlu1 %v5116_v12, %s4150_s0  ;;  %v5509_v16 = vpop.permute.xlu0 %1219 }
 0x12c   :  { %8218 = vst [vmem:[#allocation160_spill] sm:$0xff] %v5509_v16 }
 0x12d   :  { %v5511_v21 = vpop.permute.xlu1 %1221  ;;  %1479 = vrot.lane.b32.xlu0 %v5133_v40, %s4150_s0 }
 0x12e   :  { %8219 = vst [vmem:[#allocation161_spill] sm:$0xff] %v5511_v21  ;;  %v8280_v21 = vld [vmem:[#allocation100_spill] sm:$0xff] }
 0x12f   :  { %1481 = vrot.lane.b32.xlu1 %v5136_v19, %s4150_s0  ;;  %v5517_v62 = vpop.permute.xlu0 %1223 }
 0x130   :  { %8220 = vst [vmem:[#allocation162_spill] sm:$0xff] %v5517_v62  ;;  %v8279_v62 = vld [vmem:[#allocation97_spill] sm:$0xff] }
 0x131   :  { %v5519_v5 = vpop.permute.xlu1 %1225  ;;  %1483 = vrot.lane.b32.xlu0 %v5152_v15, %s4150_s0 }
 0x132   :  { %8221 = vst [vmem:[#allocation163_spill] sm:$0xff] %v5519_v5  ;;  %v8278_v5 = vld [vmem:[#allocation96_spill] sm:$0xff] }
 0x133   :  { %1485 = vrot.lane.b32.xlu1 %v5155_v17, %s4150_s0  ;;  %v5525_v11 = vpop.permute.xlu0 %1227 }
 0x134   :  { %8222 = vst [vmem:[#allocation164_spill] sm:$0xff] %v5525_v11 }
 0x135   :  { %v5527_v12 = vpop.permute.xlu1 %1229  ;;  %1487 = vrot.lane.b32.xlu0 %v5173_v30, %s4150_s0  ;;  %v844_v30 = vrot.slane %v4854_v46, 1  ;;  %v849_v46 = vrot.slane %v4868_v24, 1  ;;  %v8236_v24 = vrot.slane %v4826_v59, 1 }
 0x136   :  { %8223 = vst [vmem:[#allocation165_spill] sm:$0xff] %v5527_v12  ;;  %v8276_v12 = vld [vmem:[#allocation92_spill] sm:$0xff] }
 0x137   :  { %1489 = vrot.lane.b32.xlu1 %v5176_v31, %s4150_s0  ;;  %v5533_v40 = vpop.permute.xlu0 %1231 }
 0x138   :  { %8224 = vst [vmem:[#allocation166_spill] sm:$0xff] %v5533_v40 }
 0x139   :  { %v5535_v19 = vpop.permute.xlu1 %1233  ;;  %1491 = vrot.lane.b32.xlu0 %v5193_v18, %s4150_s0  ;;  %v8230_v18 = vrot.slane %v4796_v43, 1 }
 0x13a   :  { %8225 = vst [vmem:[#allocation167_spill] sm:$0xff] %v5535_v19  ;;  %v8274_v19 = vld [vmem:[#allocation85_spill] sm:$0xff] }
 0x13b   :  { %1493 = vrot.lane.b32.xlu1 %v5196_v54, %s4150_s0  ;;  %v5541_v15 = vpop.permute.xlu0 %1235  ;;  %v845_v54 = vsel %vm770_vm2, %v8230_v18, %v844_v30  ;;  %v854_v18 = vrot.slane %v4898_v47, 1 }
 0x13c   :  { %8226 = vst [vmem:[#allocation168_spill] sm:$0xff] %v5541_v15  ;;  %v8273_v15 = vld [vmem:[#allocation84_spill] sm:$0xff] }
 0x13d   :  { %v5543_v17 = vpop.permute.xlu1 %1237  ;;  %1495 = vrot.lane.b32.xlu0 %v5212_v37, %s4150_s0 }
 0x13e   :  { %8227 = vst [vmem:[#allocation169_spill] sm:$0xff] %v5543_v17  ;;  %v8272_v17 = vld [vmem:[#allocation88_spill] sm:$0xff] }
 0x13f   :  { %1497 = vrot.lane.b32.xlu1 %v5215_v51, %s4150_s0  ;;  %v5550_v31 = vpop.permute.xlu0 %1239  ;;  %v8233_v51 = vrot.slane %v4794_v9, 1  ;;  %v850_v9 = vsel %vm770_vm2, %v8236_v24, %v849_v46 }
 0x140   :  { %8228 = vst [vmem:[#allocation170_spill] sm:$0xff] %v5550_v31 }
 0x141   :  { %v5552_v36 = vpop.permute.xlu1 %1241  ;;  %1499 = vrot.lane.b32.xlu0 %v5232_v56, %s4150_s0  ;;  %v1037_v56 = vsel %vm770_vm2, %v844_v30, %v8233_v51  ;;  %v8237_v30 = vrot.slane %v4829_v60, 1  ;;  %v8245_v60 = vld [vmem:[#allocation52_spill] sm:$0xff] }
 0x142   :  { %8229 = vst [vmem:[#allocation171_spill] sm:$0xff] %v5552_v36  ;;  %v8270_v36 = vld [vmem:[#allocation80_spill] sm:$0xff] }
 0x143   :  { %1501 = vrot.lane.b32.xlu1 %v5235_v20, %s4150_s0  ;;  %v5561_v37 = vpop.permute.xlu0 %1243  ;;  %v1038_v51 = vsel %vm770_vm2, %v849_v46, %v8237_v30  ;;  %v8242_v46 = vld [vmem:[#allocation51_spill] sm:$0xff] }
 0x144   :  { %8231 = vst [vmem:[#allocation172_spill] sm:$0xff] %v5561_v37 }
 0x145   :  { %v5563_v0 = vpop.permute.xlu1 %1245  ;;  %1503 = vrot.lane.b32.xlu0 %v5256_v13, %s4150_s0  ;;  %v851_v13 = vrot.slane %v4881_v53, 1  ;;  %v856_v53 = vrot.slane %v4900_v3, 1 }
 0x146   :  { %8232 = vst [vmem:[#allocation173_spill] sm:$0xff] %v5563_v0  ;;  %v8268_v0 = vld [vmem:[#allocation73_spill] sm:$0xff] }
 0x147   :  { %1505 = vrot.lane.b32.xlu1 %v845_v54, %s4150_s0  ;;  %v5572_v20 = vpop.permute.xlu0 %1247  ;;  %v852_v54 = vrot.slane %v4883_v52, 1  ;;  %v857_v52 = vrot.slane %v4914_v55, 1  ;;  %v1039_v30 = vsel %vm770_vm2, %v854_v18, %v851_v13 }
 0x148   :  { %8234 = vst [vmem:[#allocation174_spill] sm:$0xff] %v5572_v20  ;;  %v8267_v20 = vld [vmem:[#allocation72_spill] sm:$0xff] }
 0x149   :  { %v5574_v43 = vpop.permute.xlu1 %1249  ;;  %1507 = vrot.lane.b32.xlu0 %v1037_v56, %s4150_s0  ;;  %v855_v56 = vsel %vm770_vm2, %v852_v54, %v854_v18  ;;  %v858_v3 = vsel %vm770_vm2, %v856_v53, %v857_v52 }
 0x14a   :  { %8235 = vst [vmem:[#allocation175_spill] sm:$0xff] %v5574_v43 }
 0x14b   :  { %1509 = vrot.lane.b32.xlu1 %v5275_v6, %s4150_s0  ;;  %v5588_v43 = vpop.permute.xlu0 %1251  ;;  %v853_v6 = vsel %vm770_vm2, %v851_v13, %v852_v54  ;;  %v861_v54 = vrot.slane %v8245_v60, 1  ;;  %v8250_v60 = vld [vmem:[#allocation55_spill] sm:$0xff] }
 0x14c   :  { %8238 = vst [vmem:[#allocation176_spill] sm:$0xff] %v5588_v43  ;;  %v8266_v43 = vld [vmem:[#allocation76_spill] sm:$0xff] }
 0x14d   :  { %v5590_v47 = vpop.permute.xlu1 %1253  ;;  %1511 = vrot.lane.b32.xlu0 %v850_v9, %s4150_s0  ;;  %v859_v9 = vrot.slane %v8242_v46, 1 }
 0x14e   :  { %8239 = vst [vmem:[#allocation177_spill] sm:$0xff] %v5590_v47 }
 0x14f   :  { %1513 = vrot.lane.b32.xlu1 %v1038_v51, %s4150_s0  ;;  %v5598_v24 = vpop.permute.xlu0 %1255  ;;  %v860_v46 = vsel %vm770_vm2, %v857_v52, %v859_v9  ;;  %v1040_v18 = vsel %vm770_vm2, %v859_v9, %v856_v53  ;;  %v8254_v53 = vld [vmem:[#allocation57_spill] sm:$0xff] }
 0x150   :  { %8240 = vst [vmem:[#allocation178_spill] sm:$0xff] %v5598_v24  ;;  %v8247_v24 = vld [vmem:[#allocation54_spill] sm:$0xff]  ;;  %v869_v9 = vrot.slane %v8254_v53, 1 }
 0x151   :  { %v5600_v59 = vpop.permute.xlu1 %1257  ;;  %1515 = vrot.lane.b32.xlu0 %v853_v6, %s4150_s0 }
 0x152   :  { %8241 = vst [vmem:[#allocation179_spill] sm:$0xff] %v5600_v59  ;;  %v8246_v59 = vld [vmem:[#allocation53_spill] sm:$0xff] }
 0x153   :  { %1517 = vrot.lane.b32.xlu1 %v855_v56, %s4150_s0  ;;  %v5607_v51 = vpop.permute.xlu0 %1259  ;;  %v862_v6 = vrot.slane %v8246_v59, 1  ;;  %v864_v56 = vrot.slane %v8247_v24, 1 }
 0x154   :  { %8243 = vst [vmem:[#allocation51_spill] sm:$0xff] %v5607_v51 }
 0x155   :  { %v5609_v55 = vpop.permute.xlu1 %1261  ;;  %1519 = vrot.lane.b32.xlu0 %v1039_v30, %s4150_s0  ;;  %v866_v30 = vrot.slane %v8250_v60, 1  ;;  %v863_v59 = vsel %vm770_vm2, %v861_v54, %v862_v6  ;;  %v865_v24 = vsel %vm770_vm2, %v862_v6, %v864_v56 }
 0x156   :  { %8244 = vst [vmem:[#allocation180_spill] sm:$0xff] %v5609_v55  ;;  %v8251_v55 = vld [vmem:[#allocation56_spill] sm:$0xff] }
 0x157   :  { %1521 = vrot.lane.b32.xlu1 %v858_v3, %s4150_s0  ;;  %v5618_v13 = vpop.permute.xlu0 %1263  ;;  %v867_v3 = vrot.slane %v8251_v55, 1 }
 0x158   :  { %8248 = vst [vmem:[#allocation52_spill] sm:$0xff] %v5618_v13 }
 0x159   :  { %v5620_v47 = vpop.permute.xlu1 %1265  ;;  %1523 = vrot.lane.b32.xlu0 %v860_v46, %s4150_s0  ;;  %v1041_v46 = vsel %vm770_vm2, %v864_v56, %v861_v54  ;;  %v870_v53 = vsel %vm770_vm2, %v867_v3, %v869_v9  ;;  %v1042_v54 = vsel %vm770_vm2, %v869_v9, %v866_v30 }
 0x15a   :  { %8249 = vst [vmem:[#allocation53_spill] sm:$0xff] %v5620_v47  ;;  %v8257_v47 = vld [vmem:[#allocation64_spill] sm:$0xff] }
 0x15b   :  { %1525 = vrot.lane.b32.xlu1 %v1040_v18, %s4150_s0  ;;  %v5628_v51 = vpop.permute.xlu0 %1267  ;;  %v868_v18 = vsel %vm770_vm2, %v866_v30, %v867_v3  ;;  %v874_v6 = vrot.slane %v8257_v47, 1  ;;  %v8262_v47 = vld [vmem:[#allocation65_spill] sm:$0xff] }
 0x15c   :  { %8252 = vst [vmem:[#allocation54_spill] sm:$0xff] %v5628_v51  ;;  %v8259_v51 = vld [vmem:[#allocation61_spill] sm:$0xff] }
 0x15d   :  { %v5630_v52 = vpop.permute.xlu1 %1269  ;;  %1527 = vrot.lane.b32.xlu0 %v863_v59, %s4150_s0  ;;  %v8265_v30 = vld [vmem:[#allocation69_spill] sm:$0xff] }
 0x15e   :  { %8253 = vst [vmem:[#allocation55_spill] sm:$0xff] %v5630_v52  ;;  %v8258_v52 = vld [vmem:[#allocation60_spill] sm:$0xff]  ;;  %v879_v9 = vrot.slane %v8265_v30, 1 }
 0x15f   :  { %1529 = vrot.lane.b32.xlu1 %v865_v24, %s4150_s0  ;;  %v5637_v60 = vpop.permute.xlu0 %1271  ;;  %v871_v59 = vrot.slane %v8258_v52, 1  ;;  %v872_v24 = vrot.slane %v8259_v51, 1 }
 0x160   :  { %8255 = vst [vmem:[#allocation56_spill] sm:$0xff] %v5637_v60 }
 0x161   :  { %v5639_v55 = vpop.permute.xlu1 %1273  ;;  %1531 = vrot.lane.b32.xlu0 %v1041_v46, %s4150_s0  ;;  %v876_v46 = vrot.slane %v8262_v47, 1  ;;  %v873_v52 = vsel %vm770_vm2, %v871_v59, %v872_v24  ;;  %v875_v51 = vsel %vm770_vm2, %v872_v24, %v874_v6  ;;  %v884_v24 = vrot.slane %v8266_v43, 1  ;;  %v8269_v43 = vld [vmem:[#allocation77_spill] sm:$0xff] }
 0x162   :  { %8256 = vst [vmem:[#allocation57_spill] sm:$0xff] %v5639_v55  ;;  %v8263_v55 = vld [vmem:[#allocation68_spill] sm:$0xff] }
 0x163   :  { %1533 = vrot.lane.b32.xlu1 %v868_v18, %s4150_s0  ;;  %v5648_v56 = vpop.permute.xlu0 %1419  ;;  %v877_v18 = vrot.slane %v8263_v55, 1 }
 0x164   :  { %8260 = vst [vmem:[#allocation64_spill] sm:$0xff] %v5648_v56 }
 0x165   :  { %v5650_v13 = vpop.permute.xlu1 %1421  ;;  %1535 = vrot.lane.b32.xlu0 %v870_v53, %s4150_s0  ;;  %v1043_v53 = vsel %vm770_vm2, %v874_v6, %v871_v59  ;;  %v880_v30 = vsel %vm770_vm2, %v877_v18, %v879_v9  ;;  %v1044_v6 = vsel %vm770_vm2, %v879_v9, %v876_v46 }
 0x166   :  { %8261 = vst [vmem:[#allocation60_spill] sm:$0xff] %v5650_v13 }
 0x167   :  { %1537 = vrot.lane.b32.xlu1 %v1042_v54, %s4150_s0  ;;  %v5658_v60 = vpop.permute.xlu0 %1423  ;;  %v878_v54 = vsel %vm770_vm2, %v876_v46, %v877_v18  ;;  %v8271_v46 = vld [vmem:[#allocation81_spill] sm:$0xff] }
 0x168   :  { %8264 = vst [vmem:[#allocation61_spill] sm:$0xff] %v5658_v60  ;;  %v889_v9 = vrot.slane %v8271_v46, 1 }
 0x169   :  { %v5660_v3 = vpop.permute.xlu1 %1425  ;;  %1539 = vrot.lane.b32.xlu0 %v873_v52, %s4150_s0  ;;  %v881_v52 = vrot.slane %v8267_v20, 1 }
 0x16b   :  { %1541 = vrot.lane.b32.xlu1 %v875_v51, %s4150_s0  ;;  %v5667_v47 = vpop.permute.xlu0 %1427  ;;  %v882_v51 = vrot.slane %v8268_v0, 1 }
 0x16d   :  { %v5669_v55 = vpop.permute.xlu1 %1429  ;;  %1543 = vrot.lane.b32.xlu0 %v1043_v53, %s4150_s0  ;;  %v886_v53 = vrot.slane %v8269_v43, 1  ;;  %v883_v20 = vsel %vm770_vm2, %v881_v52, %v882_v51  ;;  %v885_v0 = vsel %vm770_vm2, %v882_v51, %v884_v24  ;;  %v894_v51 = vrot.slane %v8272_v17, 1  ;;  %v8275_v17 = vld [vmem:[#allocation89_spill] sm:$0xff] }
 0x16f   :  { %1545 = vrot.lane.b32.xlu1 %v878_v54, %s4150_s0  ;;  %v5678_v59 = vpop.permute.xlu0 %1431  ;;  %v887_v54 = vrot.slane %v8270_v36, 1 }
 0x171   :  { %v5680_v37 = vpop.permute.xlu1 %1433  ;;  %1547 = vrot.lane.b32.xlu0 %v880_v30, %s4150_s0  ;;  %v1045_v30 = vsel %vm770_vm2, %v884_v24, %v881_v52  ;;  %v890_v46 = vsel %vm770_vm2, %v887_v54, %v889_v9  ;;  %v1046_v24 = vsel %vm770_vm2, %v889_v9, %v886_v53 }
 0x173   :  { %1549 = vrot.lane.b32.xlu1 %v1044_v6, %s4150_s0  ;;  %v5688_v31 = vpop.permute.xlu0 %1435  ;;  %v888_v6 = vsel %vm770_vm2, %v886_v53, %v887_v54  ;;  %v8277_v53 = vld [vmem:[#allocation93_spill] sm:$0xff] }
 0x174   :  { %v899_v9 = vrot.slane %v8277_v53, 1 }
 0x175   :  { %v5690_v18 = vpop.permute.xlu1 %1437  ;;  %1551 = vrot.lane.b32.xlu0 %v883_v20, %s4150_s0  ;;  %v891_v20 = vrot.slane %v8273_v15, 1 }
 0x177   :  { %1553 = vrot.lane.b32.xlu1 %v885_v0, %s4150_s0  ;;  %v5697_v43 = vpop.permute.xlu0 %1439  ;;  %v892_v0 = vrot.slane %v8274_v19, 1 }
 0x179   :  { %v5699_v36 = vpop.permute.xlu1 %1441  ;;  %1555 = vrot.lane.b32.xlu0 %v1045_v30, %s4150_s0  ;;  %v896_v30 = vrot.slane %v8275_v17, 1  ;;  %v893_v15 = vsel %vm770_vm2, %v891_v20, %v892_v0  ;;  %v895_v19 = vsel %vm770_vm2, %v892_v0, %v894_v51  ;;  %v901_v0 = vrot.slane %v8278_v5, 1  ;;  %v8281_v5 = vld [vmem:[#allocation101_spill] sm:$0xff] }
 0x17b   :  { %1557 = vrot.lane.b32.xlu1 %v888_v6, %s4150_s0  ;;  %v5708_v52 = vpop.permute.xlu0 %1443  ;;  %v897_v6 = vrot.slane %v8276_v12, 1 }
 0x17d   :  { %v5710_v40 = vpop.permute.xlu1 %1445  ;;  %1559 = vrot.lane.b32.xlu0 %v890_v46, %s4150_s0  ;;  %v1047_v46 = vsel %vm770_vm2, %v894_v51, %v891_v20  ;;  %v900_v53 = vsel %vm770_vm2, %v897_v6, %v899_v9  ;;  %v1048_v51 = vsel %vm770_vm2, %v899_v9, %v896_v30 }
 0x17f   :  { %1561 = vrot.lane.b32.xlu1 %v1046_v24, %s4150_s0  ;;  %v5718_v11 = vpop.permute.xlu0 %1447  ;;  %v898_v24 = vsel %vm770_vm2, %v896_v30, %v897_v6  ;;  %v8283_v30 = vld [vmem:[#allocation105_spill] sm:$0xff] }
 0x180   :  { %v909_v9 = vrot.slane %v8283_v30, 1 }
 0x181   :  { %v5720_v54 = vpop.permute.xlu1 %1449  ;;  %1563 = vrot.lane.b32.xlu0 %v893_v15, %s4150_s0  ;;  %v902_v15 = vrot.slane %v8279_v62, 1 }
 0x183   :  { %1565 = vrot.lane.b32.xlu1 %v895_v19, %s4150_s0  ;;  %v5727_v17 = vpop.permute.xlu0 %1451  ;;  %v904_v19 = vrot.slane %v8280_v21, 1  ;;  %v903_v62 = vsel %vm770_vm2, %v901_v0, %v902_v15 }
 0x185   :  { %v5729_v12 = vpop.permute.xlu1 %1453  ;;  %1567 = vrot.lane.b32.xlu0 %v1047_v46, %s4150_s0  ;;  %v906_v46 = vrot.slane %v8281_v5, 1  ;;  %v905_v21 = vsel %vm770_vm2, %v902_v15, %v904_v19  ;;  %v914_v15 = vrot.slane %v5241_v33, 1  ;;  %v8288_v33 = vld [vmem:[#allocation112_spill] sm:$0xff] }
 0x187   :  { %1569 = vrot.lane.b32.xlu1 %v898_v24, %s4150_s0  ;;  %v5738_v20 = vpop.permute.xlu0 %1455  ;;  %v907_v24 = vrot.slane %v8282_v1, 1 }
 0x189   :  { %v5740_v16 = vpop.permute.xlu1 %1457  ;;  %1571 = vrot.lane.b32.xlu0 %v900_v53, %s4150_s0  ;;  %v1049_v53 = vsel %vm770_vm2, %v904_v19, %v901_v0  ;;  %v910_v30 = vsel %vm770_vm2, %v907_v24, %v909_v9  ;;  %v1050_v0 = vsel %vm770_vm2, %v909_v9, %v906_v46 }
 0x18b   :  { %1573 = vrot.lane.b32.xlu1 %v1048_v51, %s4150_s0  ;;  %v5748_v60 = vpop.permute.xlu0 %1459  ;;  %v908_v51 = vsel %vm770_vm2, %v906_v46, %v907_v24  ;;  %v8292_v46 = vld [vmem:[#allocation116_spill] sm:$0xff] }
 0x18c   :  { %v919_v9 = vrot.slane %v8292_v46, 1 }
 0x18d   :  { %v5750_v6 = vpop.permute.xlu1 %1461  ;;  %1575 = vrot.lane.b32.xlu0 %v903_v62, %s4150_s0  ;;  %v911_v62 = vrot.slane %v8284_v44, 1 }
 0x18f   :  { %1577 = vrot.lane.b32.xlu1 %v905_v21, %s4150_s0  ;;  %v5757_v5 = vpop.permute.xlu0 %1463  ;;  %v912_v21 = vrot.slane %v8285_v35, 1 }
 0x191   :  { %v5759_v1 = vpop.permute.xlu1 %1465  ;;  %1579 = vrot.lane.b32.xlu0 %v1049_v53, %s4150_s0  ;;  %v916_v53 = vrot.slane %v8288_v33, 1  ;;  %v913_v44 = vsel %vm770_vm2, %v911_v62, %v912_v21  ;;  %v915_v35 = vsel %vm770_vm2, %v912_v21, %v914_v15 }
 0x193   :  { %1581 = vrot.lane.b32.xlu1 %v908_v51, %s4150_s0  ;;  %v5768_v19 = vpop.permute.xlu0 %1467  ;;  %v917_v51 = vrot.slane %v8289_v38, 1 }
 0x194   :  { %8286 = vst [vmem:[#allocation65_spill] sm:$0xff] %v5768_v19 }
 0x195   :  { %v5770_v13 = vpop.permute.xlu1 %1469  ;;  %1583 = vrot.lane.b32.xlu0 %v910_v30, %s4150_s0  ;;  %v1051_v30 = vsel %vm770_vm2, %v914_v15, %v911_v62  ;;  %v920_v46 = vsel %vm770_vm2, %v917_v51, %v919_v9  ;;  %v1052_v15 = vsel %vm770_vm2, %v919_v9, %v916_v53 }
 0x196   :  { %8287 = vst [vmem:[#allocation68_spill] sm:$0xff] %v5770_v13  ;;  %v8295_v13 = vld [vmem:[#allocation119_spill] sm:$0xff] }
 0x197   :  { %1585 = vrot.lane.b32.xlu1 %v1050_v0, %s4150_s0  ;;  %v5778_v58 = vpop.permute.xlu0 %1471  ;;  %v918_v0 = vsel %vm770_vm2, %v916_v53, %v917_v51  ;;  %v921_v21 = vrot.slane %v8295_v13, 1  ;;  %v8300_v13 = vld [vmem:[#allocation124_spill] sm:$0xff] }
 0x198   :  { %8290 = vst [vmem:[#allocation69_spill] sm:$0xff] %v5778_v58  ;;  %v8297_v58 = vld [vmem:[#allocation123_spill] sm:$0xff]  ;;  %v8304_v53 = vld [vmem:[#allocation128_spill] sm:$0xff] }
 0x199   :  { %v5780_v24 = vpop.permute.xlu1 %1473  ;;  %1587 = vrot.lane.b32.xlu0 %v913_v44, %s4150_s0  ;;  %v929_v9 = vrot.slane %v8304_v53, 1 }
 0x19a   :  { %8291 = vst [vmem:[#allocation76_spill] sm:$0xff] %v5780_v24  ;;  %v8296_v24 = vld [vmem:[#allocation120_spill] sm:$0xff] }
 0x19b   :  { %1589 = vrot.lane.b32.xlu1 %v915_v35, %s4150_s0  ;;  %v5787_v33 = vpop.permute.xlu0 %1475  ;;  %v922_v44 = vrot.slane %v8296_v24, 1  ;;  %v924_v35 = vrot.slane %v8297_v58, 1 }
 0x19c   :  { %8293 = vst [vmem:[#allocation72_spill] sm:$0xff] %v5787_v33 }
 0x19d   :  { %v5789_v38 = vpop.permute.xlu1 %1477  ;;  %1591 = vrot.lane.b32.xlu0 %v1051_v30, %s4150_s0  ;;  %v926_v30 = vrot.slane %v8300_v13, 1  ;;  %v923_v24 = vsel %vm770_vm2, %v921_v21, %v922_v44  ;;  %v925_v58 = vsel %vm770_vm2, %v922_v44, %v924_v35 }
 0x19e   :  { %8294 = vst [vmem:[#allocation73_spill] sm:$0xff] %v5789_v38  ;;  %v8301_v38 = vld [vmem:[#allocation127_spill] sm:$0xff] }
 0x19f   :  { %1593 = vrot.lane.b32.xlu1 %v918_v0, %s4150_s0  ;;  %v5798_v62 = vpop.permute.xlu0 %1479  ;;  %v927_v0 = vrot.slane %v8301_v38, 1 }
 0x1a0   :  { %8298 = vst [vmem:[#allocation77_spill] sm:$0xff] %v5798_v62 }
 0x1a1   :  { %v5800_v19 = vpop.permute.xlu1 %1481  ;;  %1595 = vrot.lane.b32.xlu0 %v920_v46, %s4150_s0  ;;  %v1053_v46 = vsel %vm770_vm2, %v924_v35, %v921_v21  ;;  %v930_v53 = vsel %vm770_vm2, %v927_v0, %v929_v9  ;;  %v1054_v21 = vsel %vm770_vm2, %v929_v9, %v926_v30 }
 0x1a2   :  { %8299 = vst [vmem:[#allocation80_spill] sm:$0xff] %v5800_v19  ;;  %v8307_v19 = vld [vmem:[#allocation135_spill] sm:$0xff] }
 0x1a3   :  { %1597 = vrot.lane.b32.xlu1 %v1052_v15, %s4150_s0  ;;  %v5808_v33 = vpop.permute.xlu0 %1483  ;;  %v928_v15 = vsel %vm770_vm2, %v926_v30, %v927_v0  ;;  %v934_v44 = vrot.slane %v8307_v19, 1  ;;  %v8312_v19 = vld [vmem:[#allocation136_spill] sm:$0xff] }
 0x1a4   :  { %8302 = vst [vmem:[#allocation81_spill] sm:$0xff] %v5808_v33  ;;  %v8309_v33 = vld [vmem:[#allocation132_spill] sm:$0xff] }
 0x1a5   :  { %v5810_v51 = vpop.permute.xlu1 %1485  ;;  %1599 = vrot.lane.b32.xlu0 %v923_v24, %s4150_s0  ;;  %v8316_v30 = vld [vmem:[#allocation140_spill] sm:$0xff] }
 0x1a6   :  { %8303 = vst [vmem:[#allocation88_spill] sm:$0xff] %v5810_v51  ;;  %v8308_v51 = vld [vmem:[#allocation131_spill] sm:$0xff]  ;;  %v939_v9 = vrot.slane %v8316_v30, 1 }
 0x1a7   :  { %1601 = vrot.lane.b32.xlu1 %v925_v58, %s4150_s0  ;;  %v5817_v13 = vpop.permute.xlu0 %1487  ;;  %v931_v24 = vrot.slane %v8308_v51, 1  ;;  %v932_v58 = vrot.slane %v8309_v33, 1 }
 0x1a8   :  { %8305 = vst [vmem:[#allocation84_spill] sm:$0xff] %v5817_v13 }
 0x1a9   :  { %v5819_v38 = vpop.permute.xlu1 %1489  ;;  %1603 = vrot.lane.b32.xlu0 %v1053_v46, %s4150_s0  ;;  %v936_v46 = vrot.slane %v8312_v19, 1  ;;  %v933_v51 = vsel %vm770_vm2, %v931_v24, %v932_v58  ;;  %v935_v33 = vsel %vm770_vm2, %v932_v58, %v934_v44 }
 0x1aa   :  { %8306 = vst [vmem:[#allocation85_spill] sm:$0xff] %v5819_v38  ;;  %v8313_v38 = vld [vmem:[#allocation139_spill] sm:$0xff] }
 0x1ab   :  { %1605 = vrot.lane.b32.xlu1 %v928_v15, %s4150_s0  ;;  %v5828_v35 = vpop.permute.xlu0 %1491  ;;  %v937_v15 = vrot.slane %v8313_v38, 1 }
 0x1ac   :  { %8310 = vst [vmem:[#allocation89_spill] sm:$0xff] %v5828_v35  ;;  %v4087_v35 = vld [vmem:[#allocation2 + $0x1d8] sm:$0xff] }
 0x1ad   :  { %v5830_v62 = vpop.permute.xlu1 %1493  ;;  %1607 = vrot.lane.b32.xlu0 %v930_v53, %s4150_s0  ;;  %v1055_v53 = vsel %vm770_vm2, %v934_v44, %v931_v24  ;;  %v940_v30 = vsel %vm770_vm2, %v937_v15, %v939_v9  ;;  %v1056_v44 = vsel %vm770_vm2, %v939_v9, %v936_v46 }
 0x1ae   :  { %8311 = vst [vmem:[#allocation92_spill] sm:$0xff] %v5830_v62  ;;  %v8319_v62 = vld [vmem:[#allocation143_spill] sm:$0xff] }
 0x1af   :  { %1609 = vrot.lane.b32.xlu1 %v1054_v21, %s4150_s0  ;;  %v5838_v13 = vpop.permute.xlu0 %1495  ;;  %v938_v21 = vsel %vm770_vm2, %v936_v46, %v937_v15  ;;  %v941_v58 = vrot.slane %v8319_v62, 1  ;;  %v946_v62 = vrot.slane %v5367_v32, 1  ;;  %v949_v46 = vrot.slane %v5379_v8, 1  ;;  %v8329_v8 = vld [vmem:[#allocation66_spill] sm:$0xff] }
 0x1b0   :  { %8314 = vst [vmem:[#allocation93_spill] sm:$0xff] %v5838_v13 }
 0x1b1   :  { %v5840_v0 = vpop.permute.xlu1 %1497  ;;  %1611 = vrot.lane.b32.xlu0 %v933_v51, %s4150_s0 }
 0x1b2   :  { %8315 = vst [vmem:[#allocation96_spill] sm:$0xff] %v5840_v0  ;;  %v8320_v0 = vld [vmem:[#allocation144_spill] sm:$0xff] }
 0x1b3   :  { %1613 = vrot.lane.b32.xlu1 %v935_v33, %s4150_s0  ;;  %v5847_v19 = vpop.permute.xlu0 %1499  ;;  %v942_v51 = vrot.slane %v8320_v0, 1  ;;  %v944_v33 = vrot.slane %v5365_v50, 1 }
 0x1b4   :  { %8317 = vst [vmem:[#allocation97_spill] sm:$0xff] %v5847_v19 }
 0x1b5   :  { %v5849_v38 = vpop.permute.xlu1 %1501  ;;  %1615 = vrot.lane.b32.xlu0 %v1055_v53, %s4150_s0  ;;  %v947_v53 = vrot.slane %v5377_v14, 1  ;;  %v943_v0 = vsel %vm770_vm2, %v941_v58, %v942_v51  ;;  %v945_v50 = vsel %vm770_vm2, %v942_v51, %v944_v33  ;;  %v1057_v9 = vsel %vm770_vm2, %v944_v33, %v941_v58  ;;  %v8330_v58 = vld [vmem:[#allocation7_spill] sm:$0xff] }
 0x1b6   :  { %8318 = vst [vmem:[#allocation100_spill] sm:$0xff] %v5849_v38  ;;  %v1747_v33 = vsel %vm14_vm0, %v8330_v58, %v8329_v8  ;;  %v8339_v58 = vld [vmem:[#allocation70_spill] sm:$0xff]  ;;  %v4086_v38 = vld [vmem:[#allocation2 + $0x1c8] sm:$0xff] }
 0x1b7   :  { %1617 = vrot.lane.b32.xlu1 %v938_v21, %s4150_s0  ;;  %v5858_v24 = vpop.permute.xlu0 %1503  ;;  %v948_v32 = vsel %vm770_vm2, %v946_v62, %v947_v53  ;;  %v950_v51 = vsel %vm770_vm2, %v947_v53, %v949_v46  ;;  %v558_v19 = vrot.slane %v4086_v38, 7 }
 0x1b8   :  { %8321 = vst [vmem:[#allocation101_spill] sm:$0xff] %v5858_v24 }
 0x1b9   :  { %v5860_v13 = vpop.permute.xlu1 %1505  ;;  %1619 = vrot.lane.b32.xlu0 %v940_v30, %s4150_s0 }
 0x1ba   :  { %8322 = vst [vmem:[#allocation104_spill] sm:$0xff] %v5860_v13 }
 0x1bb   :  { %1621 = vrot.lane.b32.xlu1 %v1056_v44, %s4150_s0  ;;  %v5868_v21 = vpop.permute.xlu0 %1507  ;;  %v1058_v44 = vsel %vm770_vm2, %v949_v46, %v946_v62 }
 0x1bc   :  { %8323 = vst [vmem:[#allocation105_spill] sm:$0xff] %v5868_v21 }
 0x1bd   :  { %v5870_v15 = vpop.permute.xlu1 %1509  ;;  %1623 = vrot.lane.b32.xlu0 %v943_v0, %s4150_s0 }
 0x1be   :  { %8324 = vst [vmem:[#allocation108_spill] sm:$0xff] %v5870_v15 }
 0x1bf   :  { %1625 = vrot.lane.b32.xlu1 %v945_v50, %s4150_s0  ;;  %v5877_v30 = vpop.permute.xlu0 %1511 }
 0x1c0   :  { %8325 = vst [vmem:[#allocation109_spill] sm:$0xff] %v5877_v30 }
 0x1c1   :  { %v5879_v14 = vpop.permute.xlu1 %1513  ;;  %1627 = vrot.lane.b32.xlu0 %v1057_v9, %s4150_s0  ;;  %v8332_v9 = vld [vmem:[#allocation8_spill] sm:$0xff] }
 0x1c2   :  { %8326 = vst [vmem:[#allocation112_spill] sm:$0xff] %v5879_v14  ;;  %v8331_v14 = vld [vmem:[#allocation67_spill] sm:$0xff] }
 0x1c3   :  { %1629 = vrot.lane.b32.xlu1 %v948_v32, %s4150_s0  ;;  %v5885_v0 = vpop.permute.xlu0 %1515  ;;  %v1746_v32 = vsel %vm14_vm0, %v8332_v9, %v8331_v14  ;;  %v8337_v14 = vld [vmem:[#allocation58_spill] sm:$0xff]  ;;  %v8340_v9 = vld [vmem:[#allocation9_spill] sm:$0xff] }
 0x1c4   :  { %8327 = vst [vmem:[#allocation115_spill] sm:$0xff] %v5885_v0  ;;  %v5903_v46 = vsel %vm1851_vm3, %v1746_v32, %v5660_v3  ;;  %v1749_v3 = vsel %vm14_vm0, %v8340_v9, %v8339_v58  ;;  %v8346_v9 = vld [vmem:[#allocation74_spill] sm:$0xff]  ;;  %v8361_v0 = vld [vmem:[#allocation15_spill] sm:$0xff] }
 0x1c5   :  { %v5887_v50 = vpop.permute.xlu1 %1517  ;;  %1631 = vrot.lane.b32.xlu0 %v950_v51, %s4150_s0  ;;  %8335 = vst [vmem:[#allocation123_spill] sm:$0xff] %v5903_v46  ;;  %v5907_v51 = vsel %vm1851_vm3, %v1747_v33, %v5667_v47  ;;  %v5929_v33 = vsel %vm1851_vm3, %v1749_v3, %v5678_v59 }
 0x1c6   :  { %8328 = vst [vmem:[#allocation116_spill] sm:$0xff] %v5887_v50  ;;  %8336 = vst [vmem:[#allocation124_spill] sm:$0xff] %v5907_v51 }
 0x1c7   :  { %1633 = vrot.lane.b32.xlu1 %v1058_v44, %s4150_s0  ;;  %v5897_v53 = vpop.permute.xlu0 %1519  ;;  %v8338_v44 = vld [vmem:[#allocation3_spill] sm:$0xff] }
 0x1c8   :  { %8333 = vst [vmem:[#allocation119_spill] sm:$0xff] %v5897_v53  ;;  %v1748_v8 = vsel %vm14_vm0, %v8338_v44, %v8337_v14  ;;  %v8344_v14 = vld [vmem:[#allocation71_spill] sm:$0xff]  ;;  %v8345_v44 = vld [vmem:[#allocation10_spill] sm:$0xff]  ;;  %v8354_v53 = vld [vmem:[#allocation13_spill] sm:$0xff] }
 0x1c9   :  { %v5899_v62 = vpop.permute.xlu1 %1521  ;;  %2056 = vrot.lane.b32.xlu0 %v5903_v46, %s4151_s27  ;;  %v5925_v47 = vsel %vm1851_vm3, %v1748_v8, %v5669_v55  ;;  %v1750_v58 = vsel %vm14_vm0, %v8345_v44, %v8344_v14  ;;  %v8351_v14 = vld [vmem:[#allocation75_spill] sm:$0xff]  ;;  %v4088_v46 = vld [vmem:[#allocation2 + $0x1d0] sm:$0xff] }
 0x1ca   :  { %8334 = vst [vmem:[#allocation120_spill] sm:$0xff] %v5899_v62  ;;  %8343 = vst [vmem:[#allocation135_spill] sm:$0xff] %v5925_v47  ;;  %v5947_v59 = vsel %vm1851_vm3, %v1750_v58, %v5680_v37 }
 0x1cb   :  { %2058 = vrot.lane.b32.xlu1 %v5907_v51, %s4151_s27  ;;  %v5919_v32 = vpop.permute.xlu0 %1523 }
 0x1cc   :  { %8341 = vst [vmem:[#allocation127_spill] sm:$0xff] %v5919_v32 }
 0x1cd   :  { %v5921_v62 = vpop.permute.xlu1 %1525  ;;  %2060 = vrot.lane.b32.xlu0 %v5925_v47, %s4151_s27  ;;  %v356_v47 = vrot.slane %v4087_v35, 7  ;;  %v8376_v35 = vld [vmem:[#allocation20_spill] sm:$0xff] }
 0x1ce   :  { %8342 = vst [vmem:[#allocation128_spill] sm:$0xff] %v5921_v62  ;;  %v8347_v62 = vld [vmem:[#allocation11_spill] sm:$0xff] }
 0x1cf   :  { %2062 = vrot.lane.b32.xlu1 %v5929_v33, %s4151_s27  ;;  %v1751_v32 = vsel %vm14_vm0, %v8347_v62, %v8346_v9  ;;  %v5941_v55 = vpop.permute.xlu0 %1527  ;;  %v8352_v62 = vld [vmem:[#allocation12_spill] sm:$0xff]  ;;  %v8353_v9 = vld [vmem:[#allocation78_spill] sm:$0xff] }
 0x1d0   :  { %8348 = vst [vmem:[#allocation131_spill] sm:$0xff] %v5941_v55  ;;  %v5951_v3 = vsel %vm1851_vm3, %v1751_v32, %v5688_v31  ;;  %v1752_v44 = vsel %vm14_vm0, %v8352_v62, %v8351_v14  ;;  %v1753_v50 = vsel %vm14_vm0, %v8354_v53, %v8353_v9  ;;  %v8358_v14 = vld [vmem:[#allocation79_spill] sm:$0xff]  ;;  %v8359_v53 = vld [vmem:[#allocation14_spill] sm:$0xff] }
 0x1d1   :  { %v5943_v8 = vpop.permute.xlu1 %1529  ;;  %8350 = vst [vmem:[#allocation136_spill] sm:$0xff] %v5951_v3  ;;  %2064 = vrot.lane.b32.xlu0 %v5947_v59, %s4151_s27  ;;  %v5969_v31 = vsel %vm1851_vm3, %v1752_v44, %v5690_v18  ;;  %v5973_v32 = vsel %vm1851_vm3, %v1753_v50, %v5697_v43  ;;  %v1754_v62 = vsel %vm14_vm0, %v8359_v53, %v8358_v14  ;;  %v8360_v9 = vld [vmem:[#allocation82_spill] sm:$0xff]  ;;  %v8364_v14 = vld [vmem:[#allocation83_spill] sm:$0xff]  ;;  %v8365_v53 = vld [vmem:[#allocation16_spill] sm:$0xff] }
 0x1d2   :  { %8349 = vst [vmem:[#allocation132_spill] sm:$0xff] %v5943_v8  ;;  %8356 = vst [vmem:[#allocation140_spill] sm:$0xff] %v5969_v31  ;;  %v1755_v30 = vsel %vm14_vm0, %v8361_v0, %v8360_v9  ;;  %v5991_v43 = vsel %vm1851_vm3, %v1754_v62, %v5699_v36  ;;  %v2836_v0 = vld [vmem:[%s7961_s1 + $0x20] sm:$0xf]  ;;  %v1756_v36 = vsel %vm14_vm0, %v8365_v53, %v8364_v14  ;;  %v8366_v62 = vld [vmem:[#allocation86_spill] sm:$0xff] }
 0x1d3   :  { %2066 = vrot.lane.b32.xlu1 %v5951_v3, %s4151_s27  ;;  %v5963_v37 = vpop.permute.xlu0 %1531  ;;  %8357 = vst [vmem:[#allocation143_spill] sm:$0xff] %v5973_v32  ;;  %8362 = vst [vmem:[#allocation144_spill] sm:$0xff] %v5991_v43  ;;  %v5995_v50 = vsel %vm1851_vm3, %v1755_v30, %v5708_v52  ;;  %v8367_v9 = vld [vmem:[#allocation17_spill] sm:$0xff]  ;;  %3917 = vmatprep.subr.msk.mxu0 %vm3133_vm4, %v2836_v0  ;;  %v6016_v21 = vsel %vm1851_vm3, %v1756_v36, %v5710_v40  ;;  %v2835_v14 = vld [vmem:[%s7961_s1 + $0x18] sm:$0xff] }
 0x1d4   :  { %8355 = vst [vmem:[#allocation139_spill] sm:$0xff] %v5963_v37  ;;  %8363 = vst [vmem:[#allocation66_spill] sm:$0xff] %v5995_v50  ;;  %v1757_v52 = vsel %vm14_vm0, %v8367_v9, %v8366_v62  ;;  %4071 = vmatprep.subr.msk.mxu1 %vm3133_vm4, %v2836_v0  ;;  %3918 = vmatpush3.msk.msra.mxu0 %vm3133_vm4, %v2836_v0  ;;  %v2834_v40 = vld [vmem:[%s7961_s1 + $0x10] sm:$0xff]  ;;  %v8370_v53 = vld [vmem:[#allocation18_spill] sm:$0xff]  ;;  %v753_v37 = vsel %vm481_vm1, %v356_v47, %v558_v19 }
 0x1d5   :  { %v5965_v58 = vpop.permute.xlu1 %1533  ;;  %2068 = vrot.lane.b32.xlu0 %v5969_v31, %s4151_s27  ;;  %v6020_v13 = vsel %vm1851_vm3, %v1757_v52, %v5718_v11  ;;  %4076 = vmatpush3.msk.msra.mxu1 %vm3133_vm4, %v2836_v0  ;;  %v8369_v11 = vld [vmem:[#allocation87_spill] sm:$0xff]  ;;  %v8371_v62 = vld [vmem:[#allocation90_spill] sm:$0xff] }
 0x1d6   :  { %8368 = vst [vmem:[#allocation7_spill] sm:$0xff] %v6020_v13  ;;  %3919 = vmatprep.subr.mxu0 %v2835_v14  ;;  %4072 = vmatprep.subr.mxu1 %v2835_v14  ;;  %v1758_v36 = vsel %vm14_vm0, %v8370_v53, %v8369_v11  ;;  %v8372_v9 = vld [vmem:[#allocation19_spill] sm:$0xff]  ;;  %v2833_v53 = vld [vmem:[%s7961_s1 + $0x8] sm:$0xff]  ;;  %v8382_v8 = vld [vmem:[#allocation22_spill] sm:$0xff] }
 0x1d7   :  { %2070 = vrot.lane.b32.xlu1 %v5973_v32, %s4151_s27  ;;  %v5985_v18 = vpop.permute.xlu0 %1535  ;;  %v1759_v0 = vsel %vm14_vm0, %v8372_v9, %v8371_v62  ;;  %3920 = vmatpush3.msra.mxu0 %v2835_v14  ;;  %v6044_v51 = vsel %vm1851_vm3, %v1758_v36, %v5720_v54  ;;  %v8375_v54 = vld [vmem:[#allocation91_spill] sm:$0xff] }
 0x1d8   :  { %4077 = vmatpush3.msra.mxu1 %v2835_v14  ;;  %8373 = vst [vmem:[#allocation67_spill] sm:$0xff] %v6044_v51  ;;  %v6048_v11 = vsel %vm1851_vm3, %v1759_v0, %v5727_v17  ;;  %3921 = vmatprep.subr.mxu0 %v2834_v40  ;;  %v1760_v38 = vsel %vm14_vm0, %v8376_v35, %v8375_v54  ;;  %v8377_v17 = vld [vmem:[#allocation94_spill] sm:$0xff]  ;;  %v8378_v14 = vld [vmem:[#allocation21_spill] sm:$0xff]  ;;  %v2832_v0 = vld [vmem:[%s7961_s1] sm:$0xff]  ;;  %s4152_s1 = smov 24  }
 0x1d9   :  { %v5987_v44 = vpop.permute.xlu1 %1537  ;;  %2072 = vrot.lane.b32.xlu0 %v5991_v43, %s4151_s27  ;;  %8374 = vst [vmem:[#allocation8_spill] sm:$0xff] %v6048_v11  ;;  %4073 = vmatprep.subr.mxu1 %v2834_v40  ;;  %v1761_v36 = vsel %vm14_vm0, %v8378_v14, %v8377_v17  ;;  %v6073_v54 = vsel %vm1851_vm3, %v1760_v38, %v5729_v12  ;;  %v8381_v14 = vld [vmem:[#allocation95_spill] sm:$0xff] }
 0x1da   :  { %3922 = vmatpush3.msra.mxu0 %v2834_v40  ;;  %4078 = vmatpush3.msra.mxu1 %v2834_v40  ;;  %v559_v40 = vrot.slane %v4088_v46, 7  ;;  %8379 = vst [vmem:[#allocation58_spill] sm:$0xff] %v6073_v54  ;;  %v6077_v35 = vsel %vm1851_vm3, %v1761_v36, %v5738_v20  ;;  %v4089_v46 = vld [vmem:[#allocation2 + $0x1f0] sm:$0xff]  ;;  %v1762_v12 = vsel %vm14_vm0, %v8382_v8, %v8381_v14  ;;  %v4090_v36 = vld [vmem:[#allocation2 + $0x1e0] sm:$0xff] }
 0x1db   :  { %2074 = vrot.lane.b32.xlu1 %v5995_v50, %s4151_s27  ;;  %v6010_v30 = vpop.permute.xlu0 %1539  ;;  %3923 = vmatprep.subr.mxu0 %v2833_v53  ;;  %8380 = vst [vmem:[#allocation3_spill] sm:$0xff] %v6077_v35  ;;  %v357_v17 = vrot.slane %v4089_v46, 7  ;;  %v1800_v20 = vsel %vm14_vm0, %v753_v37, %v5415_v23  ;;  %v562_v55 = vrot.slane %v4090_v36, 7  ;;  %v6095_v46 = vsel %vm1851_vm3, %v1762_v12, %v5740_v16 }
 0x1dc   :  { %4074 = vmatprep.subr.mxu1 %v2833_v53  ;;  %3924 = vmatpush3.msra.mxu0 %v2833_v53  ;;  %v560_v56 = vsel %vm481_vm1, %v558_v19, %v559_v40  ;;  %8383 = vst [vmem:[#allocation70_spill] sm:$0xff] %v6095_v46  ;;  %v6099_v8 = vsel %vm1851_vm3, %v1800_v20, %v5965_v58 }
 0x1dd   :  { %v6012_v15 = vpop.permute.xlu1 %1541  ;;  %2076 = vrot.lane.b32.xlu0 %v6016_v21, %s4151_s27  ;;  %4079 = vmatpush3.msra.mxu1 %v2833_v53  ;;  %v1801_v23 = vsel %vm14_vm0, %v560_v56, %v5421_v26  ;;  %v754_v14 = vsel %vm481_vm1, %v357_v17, %v562_v55  ;;  %v561_v20 = vsel %vm481_vm1, %v559_v40, %v356_v47  ;;  %v4092_v40 = vld [vmem:[#allocation2 + $0x1f8] sm:$0xff] }
 0x1de   :  { %3925 = vmatprep.subr.mxu0 %v2832_v0  ;;  %4075 = vmatprep.subr.mxu1 %v2832_v0  ;;  %v6114_v58 = vsel %vm1851_vm3, %v1801_v23, %v5985_v18  ;;  %v1803_v26 = vsel %vm14_vm0, %v754_v14, %v5429_v48  ;;  %v1802_v48 = vsel %vm14_vm0, %v561_v20, %v5423_v27  ;;  %v566_v14 = vrot.slane %v4092_v40, 7 }
 0x1df   :  { %2078 = vrot.lane.b32.xlu1 %v6020_v13, %s4151_s27  ;;  %v6038_v52 = vpop.permute.xlu0 %1543  ;;  %3926 = vmatpush3.msra.mxu0 %v2832_v0  ;;  %v6130_v18 = vsel %vm1851_vm3, %v1803_v26, %v6010_v30  ;;  %v4093_v26 = vld [vmem:[#allocation2 + $0x208] sm:$0xff] }
 0x1e0   :  { %4080 = vmatpush3.msra.mxu1 %v2832_v0  ;;  %v4091_v0 = vld [vmem:[#allocation2 + $0x1e8] sm:$0xff]  ;;  %v358_v20 = vrot.slane %v4093_v26, 7  ;;  %v4094_v26 = vld [vmem:[#allocation2 + $0x200] sm:$0xff] }
 0x1e1   :  { %v6040_v24 = vpop.permute.xlu1 %1545  ;;  %2080 = vrot.lane.b32.xlu0 %v6044_v51, %s4151_s27  ;;  %v563_v16 = vrot.slane %v4091_v0, 7 }
 0x1e3   :  { %2082 = vrot.lane.b32.xlu1 %v6048_v11, %s4151_s27  ;;  %v6063_v62 = vpop.permute.xlu0 %1547  ;;  %v564_v36 = vsel %vm481_vm1, %v562_v55, %v563_v16  ;;  %v6146_v55 = vsel %vm1851_vm3, %v1802_v48, %v5987_v44  ;;  %v565_v44 = vsel %vm481_vm1, %v563_v16, %v357_v17 }
 0x1e4   :  { %v1804_v23 = vsel %vm14_vm0, %v564_v36, %v5431_v41 }
 0x1e5   :  { %v6065_v9 = vpop.permute.xlu1 %1549  ;;  %2084 = vrot.lane.b32.xlu0 %v6073_v54, %s4151_s27  ;;  %v6150_v30 = vsel %vm1851_vm3, %v1804_v23, %v6012_v15  ;;  %v1805_v15 = vsel %vm14_vm0, %v565_v44, %v5437_v34  ;;  %v755_v23 = vsel %vm481_vm1, %v358_v20, %v566_v14  ;;  %v567_v44 = vrot.slane %v4094_v26, 7 }
 0x1e6   :  { %v6174_v40 = vsel %vm1851_vm3, %v1805_v15, %v6038_v52  ;;  %v1806_v17 = vsel %vm14_vm0, %v755_v23, %v5439_v39 }
 0x1e7   :  { %2086 = vrot.lane.b32.xlu1 %v6077_v35, %s4151_s27  ;;  %v6088_v38 = vpop.permute.xlu0 %1551  ;;  %8384 = vst [vmem:[#allocation9_spill] sm:$0xff] %v6174_v40  ;;  %v568_v39 = vsel %vm481_vm1, %v566_v14, %v567_v44  ;;  %v569_v26 = vsel %vm481_vm1, %v567_v44, %v358_v20  ;;  %v4096_v20 = vld [vmem:[#allocation2 + $0x220] sm:$0xff] }
 0x1e8   :  { %v1808_v14 = vsel %vm14_vm0, %v569_v26, %v5447_v45  ;;  %v359_v44 = vrot.slane %v4096_v20, 7  ;;  %v4097_v26 = vld [vmem:[#allocation2 + $0x218] sm:$0xff] }
 0x1e9   :  { %v6090_v53 = vpop.permute.xlu1 %1553  ;;  %2088 = vrot.lane.b32.xlu0 %v6095_v46, %s4151_s27 }
 0x1eb   :  { %2152 = vrot.lane.b32.xlu1 %v6099_v8, %s4151_s27  ;;  %v6107_v37 = vpop.permute.xlu0 %1555 }
 0x1ed   :  { %v6109_v19 = vpop.permute.xlu1 %1557  ;;  %2154 = vrot.lane.b32.xlu0 %v6114_v58, %s4151_s27 }
 0x1ef   :  { %2350 = vrot.lane.b32.xlu1 %v5929_v33, %s4152_s1  ;;  %v6122_v56 = vpop.permute.xlu0 %1559 }
 0x1f1   :  { %v6124_v12 = vpop.permute.xlu1 %1561  ;;  %2446 = vrot.lane.b32.xlu0 %v6130_v18, %s4152_s1 }
 0x1f3   :  { %2352 = vrot.lane.b32.xlu1 %v5947_v59, %s4152_s1  ;;  %v6140_v0 = vpop.permute.xlu0 %1563 }
 0x1f5   :  { %v6142_v47 = vpop.permute.xlu1 %1565  ;;  %2448 = vrot.lane.b32.xlu0 %v6150_v30, %s4152_s1 }
 0x1f7   :  { %2156 = vrot.lane.b32.xlu1 %v6146_v55, %s4151_s27  ;;  %v6156_v27 = vpop.permute.xlu0 %1567 }
 0x1f9   :  { %v6158_v41 = vpop.permute.xlu1 %1569  ;;  %2158 = vrot.lane.b32.xlu0 %v6130_v18, %s4151_s27 }
 0x1fb   :  { %2354 = vrot.lane.b32.xlu1 %v5951_v3, %s4152_s1  ;;  %v6167_v36 = vpop.permute.xlu0 %1571  ;;  %v6188_v3 = vsel %vm1851_vm3, %v1806_v17, %v6040_v24  ;;  %v1807_v24 = vsel %vm14_vm0, %v568_v39, %v5445_v2 }
 0x1fd   :  { %v6169_v48 = vpop.permute.xlu1 %1573  ;;  %2450 = vrot.lane.b32.xlu0 %v6174_v40, %s4152_s1 }
 0x1ff   :  { %2356 = vrot.lane.b32.xlu1 %v5969_v31, %s4152_s1  ;;  %v6182_v34 = vpop.permute.xlu0 %1575  ;;  %v6212_v31 = vsel %vm1851_vm3, %v1807_v24, %v6063_v62  ;;  %v6226_v62 = vsel %vm1851_vm3, %v1808_v14, %v6065_v9 }
 0x201   :  { %v6184_v16 = vpop.permute.xlu1 %1577  ;;  %2452 = vrot.lane.b32.xlu0 %v6188_v3, %s4152_s1 }
 0x203   :  { %2160 = vrot.lane.b32.xlu1 %v6150_v30, %s4151_s27  ;;  %v6194_v52 = vpop.permute.xlu0 %1579 }
 0x205   :  { %v6196_v15 = vpop.permute.xlu1 %1581  ;;  %2162 = vrot.lane.b32.xlu0 %v6174_v40, %s4151_s27 }
 0x207   :  { %2358 = vrot.lane.b32.xlu1 %v5973_v32, %s4152_s1  ;;  %v6205_v23 = vpop.permute.xlu0 %1583  ;;  %v4095_v32 = vld [vmem:[#allocation2 + $0x210] sm:$0xff] }
 0x208   :  { %v570_v40 = vrot.slane %v4095_v32, 7 }
 0x209   :  { %v6207_v17 = vpop.permute.xlu1 %1585  ;;  %2454 = vrot.lane.b32.xlu0 %v6212_v31, %s4152_s1 }
 0x20a   :  { %v756_v32 = vsel %vm481_vm1, %v359_v44, %v570_v40 }
 0x20b   :  { %2360 = vrot.lane.b32.xlu1 %v5991_v43, %s4152_s1  ;;  %v6220_v2 = vpop.permute.xlu0 %1587  ;;  %v571_v43 = vrot.slane %v4097_v26, 7  ;;  %v1809_v9 = vsel %vm14_vm0, %v756_v32, %v5453_v49 }
 0x20c   :  { %v6250_v26 = vsel %vm1851_vm3, %v1809_v9, %v6088_v38 }
 0x20d   :  { %v6222_v39 = vpop.permute.xlu1 %1589  ;;  %2456 = vrot.lane.b32.xlu0 %v6226_v62, %s4152_s1 }
 0x20f   :  { %2164 = vrot.lane.b32.xlu1 %v6188_v3, %s4151_s27  ;;  %v6232_v24 = vpop.permute.xlu0 %1591 }
 0x210   :  { %8385 = vst [vmem:[#allocation71_spill] sm:$0xff] %v6232_v24  ;;  %v572_v24 = vsel %vm481_vm1, %v570_v40, %v571_v43 }
 0x211   :  { %v6234_v45 = vpop.permute.xlu1 %1593  ;;  %2166 = vrot.lane.b32.xlu0 %v6212_v31, %s4151_s27 }
 0x213   :  { %2362 = vrot.lane.b32.xlu1 %v5995_v50, %s4152_s1  ;;  %v6243_v14 = vpop.permute.xlu0 %1595  ;;  %v1810_v50 = vsel %vm14_vm0, %v572_v24, %v5455_v7  ;;  %v4099_v24 = vld [vmem:[#allocation2 + $0x238] sm:$0xff] }
 0x214   :  { %v6264_v40 = vsel %vm1851_vm3, %v1810_v50, %v6090_v53 }
 0x215   :  { %v6245_v20 = vpop.permute.xlu1 %1597  ;;  %2458 = vrot.lane.b32.xlu0 %v6250_v26, %s4152_s1 }
 0x216   :  { %8386 = vst [vmem:[#allocation10_spill] sm:$0xff] %v6245_v20  ;;  %v4098_v20 = vld [vmem:[#allocation2 + $0x228] sm:$0xff] }
 0x217   :  { %2364 = vrot.lane.b32.xlu1 %v6016_v21, %s4152_s1  ;;  %v6258_v49 = vpop.permute.xlu0 %1599  ;;  %v574_v7 = vrot.slane %v4098_v20, 7 }
 0x218   :  { %8387 = vst [vmem:[#allocation74_spill] sm:$0xff] %v6258_v49  ;;  %v360_v49 = vrot.slane %v4099_v24, 7 }
 0x219   :  { %v6260_v32 = vpop.permute.xlu1 %1601  ;;  %2460 = vrot.lane.b32.xlu0 %v6264_v40, %s4152_s1 }
 0x21a   :  { %8388 = vst [vmem:[#allocation11_spill] sm:$0xff] %v6260_v32  ;;  %v573_v32 = vsel %vm481_vm1, %v571_v43, %v359_v44 }
 0x21b   :  { %2168 = vrot.lane.b32.xlu1 %v6226_v62, %s4151_s27  ;;  %v6270_v38 = vpop.permute.xlu0 %1603  ;;  %v1811_v50 = vsel %vm14_vm0, %v573_v32, %v5461_v4  ;;  %v4100_v32 = vld [vmem:[#allocation2 + $0x230] sm:$0xff] }
 0x21c   :  { %8389 = vst [vmem:[#allocation75_spill] sm:$0xff] %v6270_v38  ;;  %v6288_v20 = vsel %vm1851_vm3, %v1811_v50, %v6107_v37  ;;  %v575_v24 = vrot.slane %v4100_v32, 7 }
 0x21d   :  { %v6272_v9 = vpop.permute.xlu1 %1605  ;;  %2170 = vrot.lane.b32.xlu0 %v6250_v26, %s4151_s27  ;;  %8393 = vst [vmem:[#allocation79_spill] sm:$0xff] %v6288_v20 }
 0x21e   :  { %8390 = vst [vmem:[#allocation12_spill] sm:$0xff] %v6272_v9  ;;  %v757_v9 = vsel %vm481_vm1, %v360_v49, %v574_v7  ;;  %v577_v32 = vsel %vm481_vm1, %v575_v24, %v360_v49  ;;  %v4102_v49 = vld [vmem:[#allocation2 + $0x250] sm:$0xff] }
 0x21f   :  { %2366 = vrot.lane.b32.xlu1 %v6020_v13, %s4152_s1  ;;  %v6281_v53 = vpop.permute.xlu0 %1607  ;;  %v1812_v43 = vsel %vm14_vm0, %v757_v9, %v5463_v28  ;;  %v576_v28 = vsel %vm481_vm1, %v574_v7, %v575_v24  ;;  %v1814_v7 = vsel %vm14_vm0, %v577_v32, %v5471_v42  ;;  %v361_v24 = vrot.slane %v4102_v49, 7  ;;  %v4103_v32 = vld [vmem:[#allocation2 + $0x248] sm:$0xff] }
 0x220   :  { %8391 = vst [vmem:[#allocation78_spill] sm:$0xff] %v6281_v53 }
 0x221   :  { %v6283_v38 = vpop.permute.xlu1 %1609  ;;  %2462 = vrot.lane.b32.xlu0 %v6288_v20, %s4152_s1 }
 0x222   :  { %8392 = vst [vmem:[#allocation13_spill] sm:$0xff] %v6283_v38  ;;  %v6302_v38 = vsel %vm1851_vm3, %v1812_v43, %v6109_v19  ;;  %v1813_v19 = vsel %vm14_vm0, %v576_v28, %v5469_v22 }
 0x223   :  { %2368 = vrot.lane.b32.xlu1 %v6044_v51, %s4152_s1  ;;  %v6296_v4 = vpop.permute.xlu0 %1611  ;;  %8396 = vst [vmem:[#allocation15_spill] sm:$0xff] %v6302_v38 }
 0x224   :  { %8394 = vst [vmem:[#allocation14_spill] sm:$0xff] %v6296_v4 }
 0x225   :  { %v6298_v44 = vpop.permute.xlu1 %1613  ;;  %2464 = vrot.lane.b32.xlu0 %v6302_v38, %s4152_s1 }
 0x226   :  { %8395 = vst [vmem:[#allocation82_spill] sm:$0xff] %v6298_v44 }
 0x227   :  { %2172 = vrot.lane.b32.xlu1 %v6264_v40, %s4151_s27  ;;  %v6308_v37 = vpop.permute.xlu0 %1615 }
 0x228   :  { %8397 = vst [vmem:[#allocation83_spill] sm:$0xff] %v6308_v37  ;;  %v4105_v37 = vld [vmem:[#allocation2 + $0x268] sm:$0xff] }
 0x229   :  { %v6310_v50 = vpop.permute.xlu1 %1617  ;;  %2174 = vrot.lane.b32.xlu0 %v6288_v20, %s4151_s27  ;;  %v362_v44 = vrot.slane %v4105_v37, 7  ;;  %v8432_v20 = vld [vmem:[#allocation158_spill] sm:$0xff] }
 0x22a   :  { %8398 = vst [vmem:[#allocation16_spill] sm:$0xff] %v6310_v50  ;;  %v6326_v50 = vsel %vm1851_vm3, %v1813_v19, %v6122_v56  ;;  %v6340_v56 = vsel %vm1851_vm3, %v1814_v7, %v6124_v12 }
 0x22b   :  { %2370 = vrot.lane.b32.xlu1 %v6048_v11, %s4152_s1  ;;  %v6319_v9 = vpop.permute.xlu0 %1619  ;;  %8401 = vst [vmem:[#allocation87_spill] sm:$0xff] %v6326_v50  ;;  %8404 = vst [vmem:[#allocation19_spill] sm:$0xff] %v6340_v56 }
 0x22c   :  { %8399 = vst [vmem:[#allocation86_spill] sm:$0xff] %v6319_v9 }
 0x22d   :  { %v6321_v43 = vpop.permute.xlu1 %1621  ;;  %2466 = vrot.lane.b32.xlu0 %v6326_v50, %s4152_s1 }
 0x22e   :  { %8400 = vst [vmem:[#allocation17_spill] sm:$0xff] %v6321_v43  ;;  %v4101_v43 = vld [vmem:[#allocation2 + $0x240] sm:$0xff] }
 0x22f   :  { %2372 = vrot.lane.b32.xlu1 %v6073_v54, %s4152_s1  ;;  %v6334_v22 = vpop.permute.xlu0 %1623  ;;  %v578_v9 = vrot.slane %v4101_v43, 7 }
 0x230   :  { %8402 = vst [vmem:[#allocation18_spill] sm:$0xff] %v6334_v22 }
 0x231   :  { %v6336_v28 = vpop.permute.xlu1 %1625  ;;  %2468 = vrot.lane.b32.xlu0 %v6340_v56, %s4152_s1  ;;  %v758_v43 = vsel %vm481_vm1, %v361_v24, %v578_v9 }
 0x232   :  { %8403 = vst [vmem:[#allocation90_spill] sm:$0xff] %v6336_v28  ;;  %v579_v28 = vrot.slane %v4103_v32, 7  ;;  %v1815_v12 = vsel %vm14_vm0, %v758_v43, %v5477_v25 }
 0x233   :  { %2176 = vrot.lane.b32.xlu1 %v6302_v38, %s4151_s27  ;;  %v6346_v19 = vpop.permute.xlu0 %1627  ;;  %v6364_v32 = vsel %vm1851_vm3, %v1815_v12, %v6140_v0  ;;  %v8411_v0 = vld [vmem:[#allocation98_spill] sm:$0xff]  ;;  %v8412_v12 = vld [vmem:[#allocation23_spill] sm:$0xff] }
 0x234   :  { %8405 = vst [vmem:[#allocation91_spill] sm:$0xff] %v6346_v19  ;;  %v580_v19 = vsel %vm481_vm1, %v578_v9, %v579_v28  ;;  %8409 = vst [vmem:[#allocation95_spill] sm:$0xff] %v6364_v32 }
 0x235   :  { %v6348_v42 = vpop.permute.xlu1 %1629  ;;  %2178 = vrot.lane.b32.xlu0 %v6326_v50, %s4151_s27  ;;  %v8429_v50 = vld [vmem:[#allocation64_spill] sm:$0xff] }
 0x236   :  { %8406 = vst [vmem:[#allocation20_spill] sm:$0xff] %v6348_v42  ;;  %v1816_v42 = vsel %vm14_vm0, %v580_v19, %v5479_v29  ;;  %v4104_v19 = vld [vmem:[#allocation2 + $0x258] sm:$0xff] }
 0x237   :  { %2374 = vrot.lane.b32.xlu1 %v6077_v35, %s4152_s1  ;;  %v6357_v7 = vpop.permute.xlu0 %1631  ;;  %v6378_v9 = vsel %vm1851_vm3, %v1816_v42, %v6142_v47  ;;  %v582_v22 = vrot.slane %v4104_v19, 7  ;;  %v581_v47 = vsel %vm481_vm1, %v579_v28, %v361_v24 }
 0x238   :  { %8407 = vst [vmem:[#allocation94_spill] sm:$0xff] %v6357_v7  ;;  %8410 = vst [vmem:[#allocation22_spill] sm:$0xff] %v6378_v9  ;;  %v1817_v19 = vsel %vm14_vm0, %v581_v47, %v5485_v63 }
 0x239   :  { %v6359_v49 = vpop.permute.xlu1 %1633  ;;  %2470 = vrot.lane.b32.xlu0 %v6364_v32, %s4152_s1 }
 0x23a   :  { %8408 = vst [vmem:[#allocation21_spill] sm:$0xff] %v6359_v49  ;;  %v1763_v49 = vsel %vm14_vm0, %v8412_v12, %v8411_v0  ;;  %v8414_v0 = vld [vmem:[#allocation99_spill] sm:$0xff]  ;;  %v8415_v12 = vld [vmem:[#allocation24_spill] sm:$0xff] }
 0x23b   :  { %2376 = vrot.lane.b32.xlu1 %v6095_v46, %s4152_s1  ;;  %v6372_v25 = vpop.permute.xlu0 %2056  ;;  %v6394_v42 = vsel %vm1851_vm3, %v1763_v49, %v5748_v60  ;;  %v1764_v4 = vsel %vm14_vm0, %v8415_v12, %v8414_v0  ;;  %v759_v60 = vsel %vm481_vm1, %v362_v44, %v582_v22  ;;  %v6416_v49 = vsel %vm1851_vm3, %v1817_v19, %v6156_v27  ;;  %v4106_v12 = vld [vmem:[#allocation2 + $0x260] sm:$0xff] }
 0x23c   :  { %8413 = vst [vmem:[#allocation98_spill] sm:$0xff] %v6394_v42  ;;  %v6412_v24 = vsel %vm1851_vm3, %v1764_v4, %v5750_v6  ;;  %8417 = vst [vmem:[#allocation99_spill] sm:$0xff] %v6416_v49  ;;  %v1818_v63 = vsel %vm14_vm0, %v759_v60, %v5487_v10  ;;  %v583_v6 = vrot.slane %v4106_v12, 7  ;;  %v8420_v60 = vld [vmem:[#allocation25_spill] sm:$0xff] }
 0x23d   :  { %v6374_v43 = vpop.permute.xlu1 %2058  ;;  %2472 = vrot.lane.b32.xlu0 %v6378_v9, %s4152_s1  ;;  %8416 = vst [vmem:[#allocation23_spill] sm:$0xff] %v6412_v24  ;;  %v6430_v4 = vsel %vm1851_vm3, %v1818_v63, %v6158_v41  ;;  %v8419_v41 = vld [vmem:[#allocation102_spill] sm:$0xff] }
 0x23e   :  { %8418 = vst [vmem:[#allocation24_spill] sm:$0xff] %v6430_v4  ;;  %v584_v10 = vsel %vm481_vm1, %v582_v22, %v583_v6  ;;  %v1765_v63 = vsel %vm14_vm0, %v8420_v60, %v8419_v41  ;;  %v585_v46 = vsel %vm481_vm1, %v583_v6, %v362_v44 }
 0x23f   :  { %2180 = vrot.lane.b32.xlu1 %v6340_v56, %s4151_s27  ;;  %v6387_v7 = vpop.permute.xlu0 %2060  ;;  %v1819_v12 = vsel %vm14_vm0, %v584_v10, %v5493_v57  ;;  %v6457_v22 = vsel %vm1851_vm3, %v1765_v63, %v5757_v5  ;;  %v8423_v57 = vld [vmem:[#allocation103_spill] sm:$0xff]  ;;  %v8424_v10 = vld [vmem:[#allocation26_spill] sm:$0xff]  ;;  %v1820_v44 = vsel %vm14_vm0, %v585_v46, %v5495_v61  ;;  %v4107_v46 = vld [vmem:[#allocation2 + $0x270] sm:$0xff] }
 0x240   :  { %8421 = vst [vmem:[#allocation102_spill] sm:$0xff] %v6457_v22  ;;  %v1766_v41 = vsel %vm14_vm0, %v8424_v10, %v8423_v57  ;;  %v6482_v60 = vsel %vm1851_vm3, %v1820_v44, %v6169_v48  ;;  %v6492_v57 = vld [vmem:[#allocation2 + $0x280] sm:$0xff]  ;;  %v4109_v48 = vld [vmem:[#allocation2 + $0x1b0] sm:$0xff] }
 0x241   :  { %v6389_v29 = vpop.permute.xlu1 %2062  ;;  %2182 = vrot.lane.b32.xlu0 %v6364_v32, %s4151_s27  ;;  %v554_v10 = vrot.slane %v4109_v48, 7  ;;  %v8427_v56 = vld [vmem:[#allocation59_spill] sm:$0xff] }
 0x243   :  { %2378 = vrot.lane.b32.xlu1 %v6394_v42, %s4152_s1  ;;  %v6405_v37 = vpop.permute.xlu0 %2064 }
 0x245   :  { %v6407_v28 = vpop.permute.xlu1 %2066  ;;  %2474 = vrot.lane.b32.xlu0 %v6416_v49, %s4152_s1 }
 0x247   :  { %2380 = vrot.lane.b32.xlu1 %v6412_v24, %s4152_s1  ;;  %v6424_v47 = vpop.permute.xlu0 %2068 }
 0x249   :  { %v6426_v0 = vpop.permute.xlu1 %2070  ;;  %2476 = vrot.lane.b32.xlu0 %v6430_v4, %s4152_s1 }
 0x24b   :  { %2184 = vrot.lane.b32.xlu1 %v6378_v9, %s4151_s27  ;;  %v6436_v27 = vpop.permute.xlu0 %2072 }
 0x24d   :  { %v6438_v19 = vpop.permute.xlu1 %2074  ;;  %2090 = vrot.lane.b32.xlu0 %v6394_v42, %s4151_s27 }
 0x24f   :  { %2186 = vrot.lane.b32.xlu1 %v6416_v49, %s4151_s27  ;;  %v6450_v53 = vpop.permute.xlu0 %2076  ;;  %v6461_v49 = vsel %vm1851_vm3, %v1819_v12, %v6167_v36  ;;  %v6478_v36 = vsel %vm1851_vm3, %v1766_v41, %v5759_v1  ;;  %v586_v12 = vrot.slane %v4107_v46, 7  ;;  %v8043_v1 = vrot.slane %v6492_v57, 7  ;;  %v6499_v41 = vld [vmem:[#allocation2 + $0x1c0] sm:$0xff]  ;;  %v6504_v46 = vld [vmem:[#allocation2 + $0x278] sm:$0xff] }
 0x250   :  { %8422 = vst [vmem:[#allocation25_spill] sm:$0xff] %v6461_v49  ;;  %v355_v44 = vrot.slane %v6499_v41, 7  ;;  %v4112_v41 = vld [vmem:[#allocation2 + $0x1b8] sm:$0xff] }
 0x251   :  { %v6452_v9 = vpop.permute.xlu1 %2078  ;;  %2382 = vrot.lane.b32.xlu0 %v6457_v22, %s4152_s1  ;;  %v555_v54 = vrot.slane %v4112_v41, 7  ;;  %v8433_v41 = vrot.slane %v6504_v46, 7 }
 0x252   :  { %v752_v35 = vsel %vm481_vm1, %v355_v44, %v554_v10 }
 0x253   :  { %2478 = vrot.lane.b32.xlu1 %v6461_v49, %s4152_s1  ;;  %v6472_v6 = vpop.permute.xlu0 %2080  ;;  %v588_v51 = vsel %vm481_vm1, %v586_v12, %v8433_v41  ;;  %v8442_v41 = vld [vmem:[#allocation159_spill] sm:$0xff] }
 0x255   :  { %v6474_v5 = vpop.permute.xlu1 %2082  ;;  %2384 = vrot.lane.b32.xlu0 %v6478_v36, %s4152_s1 }
 0x257   :  { %2480 = vrot.lane.b32.xlu1 %v6482_v60, %s4152_s1  ;;  %v6488_v63 = vpop.permute.xlu0 %2084 }
 0x259   :  { %v6490_v61 = vpop.permute.xlu1 %2086  ;;  %2092 = vrot.lane.b32.xlu0 %v6412_v24, %s4151_s27  ;;  %v760_v24 = vsel %vm481_vm1, %v8043_v1, %v586_v12  ;;  %v8430_v1 = vld [vmem:[#allocation106_spill] sm:$0xff]  ;;  %v8439_v12 = vld [vmem:[#allocation131_spill] sm:$0xff] }
 0x25a   :  { %8425 = vst [vmem:[#allocation103_spill] sm:$0xff] %v6490_v61  ;;  %v8434_v61 = vld [vmem:[#allocation65_spill] sm:$0xff] }
 0x25b   :  { %2188 = vrot.lane.b32.xlu1 %v6430_v4, %s4151_s27  ;;  %v6502_v42 = vpop.permute.xlu0 %2088  ;;  %v8428_v4 = vld [vmem:[#allocation4_spill] sm:$0xff] }
 0x25c   :  { %8426 = vst [vmem:[#allocation26_spill] sm:$0xff] %v6502_v42  ;;  %v1743_v48 = vsel %vm14_vm0, %v8428_v4, %v8427_v56  ;;  %v8431_v42 = vld [vmem:[#allocation27_spill] sm:$0xff]  ;;  %v1821_v56 = vsel %vm14_vm0, %v760_v24, %v8432_v20 }
 0x25d   :  { %v2153_v32 = vpop.permute.xlu1 %2152  ;;  %2094 = vrot.lane.b32.xlu0 %v6457_v22, %s4151_s27  ;;  %v1852_v11 = vsel %vm1851_vm3, %v1743_v48, %v8429_v50  ;;  %v1767_v38 = vsel %vm14_vm0, %v8431_v42, %v8430_v1  ;;  %v6536_v42 = vsel %vm1851_vm3, %v1821_v56, %v6182_v34  ;;  %v8435_v24 = vld [vmem:[#allocation63_spill] sm:$0xff]  ;;  %v8436_v1 = vld [vmem:[#allocation6_spill] sm:$0xff] }
 0x25e   :  { %v2639_v4 = vsel %vm2638_vm5, %v1852_v11, %v6372_v25  ;;  %v6532_v50 = vsel %vm1851_vm3, %v1767_v38, %v8434_v61  ;;  %v1744_v11 = vsel %vm14_vm0, %v8436_v1, %v8435_v24  ;;  %v8437_v25 = vld [vmem:[#allocation155_spill] sm:$0xff]  ;;  %v556_v38 = vsel %vm481_vm1, %v554_v10, %v555_v54  ;;  %v8438_v61 = vld [vmem:[#allocation60_spill] sm:$0xff] }
 0x25f   :  { %2190 = vrot.lane.b32.xlu1 %v6461_v49, %s4151_s27  ;;  %v2155_v22 = vpop.permute.xlu0 %2154  ;;  %v1797_v48 = vsel %vm14_vm0, %v752_v35, %v8437_v25  ;;  %v1853_v34 = vsel %vm1851_vm3, %v1744_v11, %v8438_v61  ;;  %v8440_v56 = vld [vmem:[#allocation107_spill] sm:$0xff]  ;;  %v1822_v24 = vsel %vm14_vm0, %v588_v51, %v8442_v41  ;;  %v8443_v11 = vld [vmem:[#allocation68_spill] sm:$0xff] }
 0x260   :  { %v2640_v1 = vsel %vm2638_vm5, %v1853_v34, %v6374_v43  ;;  %v8444_v51 = vld [vmem:[#allocation156_spill] sm:$0xff] }
 0x261   :  { %v2351_v49 = vpop.permute.xlu1 %2350  ;;  %2386 = vrot.lane.b32.xlu0 %v6532_v50, %s4152_s1  ;;  %v4113_v41 = vld [vmem:[#allocation2 + $0x288] sm:$0xff] }
 0x262   :  { %v2736_v20 = vsel %vm2735_vm6, %v2639_v4, %v2351_v49  ;;  %v1906_v49 = vsel %vm1851_vm3, %v1797_v48, %v8439_v12  ;;  %v8441_v4 = vld [vmem:[#allocation28_spill] sm:$0xff] }
 0x263   :  { %2482 = vrot.lane.b32.xlu1 %v6536_v42, %s4152_s1  ;;  %3927 = vmatprep.mubr.msk.f32.mxu0 %vm2844_vm7, %v2736_v20  ;;  %v1768_v35 = vsel %vm14_vm0, %v8441_v4, %v8440_v56  ;;  %v2687_v10 = vsel %vm2638_vm5, %v1906_v49, %v2153_v32  ;;  %v2447_v25 = vpop.permute.xlu0 %2446  ;;  %v6568_v20 = vsel %vm1851_vm3, %v1822_v24, %v6184_v16  ;;  %v8445_v32 = vld [vmem:[#allocation132_spill] sm:$0xff]  ;;  %v8447_v4 = vld [vmem:[#allocation5_spill] sm:$0xff]  ;;  %v590_v24 = vrot.slane %v4113_v41, 7  ;;  %v8456_v41 = vld [vmem:[#allocation123_spill] sm:$0xff] }
 0x264   :  { %v6564_v61 = vsel %vm1851_vm3, %v1768_v35, %v8443_v11  ;;  %v2784_v12 = vsel %vm2735_vm6, %v2687_v10, %v2447_v25  ;;  %v1798_v56 = vsel %vm14_vm0, %v556_v38, %v8444_v51  ;;  %v8446_v38 = vld [vmem:[#allocation62_spill] sm:$0xff]  ;;  %v557_v10 = vsel %vm481_vm1, %v555_v54, %v355_v44  ;;  %v8448_v25 = vld [vmem:[#allocation61_spill] sm:$0xff] }
 0x265   :  { %v2353_v13 = vpop.permute.xlu1 %2352  ;;  %2388 = vrot.lane.b32.xlu0 %v6564_v61, %s4152_s1  ;;  %v1907_v43 = vsel %vm1851_vm3, %v1798_v56, %v8445_v32  ;;  %3999 = vmatprep.mubr.msk.f32.mxu1 %vm2844_vm7, %v2784_v12  ;;  %v1745_v35 = vsel %vm14_vm0, %v8447_v4, %v8446_v38  ;;  %v8449_v56 = vrot.slane %v6492_v57, 7  ;;  %v8450_v32 = vrot.slane %v6504_v46, 7  ;;  %v8452_v57 = vld [vmem:[#allocation139_spill] sm:$0xff]  ;;  %v8453_v46 = vld [vmem:[#allocation110_spill] sm:$0xff]  ;;  %v8455_v4 = vld [vmem:[#allocation160_spill] sm:$0xff] }
 0x266   :  { %v2737_v48 = vsel %vm2735_vm6, %v2640_v1, %v2353_v13  ;;  %v2688_v13 = vsel %vm2638_vm5, %v1907_v43, %v2155_v22  ;;  %v6591_v1 = vld [vmem:[#allocation2 + $0x298] sm:$0xff]  ;;  %v1854_v11 = vsel %vm1851_vm3, %v1745_v35, %v8448_v25 }
 0x267   :  { %2484 = vrot.lane.b32.xlu1 %v6568_v20, %s4152_s1  ;;  %3928 = vmatmul.mubr.msk.f32.vlgmr.msra.gmra.mxu0 %vm2844_vm7, %v2737_v48  ;;  %v2449_v16 = vpop.permute.xlu0 %2448  ;;  %v364_v22 = vrot.slane %v6591_v1, 7  ;;  %v2641_v48 = vsel %vm2638_vm5, %v1854_v11, %v6387_v7  ;;  %v589_v43 = vsel %vm481_vm1, %v8450_v32, %v8449_v56  ;;  %v8469_v1 = vld [vmem:[#allocation32_spill] sm:$0xff] }
 0x268   :  { %v2785_v49 = vsel %vm2735_vm6, %v2688_v13, %v2449_v16  ;;  %v8451_v16 = vld [vmem:[#allocation157_spill] sm:$0xff]  ;;  %v1823_v35 = vsel %vm14_vm0, %v589_v43, %v8455_v4 }
 0x269   :  { %v2157_v34 = vpop.permute.xlu1 %2156  ;;  %2096 = vrot.lane.b32.xlu0 %v6478_v36, %s4151_s27  ;;  %4000 = vmatmul.mubr.msk.f32.vlgmr.msra.gmra.mxu1 %vm2844_vm7, %v2785_v49  ;;  %v1799_v54 = vsel %vm14_vm0, %v557_v10, %v8451_v16  ;;  %v761_v7 = vsel %vm481_vm1, %v364_v22, %v590_v24  ;;  %v8454_v49 = vld [vmem:[#allocation29_spill] sm:$0xff]  ;;  %v2642_v10 = vsel %vm2638_vm5, %v8456_v41, %v6389_v29  ;;  %v8458_v29 = vld [vmem:[#allocation111_spill] sm:$0xff] }
 0x26a   :  { %v1908_v44 = vsel %vm1851_vm3, %v1799_v54, %v8452_v57  ;;  %v1769_v38 = vsel %vm14_vm0, %v8454_v49, %v8453_v46  ;;  %v6633_v32 = vsel %vm1851_vm3, %v1823_v35, %v6194_v52  ;;  %v8460_v52 = vld [vmem:[#allocation161_spill] sm:$0xff]  ;;  %v8461_v49 = vld [vmem:[#allocation76_spill] sm:$0xff] }
 0x26b   :  { %2192 = vrot.lane.b32.xlu1 %v6482_v60, %s4151_s27  ;;  %v2159_v12 = vpop.permute.xlu0 %2158  ;;  %v2689_v25 = vsel %vm2638_vm5, %v1908_v44, %v2157_v34  ;;  %v8459_v34 = vld [vmem:[#allocation30_spill] sm:$0xff]  ;;  %v1824_v54 = vsel %vm14_vm0, %v761_v7, %v8460_v52 }
 0x26c   :  { %v1770_v16 = vsel %vm14_vm0, %v8459_v34, %v8458_v29  ;;  %v2690_v57 = vsel %vm2638_vm5, %v6099_v8, %v2159_v12  ;;  %v6656_v4 = vsel %vm1851_vm3, %v1824_v54, %v6196_v15  ;;  %v8462_v8 = vld [vmem:[#allocation124_spill] sm:$0xff]  ;;  %v8466_v52 = vld [vmem:[#allocation162_spill] sm:$0xff] }
 0x26d   :  { %v2355_v51 = vpop.permute.xlu1 %2354  ;;  %2098 = vrot.lane.b32.xlu0 %v6532_v50, %s4151_s27  ;;  %v2643_v12 = vsel %vm2638_vm5, %v8462_v8, %v6405_v37 }
 0x26e   :  { %v2738_v13 = vsel %vm2735_vm6, %v2641_v48, %v2355_v51  ;;  %v8457_v51 = vld [vmem:[#allocation69_spill] sm:$0xff] }
 0x26f   :  { %2194 = vrot.lane.b32.xlu1 %v6536_v42, %s4151_s27  ;;  %3930 = vmatprep.mubr.msk.f32.mxu0 %vm2844_vm7, %v2738_v13  ;;  %v2451_v11 = vpop.permute.xlu0 %2450  ;;  %v6629_v56 = vsel %vm1851_vm3, %v1769_v38, %v8457_v51  ;;  %v6652_v38 = vsel %vm1851_vm3, %v1770_v16, %v8461_v49  ;;  %v8467_v49 = vld [vmem:[#allocation72_spill] sm:$0xff] }
 0x270   :  { %v2786_v13 = vsel %vm2735_vm6, %v2689_v25, %v2451_v11  ;;  %v8463_v11 = vld [vmem:[#allocation135_spill] sm:$0xff] }
 0x271   :  { %v2357_v48 = vpop.permute.xlu1 %2356  ;;  %2390 = vrot.lane.b32.xlu0 %v6629_v56, %s4152_s1  ;;  %4002 = vmatprep.mubr.msk.f32.mxu1 %vm2844_vm7, %v2786_v13 }
 0x272   :  { %v2739_v43 = vsel %vm2735_vm6, %v2642_v10, %v2357_v48  ;;  %v4115_v10 = vld [vmem:[#allocation2 + $0x290] sm:$0xff]  ;;  %v2644_v48 = vsel %vm2638_vm5, %v8463_v11, %v6407_v28 }
 0x273   :  { %2486 = vrot.lane.b32.xlu1 %v6633_v32, %s4152_s1  ;;  %3931 = vmatmul.mubr.msk.f32.gmra.mxu0 %vm2844_vm7, %v2739_v43  ;;  %v2453_v44 = vpop.permute.xlu0 %2452  ;;  %v591_v25 = vrot.slane %v4115_v10, 7  ;;  %v8464_v28 = vld [vmem:[#allocation113_spill] sm:$0xff] }
 0x274   :  { %v2787_v35 = vsel %vm2735_vm6, %v2690_v57, %v2453_v44 }
 0x275   :  { %v2161_v46 = vpop.permute.xlu1 %2160  ;;  %2392 = vrot.lane.b32.xlu0 %v6652_v38, %s4152_s1  ;;  %4003 = vmatmul.mubr.msk.f32.gmra.mxu1 %vm2844_vm7, %v2787_v35  ;;  %v592_v43 = vsel %vm481_vm1, %v590_v24, %v591_v25 }
 0x276   :  { %v2691_v37 = vsel %vm2638_vm5, %v6114_v58, %v2161_v46  ;;  %v8465_v58 = vld [vmem:[#allocation31_spill] sm:$0xff]  ;;  %v1825_v24 = vsel %vm14_vm0, %v592_v43, %v8466_v52  ;;  %v593_v46 = vsel %vm481_vm1, %v591_v25, %v364_v22 }
 0x277   :  { %2488 = vrot.lane.b32.xlu1 %v6656_v4, %s4152_s1  ;;  %v2163_v7 = vpop.permute.xlu0 %2162  ;;  %v1771_v16 = vsel %vm14_vm0, %v8465_v58, %v8464_v28  ;;  %v6703_v8 = vsel %vm1851_vm3, %v1825_v24, %v6205_v23  ;;  %v2645_v23 = vsel %vm2638_vm5, %v5929_v33, %v6424_v47  ;;  %v2646_v33 = vsel %vm2638_vm5, %v5947_v59, %v6426_v0 }
 0x278   :  { %v2692_v54 = vsel %vm2638_vm5, %v6146_v55, %v2163_v7  ;;  %v6699_v35 = vsel %vm1851_vm3, %v1771_v16, %v8467_v49  ;;  %v8468_v55 = vld [vmem:[#allocation114_spill] sm:$0xff]  ;;  %v8470_v7 = vld [vmem:[#allocation163_spill] sm:$0xff]  ;;  %v4118_v16 = vld [vmem:[#allocation2 + $0x2a8] sm:$0xff] }
 0x279   :  { %v2359_v41 = vpop.permute.xlu1 %2358  ;;  %2100 = vrot.lane.b32.xlu0 %v6564_v61, %s4151_s27  ;;  %v1772_v22 = vsel %vm14_vm0, %v8469_v1, %v8468_v55  ;;  %v595_v52 = vrot.slane %v4118_v16, 7 }
 0x27a   :  { %v2740_v15 = vsel %vm2735_vm6, %v2643_v12, %v2359_v41  ;;  %v1826_v41 = vsel %vm14_vm0, %v593_v46, %v8470_v7  ;;  %v8474_v46 = vld [vmem:[#allocation164_spill] sm:$0xff] }
 0x27b   :  { %2196 = vrot.lane.b32.xlu1 %v6568_v20, %s4151_s27  ;;  %3933 = vmatprep.mubr.msk.f32.mxu0 %vm2844_vm7, %v2740_v15  ;;  %v2455_v51 = vpop.permute.xlu0 %2454  ;;  %v8471_v15 = vld [vmem:[#allocation73_spill] sm:$0xff] }
 0x27c   :  { %v2788_v29 = vsel %vm2735_vm6, %v2691_v37, %v2455_v51  ;;  %v6721_v11 = vsel %vm1851_vm3, %v1772_v22, %v8471_v15  ;;  %v8478_v15 = vld [vmem:[#allocation34_spill] sm:$0xff] }
 0x27d   :  { %v2361_v13 = vpop.permute.xlu1 %2360  ;;  %2102 = vrot.lane.b32.xlu0 %v6629_v56, %s4151_s27  ;;  %4005 = vmatprep.mubr.msk.f32.mxu1 %vm2844_vm7, %v2788_v29  ;;  %v4117_v29 = vld [vmem:[#allocation2 + $0x2b0] sm:$0xff] }
 0x27e   :  { %v2741_v34 = vsel %vm2735_vm6, %v2644_v48, %v2361_v13  ;;  %v6725_v48 = vsel %vm1851_vm3, %v1826_v41, %v6207_v17  ;;  %v4116_v13 = vld [vmem:[#allocation2 + $0x2a0] sm:$0xff]  ;;  %v8476_v41 = vld [vmem:[#allocation77_spill] sm:$0xff] }
 0x27f   :  { %2198 = vrot.lane.b32.xlu1 %v6633_v32, %s4151_s27  ;;  %3934 = vmatmul.mubr.msk.f32.gmra.mxu0 %vm2844_vm7, %v2741_v34  ;;  %v2457_v57 = vpop.permute.xlu0 %2456  ;;  %v594_v43 = vrot.slane %v4116_v13, 7  ;;  %v365_v34 = vrot.slane %v4117_v29, 7 }
 0x280   :  { %v2789_v12 = vsel %vm2735_vm6, %v2692_v54, %v2457_v57  ;;  %v8472_v57 = vld [vmem:[#allocation117_spill] sm:$0xff] }
 0x281   :  { %v2165_v44 = vpop.permute.xlu1 %2164  ;;  %2394 = vrot.lane.b32.xlu0 %v6699_v35, %s4152_s1  ;;  %4006 = vmatmul.mubr.msk.f32.gmra.mxu1 %vm2844_vm7, %v2789_v12  ;;  %v762_v24 = vsel %vm481_vm1, %v365_v34, %v594_v43  ;;  %v8475_v12 = vld [vmem:[#allocation136_spill] sm:$0xff]  ;;  %v596_v7 = vsel %vm481_vm1, %v594_v43, %v595_v52 }
 0x282   :  { %v2693_v47 = vsel %vm2638_vm5, %v6130_v18, %v2165_v44  ;;  %v8473_v44 = vld [vmem:[#allocation33_spill] sm:$0xff]  ;;  %v1827_v49 = vsel %vm14_vm0, %v762_v24, %v8474_v46  ;;  %v2647_v55 = vsel %vm2638_vm5, %v8475_v12, %v6436_v27  ;;  %v8477_v27 = vld [vmem:[#allocation118_spill] sm:$0xff] }
 0x283   :  { %2490 = vrot.lane.b32.xlu1 %v6703_v8, %s4152_s1  ;;  %v2167_v10 = vpop.permute.xlu0 %2166 }
 0x284   :  { %v2694_v59 = vsel %vm2638_vm5, %v6150_v30, %v2167_v10  ;;  %v1773_v30 = vsel %vm14_vm0, %v8473_v44, %v8472_v57  ;;  %v6770_v10 = vsel %vm1851_vm3, %v1827_v49, %v6220_v2  ;;  %v8480_v2 = vld [vmem:[#allocation140_spill] sm:$0xff] }
 0x285   :  { %v2363_v25 = vpop.permute.xlu1 %2362  ;;  %2396 = vrot.lane.b32.xlu0 %v6721_v11, %s4152_s1  ;;  %v6811_v44 = vld [vmem:[#allocation2 + $0x2c8] sm:$0xff] }
 0x286   :  { %v2742_v37 = vsel %vm2735_vm6, %v2645_v23, %v2363_v25  ;;  %v6766_v23 = vsel %vm1851_vm3, %v1773_v30, %v8476_v41  ;;  %v366_v30 = vrot.slane %v6811_v44, 7  ;;  %v8485_v41 = vld [vmem:[#allocation35_spill] sm:$0xff] }
 0x287   :  { %2492 = vrot.lane.b32.xlu1 %v6725_v48, %s4152_s1  ;;  %3936 = vmatprep.mubr.msk.f32.mxu0 %vm2844_vm7, %v2742_v37  ;;  %v2459_v51 = vpop.permute.xlu0 %2458  ;;  %v1774_v37 = vsel %vm14_vm0, %v8478_v15, %v8477_v27 }
 0x288   :  { %v2790_v28 = vsel %vm2735_vm6, %v2693_v47, %v2459_v51  ;;  %v2648_v51 = vsel %vm2638_vm5, %v8480_v2, %v6438_v19 }
 0x289   :  { %v2365_v17 = vpop.permute.xlu1 %2364  ;;  %2104 = vrot.lane.b32.xlu0 %v6652_v38, %s4151_s27  ;;  %4008 = vmatprep.mubr.msk.f32.mxu1 %vm2844_vm7, %v2790_v28  ;;  %v8482_v28 = vld [vmem:[#allocation80_spill] sm:$0xff] }
 0x28a   :  { %v2743_v58 = vsel %vm2735_vm6, %v2646_v33, %v2365_v17  ;;  %v8479_v33 = vld [vmem:[#allocation165_spill] sm:$0xff] }
 0x28b   :  { %2200 = vrot.lane.b32.xlu1 %v6656_v4, %s4151_s27  ;;  %3937 = vmatmul.mubr.msk.f32.gmra.mxu0 %vm2844_vm7, %v2743_v58  ;;  %v2461_v18 = vpop.permute.xlu0 %2460  ;;  %v1828_v47 = vsel %vm14_vm0, %v596_v7, %v8479_v33  ;;  %v8481_v17 = vld [vmem:[#allocation9_spill] sm:$0xff]  ;;  %v6790_v58 = vsel %vm1851_vm3, %v1774_v37, %v8482_v28  ;;  %v8492_v28 = vld [vmem:[#allocation167_spill] sm:$0xff] }
 0x28c   :  { %v2791_v54 = vsel %vm2735_vm6, %v2694_v59, %v2461_v18  ;;  %v6794_v59 = vsel %vm1851_vm3, %v1828_v47, %v6222_v39  ;;  %v8484_v7 = vld [vmem:[#allocation121_spill] sm:$0xff] }
 0x28d   :  { %v2169_v0 = vpop.permute.xlu1 %2168  ;;  %2106 = vrot.lane.b32.xlu0 %v6699_v35, %s4151_s27  ;;  %4009 = vmatmul.mubr.msk.f32.gmra.mxu1 %vm2844_vm7, %v2791_v54  ;;  %v4119_v54 = vld [vmem:[#allocation2 + $0x2b8] sm:$0xff]  ;;  %v8488_v47 = vld [vmem:[#allocation81_spill] sm:$0xff] }
 0x28e   :  { %v2695_v13 = vsel %vm2638_vm5, %v8481_v17, %v2169_v0  ;;  %v598_v57 = vrot.slane %v4119_v54, 7 }
 0x28f   :  { %2202 = vrot.lane.b32.xlu1 %v6703_v8, %s4151_s27  ;;  %v2171_v1 = vpop.permute.xlu0 %2170 }
 0x290   :  { %v2696_v19 = vsel %vm2638_vm5, %v6188_v3, %v2171_v1  ;;  %v8483_v3 = vld [vmem:[#allocation143_spill] sm:$0xff] }
 0x291   :  { %v2367_v22 = vpop.permute.xlu1 %2366  ;;  %2398 = vrot.lane.b32.xlu0 %v6766_v23, %s4152_s1  ;;  %v2649_v46 = vsel %vm2638_vm5, %v8483_v3, %v6450_v53  ;;  %v1775_v53 = vsel %vm14_vm0, %v8485_v41, %v8484_v7 }
 0x292   :  { %v2744_v25 = vsel %vm2735_vm6, %v2647_v55, %v2367_v22  ;;  %v597_v55 = vsel %vm481_vm1, %v595_v52, %v365_v34  ;;  %v763_v22 = vsel %vm481_vm1, %v366_v30, %v598_v57  ;;  %v8487_v34 = vld [vmem:[#allocation144_spill] sm:$0xff]  ;;  %v6838_v2 = vsel %vm1851_vm3, %v1775_v53, %v8488_v47 }
 0x293   :  { %2494 = vrot.lane.b32.xlu1 %v6770_v10, %s4152_s1  ;;  %3939 = vmatprep.mubr.msk.f32.mxu0 %vm2844_vm7, %v2744_v25  ;;  %v2463_v43 = vpop.permute.xlu0 %2462  ;;  %v8486_v25 = vld [vmem:[#allocation166_spill] sm:$0xff]  ;;  %v2650_v52 = vsel %vm2638_vm5, %v8487_v34, %v6452_v9  ;;  %v8491_v9 = vld [vmem:[#allocation36_spill] sm:$0xff] }
 0x294   :  { %v2792_v18 = vsel %vm2735_vm6, %v2695_v13, %v2463_v43  ;;  %v1829_v27 = vsel %vm14_vm0, %v597_v55, %v8486_v25 }
 0x295   :  { %v2369_v29 = vpop.permute.xlu1 %2368  ;;  %2400 = vrot.lane.b32.xlu0 %v6790_v58, %s4152_s1  ;;  %4011 = vmatprep.mubr.msk.f32.mxu1 %vm2844_vm7, %v2792_v18  ;;  %v1830_v18 = vsel %vm14_vm0, %v763_v22, %v8492_v28 }
 0x296   :  { %v2745_v16 = vsel %vm2735_vm6, %v2648_v51, %v2369_v29  ;;  %v8489_v51 = vld [vmem:[#allocation71_spill] sm:$0xff]  ;;  %v6865_v54 = vsel %vm1851_vm3, %v1830_v18, %v6234_v45 }
 0x297   :  { %2496 = vrot.lane.b32.xlu1 %v6794_v59, %s4152_s1  ;;  %3940 = vmatmul.mubr.msk.f32.gmra.mxu0 %vm2844_vm7, %v2745_v16  ;;  %v2465_v0 = vpop.permute.xlu0 %2464  ;;  %v6842_v17 = vsel %vm1851_vm3, %v1829_v27, %v8489_v51  ;;  %v8497_v27 = vld [vmem:[#allocation168_spill] sm:$0xff] }
 0x298   :  { %v2793_v24 = vsel %vm2735_vm6, %v2696_v19, %v2465_v0 }
 0x299   :  { %v2173_v39 = vpop.permute.xlu1 %2172  ;;  %2108 = vrot.lane.b32.xlu0 %v6721_v11, %s4151_s27  ;;  %4012 = vmatmul.mubr.msk.f32.gmra.mxu1 %vm2844_vm7, %v2793_v24 }
 0x29a   :  { %v2697_v15 = vsel %vm2638_vm5, %v6212_v31, %v2173_v39  ;;  %v8490_v31 = vld [vmem:[#allocation122_spill] sm:$0xff]  ;;  %v8493_v39 = vld [vmem:[#allocation88_spill] sm:$0xff] }
 0x29b   :  { %2204 = vrot.lane.b32.xlu1 %v6725_v48, %s4151_s27  ;;  %v2175_v49 = vpop.permute.xlu0 %2174  ;;  %v1776_v29 = vsel %vm14_vm0, %v8491_v9, %v8490_v31  ;;  %v8501_v31 = vld [vmem:[#allocation169_spill] sm:$0xff] }
 0x29c   :  { %v2698_v16 = vsel %vm2638_vm5, %v6226_v62, %v2175_v49  ;;  %v6861_v24 = vsel %vm1851_vm3, %v1776_v29, %v8493_v39  ;;  %v8494_v62 = vld [vmem:[#allocation66_spill] sm:$0xff] }
 0x29d   :  { %v2371_v12 = vpop.permute.xlu1 %2370  ;;  %2110 = vrot.lane.b32.xlu0 %v6766_v23, %s4151_s27  ;;  %v2651_v3 = vsel %vm2638_vm5, %v8494_v62, %v6472_v6  ;;  %v8506_v62 = vld [vmem:[#allocation67_spill] sm:$0xff] }
 0x29e   :  { %v2746_v1 = vsel %vm2735_vm6, %v2649_v46, %v2371_v12  ;;  %v4121_v12 = vld [vmem:[#allocation2 + $0x2c0] sm:$0xff] }
 0x29f   :  { %2206 = vrot.lane.b32.xlu1 %v6770_v10, %s4151_s27  ;;  %3942 = vmatprep.mubr.msk.f32.mxu0 %vm2844_vm7, %v2746_v1  ;;  %v2467_v37 = vpop.permute.xlu0 %2466  ;;  %v599_v55 = vrot.slane %v4121_v12, 7  ;;  %v2652_v1 = vsel %vm2638_vm5, %v6016_v21, %v6474_v5  ;;  %v8495_v21 = vld [vmem:[#allocation125_spill] sm:$0xff] }
 0x2a0   :  { %v2794_v13 = vsel %vm2735_vm6, %v2697_v15, %v2467_v37 }
 0x2a1   :  { %v2373_v33 = vpop.permute.xlu1 %2372  ;;  %2402 = vrot.lane.b32.xlu0 %v6838_v2, %s4152_s1  ;;  %4014 = vmatprep.mubr.msk.f32.mxu1 %vm2844_vm7, %v2794_v13  ;;  %v600_v41 = vsel %vm481_vm1, %v598_v57, %v599_v55  ;;  %v601_v37 = vsel %vm481_vm1, %v599_v55, %v366_v30  ;;  %v8500_v30 = vld [vmem:[#allocation38_spill] sm:$0xff] }
 0x2a2   :  { %v2747_v43 = vsel %vm2735_vm6, %v2650_v52, %v2373_v33  ;;  %v1831_v57 = vsel %vm14_vm0, %v600_v41, %v8497_v27  ;;  %v8498_v33 = vld [vmem:[#allocation84_spill] sm:$0xff]  ;;  %v1832_v9 = vsel %vm14_vm0, %v601_v37, %v8501_v31  ;;  %v8512_v31 = vld [vmem:[#allocation89_spill] sm:$0xff] }
 0x2a3   :  { %2498 = vrot.lane.b32.xlu1 %v6842_v17, %s4152_s1  ;;  %3943 = vmatmul.mubr.msk.f32.gmra.mxu0 %vm2844_vm7, %v2747_v43  ;;  %v2469_v19 = vpop.permute.xlu0 %2468  ;;  %v6910_v51 = vsel %vm1851_vm3, %v1831_v57, %v6243_v14  ;;  %v8502_v14 = vld [vmem:[#allocation7_spill] sm:$0xff] }
 0x2a4   :  { %v2795_v44 = vsel %vm2735_vm6, %v2698_v16, %v2469_v19  ;;  %v2653_v29 = vsel %vm2638_vm5, %v8502_v14, %v6488_v63  ;;  %v8503_v16 = vld [vmem:[#allocation85_spill] sm:$0xff]  ;;  %v8505_v63 = vld [vmem:[#allocation103_spill] sm:$0xff]  ;;  %v8513_v14 = vld [vmem:[#allocation74_spill] sm:$0xff] }
 0x2a5   :  { %v2177_v0 = vpop.permute.xlu1 %2176  ;;  %2404 = vrot.lane.b32.xlu0 %v6861_v24, %s4152_s1  ;;  %4015 = vmatmul.mubr.msk.f32.gmra.mxu1 %vm2844_vm7, %v2795_v44 }
 0x2a6   :  { %v2699_v6 = vsel %vm2638_vm5, %v6250_v26, %v2177_v0  ;;  %v8496_v26 = vld [vmem:[#allocation37_spill] sm:$0xff]  ;;  %v8504_v0 = vld [vmem:[#allocation10_spill] sm:$0xff] }
 0x2a7   :  { %2500 = vrot.lane.b32.xlu1 %v6865_v54, %s4152_s1  ;;  %v2179_v46 = vpop.permute.xlu0 %2178  ;;  %v1777_v5 = vsel %vm14_vm0, %v8496_v26, %v8495_v21  ;;  %v6932_v39 = vsel %vm1851_vm3, %v1832_v9, %v8504_v0  ;;  %v8516_v0 = vld [vmem:[#allocation171_spill] sm:$0xff] }
 0x2a8   :  { %v2700_v34 = vsel %vm2638_vm5, %v6264_v40, %v2179_v46  ;;  %v6906_v47 = vsel %vm1851_vm3, %v1777_v5, %v8498_v33  ;;  %v8499_v40 = vld [vmem:[#allocation126_spill] sm:$0xff]  ;;  %v8507_v46 = vld [vmem:[#allocation79_spill] sm:$0xff] }
 0x2a9   :  { %v2375_v49 = vpop.permute.xlu1 %2374  ;;  %2112 = vrot.lane.b32.xlu0 %v6790_v58, %s4151_s27  ;;  %v1778_v43 = vsel %vm14_vm0, %v8500_v30, %v8499_v40  ;;  %v4124_v5 = vld [vmem:[#allocation2 + $0x2d8] sm:$0xff] }
 0x2aa   :  { %v2748_v45 = vsel %vm2735_vm6, %v2651_v3, %v2375_v49  ;;  %v6928_v19 = vsel %vm1851_vm3, %v1778_v43, %v8503_v16  ;;  %v2654_v3 = vsel %vm2638_vm5, %v8506_v62, %v8505_v63  ;;  %v603_v27 = vrot.slane %v4124_v5, 7  ;;  %v8511_v33 = vld [vmem:[#allocation170_spill] sm:$0xff]  ;;  %v8518_v62 = vld [vmem:[#allocation8_spill] sm:$0xff] }
 0x2ab   :  { %2208 = vrot.lane.b32.xlu1 %v6794_v59, %s4151_s27  ;;  %3945 = vmatprep.mubr.msk.f32.mxu0 %vm2844_vm7, %v2748_v45  ;;  %v2471_v22 = vpop.permute.xlu0 %2470  ;;  %v4122_v45 = vld [vmem:[#allocation2 + $0x2d0] sm:$0xff]  ;;  %v8517_v63 = vld [vmem:[#allocation26_spill] sm:$0xff] }
 0x2ac   :  { %v2796_v53 = vsel %vm2735_vm6, %v2699_v6, %v2471_v22  ;;  %v4123_v6 = vld [vmem:[#allocation2 + $0x2e0] sm:$0xff] }
 0x2ad   :  { %v2377_v7 = vpop.permute.xlu1 %2376  ;;  %2114 = vrot.lane.b32.xlu0 %v6838_v2, %s4151_s27  ;;  %4017 = vmatprep.mubr.msk.f32.mxu1 %vm2844_vm7, %v2796_v53  ;;  %v367_v22 = vrot.slane %v4123_v6, 7  ;;  %v8508_v53 = vld [vmem:[#allocation15_spill] sm:$0xff] }
 0x2ae   :  { %v2749_v25 = vsel %vm2735_vm6, %v2652_v1, %v2377_v7  ;;  %v602_v1 = vrot.slane %v4122_v45, 7  ;;  %v8520_v45 = vld [vmem:[#allocation92_spill] sm:$0xff]  ;;  %v8521_v6 = vld [vmem:[#allocation11_spill] sm:$0xff] }
 0x2af   :  { %2210 = vrot.lane.b32.xlu1 %v6842_v17, %s4151_s27  ;;  %3946 = vmatmul.mubr.msk.f32.gmra.mxu0 %vm2844_vm7, %v2749_v25  ;;  %v2473_v52 = vpop.permute.xlu0 %2472 }
 0x2b0   :  { %v2797_v13 = vsel %vm2735_vm6, %v2700_v34, %v2473_v52  ;;  %v764_v57 = vsel %vm481_vm1, %v367_v22, %v602_v1  ;;  %v8509_v52 = vld [vmem:[#allocation129_spill] sm:$0xff]  ;;  %v604_v43 = vsel %vm481_vm1, %v602_v1, %v603_v27 }
 0x2b1   :  { %v2181_v15 = vpop.permute.xlu1 %2180  ;;  %2406 = vrot.lane.b32.xlu0 %v6906_v47, %s4152_s1  ;;  %4018 = vmatmul.mubr.msk.f32.gmra.mxu1 %vm2844_vm7, %v2797_v13  ;;  %v1833_v13 = vsel %vm14_vm0, %v764_v57, %v8511_v33 }
 0x2b2   :  { %v2701_v49 = vsel %vm2638_vm5, %v8507_v46, %v2181_v15  ;;  %v8510_v15 = vld [vmem:[#allocation39_spill] sm:$0xff] }
 0x2b3   :  { %2502 = vrot.lane.b32.xlu1 %v6910_v51, %s4152_s1  ;;  %v2183_v28 = vpop.permute.xlu0 %2182  ;;  %v1779_v37 = vsel %vm14_vm0, %v8510_v15, %v8509_v52  ;;  %v8519_v46 = vld [vmem:[#allocation87_spill] sm:$0xff] }
 0x2b4   :  { %v2702_v25 = vsel %vm2638_vm5, %v8508_v53, %v2183_v28  ;;  %v6970_v9 = vsel %vm1851_vm3, %v1779_v37, %v8512_v31  ;;  %v8514_v28 = vld [vmem:[#allocation130_spill] sm:$0xff]  ;;  %v605_v31 = vsel %vm481_vm1, %v603_v27, %v367_v22  ;;  %v8528_v27 = vld [vmem:[#allocation75_spill] sm:$0xff] }
 0x2b5   :  { %v2379_v18 = vpop.permute.xlu1 %2378  ;;  %2408 = vrot.lane.b32.xlu0 %v6928_v19, %s4152_s1 }
 0x2b6   :  { %v2750_v44 = vsel %vm2735_vm6, %v2653_v29, %v2379_v18  ;;  %v6974_v29 = vsel %vm1851_vm3, %v1833_v13, %v8513_v14  ;;  %v8515_v18 = vld [vmem:[#allocation40_spill] sm:$0xff]  ;;  %v8524_v14 = vld [vmem:[#allocation133_spill] sm:$0xff] }
 0x2b7   :  { %2504 = vrot.lane.b32.xlu1 %v6932_v39, %s4152_s1  ;;  %3948 = vmatprep.mubr.msk.f32.mxu0 %vm2844_vm7, %v2750_v44  ;;  %v2475_v12 = vpop.permute.xlu0 %2474  ;;  %v1780_v16 = vsel %vm14_vm0, %v8515_v18, %v8514_v28  ;;  %v1834_v44 = vsel %vm14_vm0, %v604_v43, %v8516_v0  ;;  %v4125_v13 = vld [vmem:[#allocation2 + $0x2e8] sm:$0xff]  ;;  %v8525_v28 = vld [vmem:[#allocation41_spill] sm:$0xff] }
 0x2b8   :  { %v2798_v7 = vsel %vm2735_vm6, %v2701_v49, %v2475_v12  ;;  %v6992_v1 = vsel %vm1851_vm3, %v1780_v16, %v8520_v45  ;;  %v1781_v18 = vsel %vm14_vm0, %v8525_v28, %v8524_v14  ;;  %v8526_v16 = vld [vmem:[#allocation172_spill] sm:$0xff]  ;;  %v8531_v45 = vld [vmem:[#allocation173_spill] sm:$0xff] }
 0x2b9   :  { %v2381_v55 = vpop.permute.xlu1 %2380  ;;  %2116 = vrot.lane.b32.xlu0 %v6861_v24, %s4151_s27  ;;  %4020 = vmatprep.mubr.msk.f32.mxu1 %vm2844_vm7, %v2798_v7  ;;  %v6996_v7 = vsel %vm1851_vm3, %v1834_v44, %v8521_v6  ;;  %v1835_v0 = vsel %vm14_vm0, %v605_v31, %v8526_v16  ;;  %v8537_v31 = vld [vmem:[#allocation22_spill] sm:$0xff]  ;;  %v4127_v16 = vld [vmem:[#allocation2 + $0x2f0] sm:$0xff] }
 0x2ba   :  { %v2751_v41 = vsel %vm2735_vm6, %v2654_v3, %v2381_v55  ;;  %v2655_v3 = vsel %vm2638_vm5, %v8518_v62, %v8517_v63 }
 0x2bb   :  { %2212 = vrot.lane.b32.xlu1 %v6865_v54, %s4151_s27  ;;  %3949 = vmatmul.mubr.msk.f32.gmra.mxu0 %vm2844_vm7, %v2751_v41  ;;  %v2477_v21 = vpop.permute.xlu0 %2476 }
 0x2bc   :  { %v2799_v34 = vsel %vm2735_vm6, %v2702_v25, %v2477_v21  ;;  %v8522_v25 = vld [vmem:[#allocation58_spill] sm:$0xff] }
 0x2bd   :  { %v2185_v26 = vpop.permute.xlu1 %2184  ;;  %2118 = vrot.lane.b32.xlu0 %v6906_v47, %s4151_s27  ;;  %4021 = vmatmul.mubr.msk.f32.gmra.mxu1 %vm2844_vm7, %v2799_v34 }
 0x2be   :  { %v2703_v49 = vsel %vm2638_vm5, %v8519_v46, %v2185_v26  ;;  %v8523_v26 = vld [vmem:[#allocation19_spill] sm:$0xff]  ;;  %v7035_v46 = vsel %vm1851_vm3, %v1835_v0, %v8528_v27  ;;  %v607_v0 = vrot.slane %v4127_v16, 7  ;;  %v8548_v16 = vld [vmem:[#allocation100_spill] sm:$0xff] }
 0x2bf   :  { %2214 = vrot.lane.b32.xlu1 %v6910_v51, %s4151_s27  ;;  %v2091_v40 = vpop.permute.xlu0 %2090 }
 0x2c0   :  { %v2656_v21 = vsel %vm2638_vm5, %v8522_v25, %v2091_v40  ;;  %v606_v40 = vrot.slane %v4125_v13, 7  ;;  %v8533_v25 = vld [vmem:[#allocation95_spill] sm:$0xff] }
 0x2c1   :  { %v2187_v30 = vpop.permute.xlu1 %2186  ;;  %2410 = vrot.lane.b32.xlu0 %v6970_v9, %s4152_s1 }
 0x2c2   :  { %v2704_v5 = vsel %vm2638_vm5, %v8523_v26, %v2187_v30  ;;  %v4126_v30 = vld [vmem:[#allocation2 + $0x2f8] sm:$0xff]  ;;  %v608_v27 = vsel %vm481_vm1, %v606_v40, %v607_v0 }
 0x2c3   :  { %2506 = vrot.lane.b32.xlu1 %v6974_v29, %s4152_s1  ;;  %v2383_v12 = vpop.permute.xlu0 %2382  ;;  %v368_v43 = vrot.slane %v4126_v30, 7 }
 0x2c4   :  { %v2752_v41 = vsel %vm2735_vm6, %v2655_v3, %v2383_v12  ;;  %v8527_v3 = vld [vmem:[#allocation93_spill] sm:$0xff]  ;;  %v8530_v12 = vld [vmem:[#allocation42_spill] sm:$0xff] }
 0x2c5   :  { %v2479_v55 = vpop.permute.xlu1 %2478  ;;  %2412 = vrot.lane.b32.xlu0 %v6992_v1, %s4152_s1  ;;  %3951 = vmatprep.mubr.msk.f32.mxu0 %vm2844_vm7, %v2752_v41  ;;  %v765_v62 = vsel %vm481_vm1, %v368_v43, %v606_v40  ;;  %v7031_v22 = vsel %vm1851_vm3, %v1781_v18, %v8527_v3  ;;  %v8532_v41 = vld [vmem:[#allocation3_spill] sm:$0xff] }
 0x2c6   :  { %v2800_v53 = vsel %vm2735_vm6, %v2703_v49, %v2479_v55  ;;  %v8529_v49 = vld [vmem:[#allocation134_spill] sm:$0xff]  ;;  %v1836_v6 = vsel %vm14_vm0, %v765_v62, %v8531_v45 }
 0x2c7   :  { %2508 = vrot.lane.b32.xlu1 %v6996_v7, %s4152_s1  ;;  %4023 = vmatprep.mubr.msk.f32.mxu1 %vm2844_vm7, %v2800_v53  ;;  %v2385_v57 = vpop.permute.xlu0 %2384  ;;  %v1782_v55 = vsel %vm14_vm0, %v8530_v12, %v8529_v49  ;;  %v8538_v49 = vld [vmem:[#allocation137_spill] sm:$0xff]  ;;  %v8539_v12 = vld [vmem:[#allocation43_spill] sm:$0xff]  ;;  %v8540_v45 = vld [vmem:[#allocation174_spill] sm:$0xff] }
 0x2c8   :  { %v2753_v52 = vsel %vm2735_vm6, %v2656_v21, %v2385_v57  ;;  %v8534_v57 = vld [vmem:[#allocation96_spill] sm:$0xff] }
 0x2c9   :  { %v2481_v34 = vpop.permute.xlu1 %2480  ;;  %2120 = vrot.lane.b32.xlu0 %v6928_v19, %s4151_s27  ;;  %3952 = vmatmul.mubr.msk.f32.gmra.mxu0 %vm2844_vm7, %v2753_v52  ;;  %v8535_v52 = vld [vmem:[#allocation12_spill] sm:$0xff] }
 0x2ca   :  { %v2801_v15 = vsel %vm2735_vm6, %v2704_v5, %v2481_v34  ;;  %v7052_v34 = vsel %vm1851_vm3, %v1782_v55, %v8534_v57  ;;  %v1783_v55 = vsel %vm14_vm0, %v8539_v12, %v8538_v49  ;;  %v8543_v57 = vld [vmem:[#allocation138_spill] sm:$0xff]  ;;  %v8550_v12 = vld [vmem:[#allocation23_spill] sm:$0xff] }
 0x2cb   :  { %2216 = vrot.lane.b32.xlu1 %v6932_v39, %s4151_s27  ;;  %4024 = vmatmul.mubr.msk.f32.gmra.mxu1 %vm2844_vm7, %v2801_v15  ;;  %v2093_v37 = vpop.permute.xlu0 %2092  ;;  %v7056_v15 = vsel %vm1851_vm3, %v1836_v6, %v8535_v52  ;;  %v1837_v6 = vsel %vm14_vm0, %v608_v27, %v8540_v45  ;;  %v8544_v52 = vld [vmem:[#allocation46_spill] sm:$0xff]  ;;  %v8551_v45 = vld [vmem:[#allocation24_spill] sm:$0xff] }
 0x2cc   :  { %v2657_v53 = vsel %vm2638_vm5, %v8532_v41, %v2093_v37  ;;  %v8536_v37 = vld [vmem:[#allocation70_spill] sm:$0xff] }
 0x2cd   :  { %v2189_v33 = vpop.permute.xlu1 %2188  ;;  %2122 = vrot.lane.b32.xlu0 %v6970_v9, %s4151_s27 }
 0x2ce   :  { %v2705_v21 = vsel %vm2638_vm5, %v8533_v25, %v2189_v33  ;;  %v609_v25 = vsel %vm481_vm1, %v607_v0, %v368_v43 }
 0x2cf   :  { %2218 = vrot.lane.b32.xlu1 %v6974_v29, %s4151_s27  ;;  %v2095_v44 = vpop.permute.xlu0 %2094 }
 0x2d0   :  { %v2658_v33 = vsel %vm2638_vm5, %v8536_v37, %v2095_v44  ;;  %v8546_v37 = vld [vmem:[#allocation98_spill] sm:$0xff] }
 0x2d1   :  { %v2191_v63 = vpop.permute.xlu1 %2190  ;;  %2414 = vrot.lane.b32.xlu0 %v7031_v22, %s4152_s1 }
 0x2d2   :  { %v2706_v14 = vsel %vm2638_vm5, %v8537_v31, %v2191_v63  ;;  %v8547_v31 = vld [vmem:[#allocation99_spill] sm:$0xff] }
 0x2d3   :  { %2510 = vrot.lane.b32.xlu1 %v7035_v46, %s4152_s1  ;;  %v2387_v26 = vpop.permute.xlu0 %2386 }
 0x2d4   :  { %v2754_v13 = vsel %vm2735_vm6, %v2657_v53, %v2387_v26  ;;  %v8542_v26 = vld [vmem:[#allocation78_spill] sm:$0xff] }
 0x2d5   :  { %v2483_v5 = vpop.permute.xlu1 %2482  ;;  %2416 = vrot.lane.b32.xlu0 %v7052_v34, %s4152_s1  ;;  %3954 = vmatprep.mubr.msk.f32.mxu0 %vm2844_vm7, %v2754_v13  ;;  %v1784_v13 = vsel %vm14_vm0, %v8544_v52, %v8543_v57  ;;  %v4130_v52 = vld [vmem:[#allocation2 + $0x310] sm:$0xff] }
 0x2d6   :  { %v2802_v30 = vsel %vm2735_vm6, %v2705_v21, %v2483_v5  ;;  %v8541_v21 = vld [vmem:[#allocation97_spill] sm:$0xff]  ;;  %v7095_v5 = vsel %vm1851_vm3, %v1837_v6, %v8542_v26  ;;  %v7112_v0 = vsel %vm1851_vm3, %v1784_v13, %v8548_v16  ;;  %v4129_v26 = vld [vmem:[#allocation2 + $0x300] sm:$0xff]  ;;  %v369_v13 = vrot.slane %v4130_v52, 7  ;;  %v8558_v52 = vld [vmem:[#allocation142_spill] sm:$0xff] }
 0x2d7   :  { %2512 = vrot.lane.b32.xlu1 %v7056_v15, %s4152_s1  ;;  %4026 = vmatprep.mubr.msk.f32.mxu1 %vm2844_vm7, %v2802_v30  ;;  %v2389_v28 = vpop.permute.xlu0 %2388  ;;  %v7091_v40 = vsel %vm1851_vm3, %v1783_v55, %v8541_v21  ;;  %v8545_v30 = vld [vmem:[#allocation175_spill] sm:$0xff]  ;;  %v610_v57 = vrot.slane %v4129_v26, 7  ;;  %v8554_v16 = vld [vmem:[#allocation141_spill] sm:$0xff] }
 0x2d8   :  { %v2755_v62 = vsel %vm2735_vm6, %v2658_v33, %v2389_v28  ;;  %v1838_v43 = vsel %vm14_vm0, %v609_v25, %v8545_v30 }
 0x2d9   :  { %v2485_v18 = vpop.permute.xlu1 %2484  ;;  %2124 = vrot.lane.b32.xlu0 %v6992_v1, %s4151_s27  ;;  %3955 = vmatmul.mubr.msk.f32.gmra.mxu0 %vm2844_vm7, %v2755_v62  ;;  %v8549_v62 = vld [vmem:[#allocation13_spill] sm:$0xff] }
 0x2da   :  { %v2803_v3 = vsel %vm2735_vm6, %v2706_v14, %v2485_v18 }
 0x2db   :  { %2220 = vrot.lane.b32.xlu1 %v6996_v7, %s4151_s27  ;;  %4027 = vmatmul.mubr.msk.f32.gmra.mxu1 %vm2844_vm7, %v2803_v3  ;;  %v2097_v44 = vpop.permute.xlu0 %2096  ;;  %v7116_v3 = vsel %vm1851_vm3, %v1838_v43, %v8549_v62 }
 0x2dc   :  { %v2659_v33 = vsel %vm2638_vm5, %v8546_v37, %v2097_v44  ;;  %v7126_v44 = vld [vmem:[#allocation2 + $0x160] sm:$0xff]  ;;  %v4131_v37 = vld [vmem:[#allocation2 + $0x308] sm:$0xff] }
 0x2dd   :  { %v2193_v63 = vpop.permute.xlu1 %2192  ;;  %2126 = vrot.lane.b32.xlu0 %v7031_v22, %s4151_s27 }
 0x2de   :  { %v2707_v14 = vsel %vm2638_vm5, %v8547_v31, %v2193_v63  ;;  %v351_v63 = vrot.slane %v7126_v44, 7  ;;  %v8552_v31 = vld [vmem:[#allocation44_spill] sm:$0xff] }
 0x2df   :  { %2222 = vrot.lane.b32.xlu1 %v7035_v46, %s4151_s27  ;;  %v2099_v41 = vpop.permute.xlu0 %2098 }
 0x2e0   :  { %v2660_v55 = vsel %vm2638_vm5, %v8550_v12, %v2099_v41 }
 0x2e1   :  { %v2195_v53 = vpop.permute.xlu1 %2194  ;;  %2418 = vrot.lane.b32.xlu0 %v7091_v40, %s4152_s1 }
 0x2e2   :  { %v2708_v6 = vsel %vm2638_vm5, %v8551_v45, %v2195_v53 }
 0x2e3   :  { %2514 = vrot.lane.b32.xlu1 %v7095_v5, %s4152_s1  ;;  %v2391_v28 = vpop.permute.xlu0 %2390 }
 0x2e4   :  { %v2756_v27 = vsel %vm2735_vm6, %v2659_v33, %v2391_v28  ;;  %v611_v33 = vrot.slane %v4131_v37, 7  ;;  %v8560_v37 = vld [vmem:[#allocation177_spill] sm:$0xff] }
 0x2e5   :  { %v2487_v18 = vpop.permute.xlu1 %2486  ;;  %2420 = vrot.lane.b32.xlu0 %v7112_v0, %s4152_s1  ;;  %3957 = vmatprep.mubr.msk.f32.mxu0 %vm2844_vm7, %v2756_v27  ;;  %v8555_v27 = vld [vmem:[#allocation176_spill] sm:$0xff] }
 0x2e6   :  { %v2804_v49 = vsel %vm2735_vm6, %v2707_v14, %v2487_v18  ;;  %v8553_v14 = vrot.slane %v8552_v31, 7  ;;  %v766_v18 = vsel %vm481_vm1, %v369_v13, %v610_v57  ;;  %v612_v45 = vsel %vm481_vm1, %v610_v57, %v611_v33  ;;  %v8561_v31 = vld [vmem:[#allocation102_spill] sm:$0xff] }
 0x2e7   :  { %2516 = vrot.lane.b32.xlu1 %v7116_v3, %s4152_s1  ;;  %4029 = vmatprep.mubr.msk.f32.mxu1 %vm2844_vm7, %v2804_v49  ;;  %v2393_v25 = vpop.permute.xlu0 %2392  ;;  %v1839_v49 = vsel %vm14_vm0, %v766_v18, %v8555_v27  ;;  %v1840_v57 = vsel %vm14_vm0, %v612_v45, %v8560_v37  ;;  %v8563_v27 = vld [vmem:[#allocation104_spill] sm:$0xff] }
 0x2e8   :  { %v2757_v30 = vsel %vm2735_vm6, %v2660_v55, %v2393_v25  ;;  %v748_v28 = vsel %vm481_vm1, %v351_v63, %v8553_v14 }
 0x2e9   :  { %v2489_v21 = vpop.permute.xlu1 %2488  ;;  %2128 = vrot.lane.b32.xlu0 %v7052_v34, %s4151_s27  ;;  %3958 = vmatmul.mubr.msk.f32.gmra.mxu0 %vm2844_vm7, %v2757_v30  ;;  %v1785_v62 = vsel %vm14_vm0, %v748_v28, %v8554_v16  ;;  %v8559_v30 = vld [vmem:[#allocation47_spill] sm:$0xff]  ;;  %v8562_v28 = vld [vmem:[#allocation25_spill] sm:$0xff] }
 0x2ea   :  { %v2805_v43 = vsel %vm2735_vm6, %v2708_v6, %v2489_v21  ;;  %v8556_v6 = vld [vmem:[#allocation101_spill] sm:$0xff]  ;;  %v8557_v21 = vld [vmem:[#allocation14_spill] sm:$0xff] }
 0x2eb   :  { %2224 = vrot.lane.b32.xlu1 %v7056_v15, %s4151_s27  ;;  %4030 = vmatmul.mubr.msk.f32.gmra.mxu1 %vm2844_vm7, %v2805_v43  ;;  %v2101_v41 = vpop.permute.xlu0 %2100  ;;  %v7158_v25 = vsel %vm1851_vm3, %v1785_v62, %v8556_v6  ;;  %v7162_v26 = vsel %vm1851_vm3, %v1839_v49, %v8557_v21  ;;  %v1786_v43 = vsel %vm14_vm0, %v8559_v30, %v8558_v52  ;;  %v8564_v6 = vld [vmem:[#allocation82_spill] sm:$0xff] }
 0x2ec   :  { %v2661_v14 = vsel %vm2638_vm5, %v8561_v31, %v2101_v41  ;;  %v7179_v49 = vsel %vm1851_vm3, %v1786_v43, %v8563_v27  ;;  %v7183_v21 = vsel %vm1851_vm3, %v1840_v57, %v8564_v6  ;;  %v613_v6 = vsel %vm481_vm1, %v611_v33, %v369_v13  ;;  %v8571_v33 = vld [vmem:[#allocation105_spill] sm:$0xff] }
 0x2ed   :  { %v2197_v53 = vpop.permute.xlu1 %2196  ;;  %2130 = vrot.lane.b32.xlu0 %v7091_v40, %s4151_s27 }
 0x2ee   :  { %v2709_v18 = vsel %vm2638_vm5, %v8562_v28, %v2197_v53  ;;  %v4134_v28 = vld [vmem:[#allocation2 + $0x328] sm:$0xff] }
 0x2ef   :  { %2226 = vrot.lane.b32.xlu1 %v7095_v5, %s4151_s27  ;;  %v2103_v12 = vpop.permute.xlu0 %2102 }
 0x2f0   :  { %v2662_v41 = vsel %vm2638_vm5, %v6478_v36, %v2103_v12  ;;  %v4132_v36 = vld [vmem:[#allocation2 + $0x178] sm:$0xff] }
 0x2f1   :  { %v2199_v55 = vpop.permute.xlu1 %2198  ;;  %2422 = vrot.lane.b32.xlu0 %v7158_v25, %s4152_s1  ;;  %v352_v12 = vrot.slane %v4132_v36, 7  ;;  %v8572_v36 = vld [vmem:[#allocation83_spill] sm:$0xff] }
 0x2f2   :  { %v2710_v53 = vsel %vm2638_vm5, %v6482_v60, %v2199_v55  ;;  %v4133_v55 = vld [vmem:[#allocation2 + $0x318] sm:$0xff] }
 0x2f3   :  { %2518 = vrot.lane.b32.xlu1 %v7162_v26, %s4152_s1  ;;  %v2395_v16 = vpop.permute.xlu0 %2394 }
 0x2f4   :  { %v2758_v52 = vsel %vm2735_vm6, %v2661_v14, %v2395_v16  ;;  %v614_v14 = vrot.slane %v4133_v55, 7  ;;  %v8565_v16 = vld [vmem:[#allocation45_spill] sm:$0xff] }
 0x2f5   :  { %v2491_v62 = vpop.permute.xlu1 %2490  ;;  %2424 = vrot.lane.b32.xlu0 %v7179_v49, %s4152_s1  ;;  %3960 = vmatprep.mubr.msk.f32.mxu0 %vm2844_vm7, %v2758_v52  ;;  %v8567_v52 = vld [vmem:[#allocation145_spill] sm:$0xff] }
 0x2f6   :  { %v2806_v45 = vsel %vm2735_vm6, %v2709_v18, %v2491_v62  ;;  %v370_v18 = vrot.slane %v4134_v28, 7  ;;  %v8566_v62 = vrot.slane %v8565_v16, 7  ;;  %v8573_v28 = vld [vmem:[#allocation146_spill] sm:$0xff] }
 0x2f7   :  { %2520 = vrot.lane.b32.xlu1 %v7183_v21, %s4152_s1  ;;  %4032 = vmatprep.mubr.msk.f32.mxu1 %vm2844_vm7, %v2806_v45  ;;  %v2397_v30 = vpop.permute.xlu0 %2396 }
 0x2f8   :  { %v2759_v37 = vsel %vm2735_vm6, %v2662_v41, %v2397_v30  ;;  %v541_v27 = vsel %vm481_vm1, %v8566_v62, %v351_v63  ;;  %v8568_v41 = vld [vmem:[#allocation178_spill] sm:$0xff]  ;;  %v767_v13 = vsel %vm481_vm1, %v370_v18, %v614_v14  ;;  %v8574_v62 = vld [vmem:[#allocation179_spill] sm:$0xff] }
 0x2f9   :  { %v2493_v43 = vpop.permute.xlu1 %2492  ;;  %2132 = vrot.lane.b32.xlu0 %v7112_v0, %s4151_s27  ;;  %3961 = vmatmul.mubr.msk.f32.gmra.mxu0 %vm2844_vm7, %v2759_v37  ;;  %v1787_v45 = vsel %vm14_vm0, %v541_v27, %v8567_v52  ;;  %v1842_v27 = vsel %vm14_vm0, %v767_v13, %v8574_v62 }
 0x2fa   :  { %v2807_v57 = vsel %vm2735_vm6, %v2710_v53, %v2493_v43  ;;  %v1841_v53 = vsel %vm14_vm0, %v613_v6, %v8568_v41  ;;  %v8569_v43 = vld [vmem:[#allocation49_spill] sm:$0xff] }
 0x2fb   :  { %2228 = vrot.lane.b32.xlu1 %v7116_v3, %s4151_s27  ;;  %4033 = vmatmul.mubr.msk.f32.gmra.mxu1 %vm2844_vm7, %v2807_v57  ;;  %v2105_v31 = vpop.permute.xlu0 %2104  ;;  %v8570_v37 = vrot.slane %v8569_v43, 7  ;;  %v7225_v57 = vsel %vm1851_vm3, %v1787_v45, %v8571_v33  ;;  %v7229_v55 = vsel %vm1851_vm3, %v1841_v53, %v8572_v36  ;;  %v8575_v53 = vld [vmem:[#allocation108_spill] sm:$0xff]  ;;  %v4135_v36 = vld [vmem:[#allocation2 + $0x320] sm:$0xff] }
 0x2fc   :  { %v2663_v6 = vsel %vm2638_vm5, %v6532_v50, %v2105_v31 }
 0x2fd   :  { %v2201_v60 = vpop.permute.xlu1 %2200  ;;  %2134 = vrot.lane.b32.xlu0 %v7158_v25, %s4151_s27  ;;  %v749_v63 = vsel %vm481_vm1, %v352_v12, %v8570_v37  ;;  %v8576_v37 = vld [vmem:[#allocation16_spill] sm:$0xff] }
 0x2fe   :  { %v1788_v16 = vsel %vm14_vm0, %v749_v63, %v8573_v28  ;;  %v2711_v52 = vsel %vm2638_vm5, %v6536_v42, %v2201_v60  ;;  %v7249_v33 = vsel %vm1851_vm3, %v1842_v27, %v8576_v37  ;;  %v615_v28 = vrot.slane %v4135_v36, 7  ;;  %v8578_v27 = vld [vmem:[#allocation50_spill] sm:$0xff]  ;;  %v8580_v37 = vld [vmem:[#allocation48_spill] sm:$0xff] }
 0x2ff   :  { %2230 = vrot.lane.b32.xlu1 %v7162_v26, %s4151_s27  ;;  %v2107_v30 = vpop.permute.xlu0 %2106  ;;  %v7245_v43 = vsel %vm1851_vm3, %v1788_v16, %v8575_v53  ;;  %v8584_v36 = vld [vmem:[#allocation148_spill] sm:$0xff] }
 0x300   :  { %v2664_v50 = vsel %vm2638_vm5, %v6564_v61, %v2107_v30  ;;  %v616_v30 = vsel %vm481_vm1, %v614_v14, %v615_v28  ;;  %v617_v14 = vsel %vm481_vm1, %v615_v28, %v370_v18 }
 0x301   :  { %v2203_v44 = vpop.permute.xlu1 %2202  ;;  %2426 = vrot.lane.b32.xlu0 %v7225_v57, %s4152_s1 }
 0x302   :  { %v2712_v42 = vsel %vm2638_vm5, %v6568_v20, %v2203_v44  ;;  %v8577_v44 = vld [vmem:[#allocation147_spill] sm:$0xff] }
 0x303   :  { %2522 = vrot.lane.b32.xlu1 %v7229_v55, %s4152_s1  ;;  %v2399_v45 = vpop.permute.xlu0 %2398 }
 0x304   :  { %v2760_v63 = vsel %vm2735_vm6, %v2663_v6, %v2399_v45  ;;  %v1789_v6 = vsel %vm14_vm0, %v8578_v27, %v8577_v44  ;;  %v8586_v27 = vld [vmem:[#allocation112_spill] sm:$0xff] }
 0x305   :  { %v2495_v41 = vpop.permute.xlu1 %2494  ;;  %2428 = vrot.lane.b32.xlu0 %v7245_v43, %s4152_s1  ;;  %3963 = vmatprep.mubr.msk.f32.mxu0 %vm2844_vm7, %v2760_v63  ;;  %v8581_v63 = vrot.slane %v8580_v37, 7 }
 0x306   :  { %v2808_v13 = vsel %vm2735_vm6, %v2711_v52, %v2495_v41  ;;  %v8579_v52 = vld [vmem:[#allocation51_spill] sm:$0xff] }
 0x307   :  { %2524 = vrot.lane.b32.xlu1 %v7249_v33, %s4152_s1  ;;  %4035 = vmatprep.mubr.msk.f32.mxu1 %vm2844_vm7, %v2808_v13  ;;  %v2401_v31 = vpop.permute.xlu0 %2400  ;;  %v1843_v45 = vsel %vm14_vm0, %v616_v30, %v8579_v52  ;;  %v545_v13 = vsel %vm481_vm1, %v8581_v63, %v352_v12  ;;  %v8585_v12 = vld [vmem:[#allocation180_spill] sm:$0xff]  ;;  %v8587_v52 = vld [vmem:[#allocation17_spill] sm:$0xff] }
 0x308   :  { %v2761_v16 = vsel %vm2735_vm6, %v2664_v50, %v2401_v31  ;;  %v8582_v50 = vld [vmem:[#allocation109_spill] sm:$0xff]  ;;  %v8583_v31 = vld [vmem:[#allocation86_spill] sm:$0xff]  ;;  %v1844_v18 = vsel %vm14_vm0, %v617_v14, %v8585_v12  ;;  %v7328_v12 = vld [vmem:[#allocation2 + $0x340] sm:$0xff] }
 0x309   :  { %v2497_v60 = vpop.permute.xlu1 %2496  ;;  %2136 = vrot.lane.b32.xlu0 %v7179_v49, %s4151_s27  ;;  %3964 = vmatmul.mubr.msk.f32.gmra.mxu0 %vm2844_vm7, %v2761_v16  ;;  %v1790_v16 = vsel %vm14_vm0, %v545_v13, %v8584_v36  ;;  %v4138_v36 = vld [vmem:[#allocation2 + $0x330] sm:$0xff] }
 0x30a   :  { %v2809_v62 = vsel %vm2735_vm6, %v2712_v42, %v2497_v60  ;;  %v7287_v42 = vsel %vm1851_vm3, %v1789_v6, %v8582_v50  ;;  %v7291_v60 = vsel %vm1851_vm3, %v1843_v45, %v8583_v31  ;;  %v7307_v6 = vsel %vm1851_vm3, %v1790_v16, %v8586_v27 }
 0x30b   :  { %2232 = vrot.lane.b32.xlu1 %v7183_v21, %s4151_s27  ;;  %4036 = vmatmul.mubr.msk.f32.gmra.mxu1 %vm2844_vm7, %v2809_v62  ;;  %v2109_v61 = vpop.permute.xlu0 %2108  ;;  %v7311_v45 = vsel %vm1851_vm3, %v1844_v18, %v8587_v52  ;;  %v618_v16 = vrot.slane %v4138_v36, 7  ;;  %v8050_v18 = vrot.slane %v7328_v12, 7 }
 0x30c   :  { %v2665_v28 = vsel %vm2638_vm5, %v6629_v56, %v2109_v61  ;;  %8588 = vst [vmem:[#allocation59_spill] sm:$0xff] %v7311_v45  ;;  %v4136_v56 = vld [vmem:[#allocation2 + $0x180] sm:$0xff]  ;;  %v7321_v61 = vld [vmem:[#allocation2 + $0x190] sm:$0xff] }
 0x30d   :  { %v2205_v20 = vpop.permute.xlu1 %2204  ;;  %2138 = vrot.lane.b32.xlu0 %v7225_v57, %s4151_s27  ;;  %v768_v52 = vsel %vm481_vm1, %v8050_v18, %v618_v16 }
 0x30e   :  { %v2713_v62 = vsel %vm2638_vm5, %v6633_v32, %v2205_v20  ;;  %v546_v32 = vrot.slane %v4136_v56, 7  ;;  %v8052_v20 = vrot.slane %v7321_v61, 7  ;;  %v8590_v56 = vld [vmem:[#allocation52_spill] sm:$0xff] }
 0x30f   :  { %2234 = vrot.lane.b32.xlu1 %v7229_v55, %s4151_s27  ;;  %v2111_v41 = vpop.permute.xlu0 %2110 }
 0x310   :  { %v2666_v13 = vsel %vm2638_vm5, %v6652_v38, %v2111_v41  ;;  %v7339_v41 = vld [vmem:[#allocation2 + $0x188] sm:$0xff]  ;;  %v750_v27 = vsel %vm481_vm1, %v8052_v20, %v546_v32 }
 0x311   :  { %v2207_v53 = vpop.permute.xlu1 %2206  ;;  %2430 = vrot.lane.b32.xlu0 %v7287_v42, %s4152_s1 }
 0x312   :  { %v2714_v14 = vsel %vm2638_vm5, %v6656_v4, %v2207_v53  ;;  %v8051_v53 = vrot.slane %v7339_v41, 7 }
 0x313   :  { %2526 = vrot.lane.b32.xlu1 %v7291_v60, %s4152_s1  ;;  %v2403_v30 = vpop.permute.xlu0 %2402 }
 0x314   :  { %v2762_v37 = vsel %vm2735_vm6, %v2665_v28, %v2403_v30  ;;  %v7342_v30 = vld [vmem:[#allocation2 + $0x338] sm:$0xff] }
 0x315   :  { %v2499_v44 = vpop.permute.xlu1 %2498  ;;  %2432 = vrot.lane.b32.xlu0 %v7307_v6, %s4152_s1  ;;  %3966 = vmatprep.mubr.msk.f32.mxu0 %vm2844_vm7, %v2762_v37  ;;  %v8589_v37 = vld [vmem:[#allocation149_spill] sm:$0xff] }
 0x316   :  { %v2810_v63 = vsel %vm2735_vm6, %v2713_v62, %v2499_v44  ;;  %v619_v44 = vrot.slane %v7342_v30, 7  ;;  %v8592_v30 = vld [vmem:[#allocation18_spill] sm:$0xff] }
 0x317   :  { %2528 = vrot.lane.b32.xlu1 %v7311_v45, %s4152_s1  ;;  %4038 = vmatprep.mubr.msk.f32.mxu1 %vm2844_vm7, %v2810_v63  ;;  %v2405_v50 = vpop.permute.xlu0 %2404  ;;  %v1791_v63 = vsel %vm14_vm0, %v750_v27, %v8589_v37  ;;  %v8593_v27 = vld [vmem:[#allocation150_spill] sm:$0xff]  ;;  %v8594_v37 = vld [vmem:[#allocation53_spill] sm:$0xff] }
 0x318   :  { %v2763_v28 = vsel %vm2735_vm6, %v2666_v13, %v2405_v50  ;;  %v1845_v13 = vsel %vm14_vm0, %v768_v52, %v8590_v56  ;;  %v620_v36 = vsel %vm481_vm1, %v618_v16, %v619_v44 }
 0x319   :  { %v2501_v31 = vpop.permute.xlu1 %2500  ;;  %2140 = vrot.lane.b32.xlu0 %v7245_v43, %s4151_s27  ;;  %3967 = vmatmul.mubr.msk.f32.gmra.mxu0 %vm2844_vm7, %v2763_v28  ;;  %v8591_v28 = vld [vmem:[#allocation115_spill] sm:$0xff]  ;;  %v1954_v18 = vsel %vm1851_vm3, %v1845_v13, %v8592_v30  ;;  %v1846_v56 = vsel %vm14_vm0, %v620_v36, %v8594_v37  ;;  %v8596_v30 = vld [vmem:[#allocation90_spill] sm:$0xff] }
 0x31a   :  { %v2811_v62 = vsel %vm2735_vm6, %v2714_v14, %v2501_v31  ;;  %v548_v31 = vsel %vm481_vm1, %v546_v32, %v8051_v53  ;;  %v8595_v53 = vld [vmem:[#allocation116_spill] sm:$0xff]  ;;  %v7383_v20 = vsel %vm1851_vm3, %v1846_v56, %v8596_v30 }
 0x31b   :  { %2236 = vrot.lane.b32.xlu1 %v7249_v33, %s4151_s27  ;;  %4039 = vmatmul.mubr.msk.f32.gmra.mxu1 %vm2844_vm7, %v2811_v62  ;;  %v2113_v38 = vpop.permute.xlu0 %2112  ;;  %v1900_v62 = vsel %vm1851_vm3, %v1791_v63, %v8591_v28  ;;  %v1792_v52 = vsel %vm14_vm0, %v548_v31, %v8593_v27 }
 0x31c   :  { %v2667_v32 = vsel %vm2638_vm5, %v6699_v35, %v2113_v38  ;;  %v7379_v13 = vsel %vm1851_vm3, %v1792_v52, %v8595_v53  ;;  %v7390_v35 = vld [vmem:[%s7962_s2] ss:$0 sm:$0xff] }
 0x31d   :  { %v2209_v4 = vpop.permute.xlu1 %2208  ;;  %2142 = vrot.lane.b32.xlu0 %v7287_v42, %s4151_s27 }
 0x31e   :  { %v2715_v16 = vsel %vm2638_vm5, %v6703_v8, %v2209_v4 }
 0x31f   :  { %2238 = vrot.lane.b32.xlu1 %v7291_v60, %s4151_s27  ;;  %v2115_v14 = vpop.permute.xlu0 %2114 }
 0x320   :  { %v2668_v38 = vsel %vm2638_vm5, %v6721_v11, %v2115_v14 }
 0x321   :  { %v2211_v50 = vpop.permute.xlu1 %2210  ;;  %2434 = vrot.lane.b32.xlu0 %v1900_v62, %s4152_s1 }
 0x322   :  { %v2716_v4 = vsel %vm2638_vm5, %v6725_v48, %v2211_v50  ;;  %v7416_v48 = vld [vmem:[#allocation2 + $0x198] sm:$0xff]  ;;  %v7419_v50 = vld [vmem:[#allocation2 + $0x1a8] sm:$0xff] }
 0x323   :  { %2530 = vrot.lane.b32.xlu1 %v1954_v18, %s4152_s1  ;;  %v2407_v63 = vpop.permute.xlu0 %2406  ;;  %v8055_v14 = vrot.slane %v7416_v48, 7 }
 0x324   :  { %v2764_v31 = vsel %vm2735_vm6, %v2667_v32, %v2407_v63  ;;  %v8054_v63 = vrot.slane %v7419_v50, 7 }
 0x325   :  { %v2503_v28 = vpop.permute.xlu1 %2502  ;;  %2436 = vrot.lane.b32.xlu0 %v7379_v13, %s4152_s1  ;;  %3969 = vmatprep.mubr.msk.f32.mxu0 %vm2844_vm7, %v2764_v31 }
 0x326   :  { %v2812_v36 = vsel %vm2735_vm6, %v2715_v16, %v2503_v28 }
 0x327   :  { %2532 = vrot.lane.b32.xlu1 %v7383_v20, %s4152_s1  ;;  %v3929_v8 = vpop.f32.mrf.mxu0  ;;  %4041 = vmatprep.mubr.msk.f32.mxu1 %vm2844_vm7, %v2812_v36  ;;  %v2409_v27 = vpop.permute.xlu0 %2408  ;;  %v7427_v36 = vld [vmem:[#allocation2 + $0x348] sm:$0xff] }
 0x328   :  { %v3209_v53 = vadd.f32 %v3929_v8, %v7390_v35  ;;  %v2765_v37 = vsel %vm2735_vm6, %v2668_v38, %v2409_v27  ;;  %v622_v8 = vrot.slane %v7427_v36, 7  ;;  %v7430_v38 = vld [vmem:[#allocation2 + $0x358] sm:$0xff]  ;;  %v8598_v27 = vrot.slane %v7339_v41, 7  ;;  %v8602_v36 = vld [vmem:[#allocation119_spill] sm:$0xff] }
 0x329   :  { %v2505_v52 = vpop.permute.xlu1 %2504  ;;  %v3203_v56 = vpop.f32.mrf.mxu0  ;;  %2144 = vrot.lane.b32.xlu0 %v7307_v6, %s4151_s27  ;;  %3970 = vmatmul.mubr.msk.f32.gmra.mxu0 %vm2844_vm7, %v2765_v37  ;;  %v8599_v37 = vrot.slane %v7328_v12, 7  ;;  %v751_v12 = vsel %vm481_vm1, %v8054_v63, %v8055_v14  ;;  %v8607_v14 = vld [vmem:[#allocation20_spill] sm:$0xff] }
 0x32a   :  { %v2813_v32 = vsel %vm2735_vm6, %v2716_v4, %v2505_v52  ;;  %3651 = vst.msk [vmem:[%s7963_s3 + $0x8] sm:$0xff] %vm14_vm0, %v3209_v53  ;;  %v3204_v16 = vadd.f32 %v7390_v35, %v3203_v56  ;;  %v4001_v11 = vpop.f32.mrf.mxu1  ;;  %v8053_v4 = vrot.slane %v7430_v38, 7  ;;  %v8597_v53 = vrot.slane %v7321_v61, 7  ;;  %v8600_v61 = vld [vmem:[#allocation151_spill] sm:$0xff] }
 0x32b   :  { %2240 = vrot.lane.b32.xlu1 %v7311_v45, %s4151_s27  ;;  %4042 = vmatmul.mubr.msk.f32.gmra.mxu1 %vm2844_vm7, %v2813_v32  ;;  %v3433_v28 = vadd.f32 %v4001_v11, %v7390_v35  ;;  %v2117_v30 = vpop.permute.xlu0 %2116  ;;  %v621_v56 = vsel %vm481_vm1, %v619_v44, %v8599_v37  ;;  %v8601_v44 = vld [vmem:[#allocation54_spill] sm:$0xff]  ;;  %v8604_v37 = vld [vmem:[#allocation152_spill] sm:$0xff] }
 0x32c   :  { %3650 = vst.msk [vmem:[%s7963_s3] sm:$0xff] %vm14_vm0, %v3204_v16  ;;  %v549_v52 = vsel %vm481_vm1, %v8598_v27, %v8597_v53  ;;  %v3427_v32 = vpop.f32.mrf.mxu1  ;;  %v1847_v11 = vsel %vm14_vm0, %v621_v56, %v8601_v44  ;;  %v8603_v27 = vld [vmem:[#allocation91_spill] sm:$0xff]  ;;  %v1794_v56 = vsel %vm14_vm0, %v751_v12, %v8604_v37  ;;  %v2669_v44 = vsel %vm2638_vm5, %v6766_v23, %v2117_v30 }
 0x32d   :  { %v2213_v31 = vpop.permute.xlu1 %2212  ;;  %3683 = vst.msk [vmem:[%s7963_s3 + $0x108] sm:$0xff] %vm14_vm0, %v3433_v28  ;;  %v3428_v16 = vadd.f32 %v7390_v35, %v3427_v32  ;;  %2146 = vrot.lane.b32.xlu0 %v1900_v62, %s4151_s27  ;;  %v1793_v41 = vsel %vm14_vm0, %v549_v52, %v8600_v61  ;;  %v1956_v52 = vsel %vm1851_vm3, %v1847_v11, %v8603_v27 }
 0x32e   :  { %v1902_v53 = vsel %vm1851_vm3, %v1793_v41, %v8602_v36  ;;  %v2717_v41 = vsel %vm2638_vm5, %v6770_v10, %v2213_v31 }
 0x32f   :  { %2242 = vrot.lane.b32.xlu1 %v1954_v18, %s4151_s27  ;;  %3682 = vst.msk [vmem:[%s7963_s3 + $0x100] sm:$0xff] %vm14_vm0, %v3428_v16  ;;  %v2119_v62 = vpop.permute.xlu0 %2118  ;;  %v769_v18 = vsel %vm481_vm1, %v8053_v4, %v622_v8  ;;  %v8605_v16 = vld [vmem:[#allocation55_spill] sm:$0xff]  ;;  %v8606_v4 = vld [vmem:[#allocation120_spill] sm:$0xff] }
 0x330   :  { %v1848_v61 = vsel %vm14_vm0, %v769_v18, %v8605_v16  ;;  %v1903_v63 = vsel %vm1851_vm3, %v1794_v56, %v8606_v4  ;;  %v2670_v10 = vsel %vm2638_vm5, %v6790_v58, %v2119_v62  ;;  %v4146_v4 = vld [vmem:[#allocation2 + $0x1a0] sm:$0xff]  ;;  %v8608_v62 = vrot.slane %v7416_v48, 7 }
 0x331   :  { %v2215_v28 = vpop.permute.xlu1 %2214  ;;  %2438 = vrot.lane.b32.xlu0 %v1902_v53, %s4152_s1  ;;  %v1957_v12 = vsel %vm1851_vm3, %v1848_v61, %v8607_v14  ;;  %v551_v56 = vrot.slane %v4146_v4, 7 }
 0x333   :  { %2534 = vrot.lane.b32.xlu1 %v1956_v52, %s4152_s1  ;;  %v3932_v32 = vpop.f32.mrf.mxu0  ;;  %v2411_v11 = vpop.permute.xlu0 %2410 }
 0x334   :  { %v3218_v36 = vadd.f32 %v3932_v32, %v7390_v35  ;;  %v2766_v37 = vsel %vm2735_vm6, %v2669_v44, %v2411_v11  ;;  %v8610_v11 = vld [vmem:[#allocation56_spill] sm:$0xff] }
 0x335   :  { %v2507_v27 = vpop.permute.xlu1 %2506  ;;  %v3213_v45 = vpop.f32.mrf.mxu0  ;;  %2440 = vrot.lane.b32.xlu0 %v1903_v63, %s4152_s1  ;;  %3972 = vmatprep.mubr.msk.f32.mxu0 %vm2844_vm7, %v2766_v37  ;;  %v4147_v63 = vld [vmem:[#allocation2 + $0x350] sm:$0xff] }
 0x336   :  { %v2814_v18 = vsel %vm2735_vm6, %v2717_v41, %v2507_v27  ;;  %3652 = vst.msk [vmem:[%s7963_s3 + $0x10] sm:$0xff] %vm14_vm0, %v3218_v36  ;;  %v4004_v23 = vpop.f32.mrf.mxu1  ;;  %v2718_v45 = vsel %vm2638_vm5, %v6794_v59, %v2215_v28  ;;  %v623_v32 = vrot.slane %v4147_v63, 7  ;;  %v552_v28 = vsel %vm481_vm1, %v8608_v62, %v551_v56  ;;  %v8609_v36 = vld [vmem:[#allocation153_spill] sm:$0xff] }
 0x337   :  { %2536 = vrot.lane.b32.xlu1 %v1957_v12, %s4152_s1  ;;  %4044 = vmatprep.mubr.msk.f32.mxu1 %vm2844_vm7, %v2814_v18  ;;  %v3442_v14 = vadd.f32 %v4004_v23, %v7390_v35  ;;  %v2413_v30 = vpop.permute.xlu0 %2412  ;;  %v8611_v18 = vrot.slane %v7419_v50, 7  ;;  %v8612_v23 = vrot.slane %v7430_v38, 7  ;;  %v8616_v38 = vld [vmem:[#allocation57_spill] sm:$0xff] }
 0x338   :  { %v2767_v16 = vsel %vm2735_vm6, %v2670_v10, %v2413_v30  ;;  %v3437_v61 = vpop.f32.mrf.mxu1  ;;  %v624_v41 = vsel %vm481_vm1, %v622_v8, %v623_v32  ;;  %v8614_v10 = vld [vmem:[#allocation94_spill] sm:$0xff] }
 0x339   :  { %v2509_v31 = vpop.permute.xlu1 %2508  ;;  %3684 = vst.msk [vmem:[%s7963_s3 + $0x110] sm:$0xff] %vm14_vm0, %v3442_v14  ;;  %2148 = vrot.lane.b32.xlu0 %v7379_v13, %s4151_s27  ;;  %3973 = vmatmul.mubr.msk.f32.gmra.mxu0 %vm2844_vm7, %v2767_v16  ;;  %v1849_v27 = vsel %vm14_vm0, %v624_v41, %v8610_v11  ;;  %v553_v48 = vsel %vm481_vm1, %v551_v56, %v8611_v18 }
 0x33a   :  { %v2815_v44 = vsel %vm2735_vm6, %v2718_v45, %v2509_v31  ;;  %v625_v8 = vsel %vm481_vm1, %v623_v32, %v8612_v23  ;;  %v1958_v45 = vsel %vm1851_vm3, %v1849_v27, %v8614_v10  ;;  %v8615_v31 = vld [vmem:[#allocation154_spill] sm:$0xff] }
 0x33b   :  { %2244 = vrot.lane.b32.xlu1 %v7383_v20, %s4151_s27  ;;  %4045 = vmatmul.mubr.msk.f32.gmra.mxu1 %vm2844_vm7, %v2815_v44  ;;  %v2121_v58 = vpop.permute.xlu0 %2120  ;;  %v1795_v20 = vsel %vm14_vm0, %v552_v28, %v8609_v36  ;;  %v1796_v4 = vsel %vm14_vm0, %v553_v48, %v8615_v31  ;;  %v1850_v56 = vsel %vm14_vm0, %v625_v8, %v8616_v38  ;;  %v8617_v44 = vld [vmem:[#allocation128_spill] sm:$0xff]  ;;  %v8618_v28 = vld [vmem:[#allocation21_spill] sm:$0xff] }
 0x33c   :  { %v2671_v63 = vsel %vm2638_vm5, %v6838_v2, %v2121_v58  ;;  %v1905_v62 = vsel %vm1851_vm3, %v1796_v4, %v8617_v44  ;;  %v1959_v41 = vsel %vm1851_vm3, %v1850_v56, %v8618_v28 }
 0x33d   :  { %v2217_v59 = vpop.permute.xlu1 %2216  ;;  %2150 = vrot.lane.b32.xlu0 %v1902_v53, %s4151_s27  ;;  %v8613_v53 = vld [vmem:[#allocation127_spill] sm:$0xff] }
 0x33e   :  { %v2719_v32 = vsel %vm2638_vm5, %v6842_v17, %v2217_v59 }
 0x33f   :  { %2246 = vrot.lane.b32.xlu1 %v1956_v52, %s4151_s27  ;;  %v3935_v13 = vpop.f32.mrf.mxu0  ;;  %v2123_v12 = vpop.permute.xlu0 %2122  ;;  %v1904_v52 = vsel %vm1851_vm3, %v1795_v20, %v8613_v53 }
 0x340   :  { %v2672_v58 = vsel %vm2638_vm5, %v6861_v24, %v2123_v12 }
 0x341   :  { %v2219_v37 = vpop.permute.xlu1 %2218  ;;  %v3222_v14 = vpop.f32.mrf.mxu0  ;;  %2442 = vrot.lane.b32.xlu0 %v1904_v52, %s4152_s1 }
 0x342   :  { %v3223_v30 = vadd.f32 %v7390_v35, %v3222_v14  ;;  %v4007_v50 = vpop.f32.mrf.mxu1  ;;  %v2720_v59 = vsel %vm2638_vm5, %v6865_v54, %v2219_v37 }
 0x343   :  { %2538 = vrot.lane.b32.xlu1 %v1958_v45, %s4152_s1  ;;  %v2415_v16 = vpop.permute.xlu0 %2414 }
 0x344   :  { %3653 = vst.msk [vmem:[%s7963_s3 + $0x18] sm:$0xff] %vm14_vm0, %v3223_v30  ;;  %v2768_v13 = vsel %vm2735_vm6, %v2671_v63, %v2415_v16  ;;  %v3446_v36 = vpop.f32.mrf.mxu1 }
 0x345   :  { %v2511_v61 = vpop.permute.xlu1 %2510  ;;  %v3447_v17 = vadd.f32 %v7390_v35, %v3446_v36  ;;  %2444 = vrot.lane.b32.xlu0 %v1905_v62, %s4152_s1  ;;  %3975 = vmatprep.mubr.msk.f32.mxu0 %vm2844_vm7, %v2768_v13 }
 0x346   :  { %v2816_v2 = vsel %vm2735_vm6, %v2719_v32, %v2511_v61 }
 0x347   :  { %2540 = vrot.lane.b32.xlu1 %v1959_v41, %s4152_s1  ;;  %4047 = vmatprep.mubr.msk.f32.mxu1 %vm2844_vm7, %v2816_v2  ;;  %3685 = vst.msk [vmem:[%s7963_s3 + $0x118] sm:$0xff] %vm14_vm0, %v3447_v17  ;;  %v2417_v20 = vpop.permute.xlu0 %2416 }
 0x348   :  { %v2769_v27 = vsel %vm2735_vm6, %v2672_v58, %v2417_v20 }
 0x349   :  { %v2513_v11 = vpop.permute.xlu1 %2512  ;;  %3976 = vmatmul.mubr.msk.f32.gmra.mxu0 %vm2844_vm7, %v2769_v27 }
 0x34a   :  { %v2817_v18 = vsel %vm2735_vm6, %v2720_v59, %v2513_v11 }
 0x34b   :  { %4048 = vmatmul.mubr.msk.f32.gmra.mxu1 %vm2844_vm7, %v2817_v18  ;;  %v3938_v48 = vpop.f32.mrf.mxu0  ;;  %v2125_v12 = vpop.permute.xlu0 %2124 }
 0x34c   :  { %v3237_v24 = vadd.f32 %v3938_v48, %v7390_v35  ;;  %v2673_v30 = vsel %vm2638_vm5, %v6906_v47, %v2125_v12 }
 0x34d   :  { %v2221_v54 = vpop.permute.xlu1 %2220  ;;  %v3231_v37 = vpop.f32.mrf.mxu0 }
 0x34e   :  { %3655 = vst.msk [vmem:[%s7963_s3 + $0x28] sm:$0xff] %vm14_vm0, %v3237_v24  ;;  %v3232_v23 = vadd.f32 %v7390_v35, %v3231_v37  ;;  %v4010_v8 = vpop.f32.mrf.mxu1  ;;  %v2721_v50 = vsel %vm2638_vm5, %v6910_v51, %v2221_v54 }
 0x34f   :  { %v3461_v53 = vadd.f32 %v4010_v8, %v7390_v35  ;;  %v2127_v52 = vpop.permute.xlu0 %2126 }
 0x350   :  { %3654 = vst.msk [vmem:[%s7963_s3 + $0x20] sm:$0xff] %vm14_vm0, %v3232_v23  ;;  %v3455_v45 = vpop.f32.mrf.mxu1  ;;  %v2674_v47 = vsel %vm2638_vm5, %v6928_v19, %v2127_v52 }
 0x351   :  { %v2223_v10 = vpop.permute.xlu1 %2222  ;;  %3687 = vst.msk [vmem:[%s7963_s3 + $0x128] sm:$0xff] %vm14_vm0, %v3461_v53  ;;  %v3456_v14 = vadd.f32 %v7390_v35, %v3455_v45 }
 0x352   :  { %v2722_v51 = vsel %vm2638_vm5, %v6932_v39, %v2223_v10 }
 0x353   :  { %3686 = vst.msk [vmem:[%s7963_s3 + $0x120] sm:$0xff] %vm14_vm0, %v3456_v14  ;;  %v2419_v31 = vpop.permute.xlu0 %2418 }
 0x354   :  { %v2770_v38 = vsel %vm2735_vm6, %v2673_v30, %v2419_v31 }
 0x355   :  { %v2515_v4 = vpop.permute.xlu1 %2514  ;;  %3978 = vmatprep.mubr.msk.f32.mxu0 %vm2844_vm7, %v2770_v38 }
 0x356   :  { %v2818_v56 = vsel %vm2735_vm6, %v2721_v50, %v2515_v4 }
 0x357   :  { %4050 = vmatprep.mubr.msk.f32.mxu1 %vm2844_vm7, %v2818_v56  ;;  %v3941_v63 = vpop.f32.mrf.mxu0  ;;  %v2421_v16 = vpop.permute.xlu0 %2420 }
 0x358   :  { %v3246_v32 = vadd.f32 %v3941_v63, %v7390_v35  ;;  %v2771_v44 = vsel %vm2735_vm6, %v2674_v47, %v2421_v16 }
 0x359   :  { %v2517_v61 = vpop.permute.xlu1 %2516  ;;  %v3241_v28 = vpop.f32.mrf.mxu0  ;;  %3979 = vmatmul.mubr.msk.f32.gmra.mxu0 %vm2844_vm7, %v2771_v44 }
 0x35a   :  { %v2819_v62 = vsel %vm2735_vm6, %v2722_v51, %v2517_v61  ;;  %3656 = vst.msk [vmem:[%s7963_s3 + $0x30] sm:$0xff] %vm14_vm0, %v3246_v32  ;;  %v4013_v19 = vpop.f32.mrf.mxu1 }
 0x35b   :  { %4051 = vmatmul.mubr.msk.f32.gmra.mxu1 %vm2844_vm7, %v2819_v62  ;;  %v3470_v39 = vadd.f32 %v4013_v19, %v7390_v35  ;;  %v2129_v41 = vpop.permute.xlu0 %2128 }
 0x35c   :  { %v3465_v36 = vpop.f32.mrf.mxu1  ;;  %v2675_v59 = vsel %vm2638_vm5, %v6970_v9, %v2129_v41 }
 0x35d   :  { %v2225_v13 = vpop.permute.xlu1 %2224  ;;  %3688 = vst.msk [vmem:[%s7963_s3 + $0x130] sm:$0xff] %vm14_vm0, %v3470_v39 }
 0x35e   :  { %v2723_v20 = vsel %vm2638_vm5, %v6974_v29, %v2225_v13 }
 0x35f   :  { %v2131_v2 = vpop.permute.xlu0 %2130 }
 0x360   :  { %v2676_v9 = vsel %vm2638_vm5, %v6992_v1, %v2131_v2 }
 0x361   :  { %v2227_v17 = vpop.permute.xlu1 %2226 }
 0x362   :  { %v2724_v29 = vsel %vm2638_vm5, %v6996_v7, %v2227_v17 }
 0x363   :  { %v3944_v58 = vpop.f32.mrf.mxu0  ;;  %v2423_v11 = vpop.permute.xlu0 %2422 }
 0x364   :  { %v2772_v18 = vsel %vm2735_vm6, %v2675_v59, %v2423_v11 }
 0x365   :  { %v2519_v27 = vpop.permute.xlu1 %2518  ;;  %v3250_v24 = vpop.f32.mrf.mxu0  ;;  %3981 = vmatprep.mubr.msk.f32.mxu0 %vm2844_vm7, %v2772_v18 }
 0x366   :  { %v2820_v48 = vsel %vm2735_vm6, %v2723_v20, %v2519_v27  ;;  %v3251_v12 = vadd.f32 %v7390_v35, %v3250_v24  ;;  %v4016_v54 = vpop.f32.mrf.mxu1 }
 0x367   :  { %4053 = vmatprep.mubr.msk.f32.mxu1 %vm2844_vm7, %v2820_v48  ;;  %v2425_v37 = vpop.permute.xlu0 %2424 }
 0x368   :  { %3657 = vst.msk [vmem:[%s7963_s3 + $0x38] sm:$0xff] %vm14_vm0, %v3251_v12  ;;  %v2773_v8 = vsel %vm2735_vm6, %v2676_v9, %v2425_v37  ;;  %v3474_v53 = vpop.f32.mrf.mxu1 }
 0x369   :  { %v2521_v23 = vpop.permute.xlu1 %2520  ;;  %v3475_v10 = vadd.f32 %v7390_v35, %v3474_v53  ;;  %3982 = vmatmul.mubr.msk.f32.gmra.mxu0 %vm2844_vm7, %v2773_v8 }
 0x36a   :  { %v2821_v52 = vsel %vm2735_vm6, %v2724_v29, %v2521_v23 }
 0x36b   :  { %4054 = vmatmul.mubr.msk.f32.gmra.mxu1 %vm2844_vm7, %v2821_v52  ;;  %3689 = vst.msk [vmem:[%s7963_s3 + $0x138] sm:$0xff] %vm14_vm0, %v3475_v10  ;;  %v2133_v1 = vpop.permute.xlu0 %2132 }
 0x36c   :  { %v2677_v56 = vsel %vm2638_vm5, %v7031_v22, %v2133_v1 }
 0x36d   :  { %v2229_v7 = vpop.permute.xlu1 %2228 }
 0x36e   :  { %v2725_v63 = vsel %vm2638_vm5, %v7035_v46, %v2229_v7 }
 0x36f   :  { %v3947_v45 = vpop.f32.mrf.mxu0  ;;  %v2135_v30 = vpop.permute.xlu0 %2134 }
 0x370   :  { %v3265_v14 = vadd.f32 %v3947_v45, %v7390_v35  ;;  %v2678_v46 = vsel %vm2638_vm5, %v7052_v34, %v2135_v30 }
 0x371   :  { %v2231_v50 = vpop.permute.xlu1 %2230  ;;  %v3259_v31 = vpop.f32.mrf.mxu0 }
 0x372   :  { %3659 = vst.msk [vmem:[%s7963_s3 + $0x48] sm:$0xff] %vm14_vm0, %v3265_v14  ;;  %v3260_v4 = vadd.f32 %v7390_v35, %v3259_v31  ;;  %v4019_v38 = vpop.f32.mrf.mxu1  ;;  %v2726_v62 = vsel %vm2638_vm5, %v7056_v15, %v2231_v50 }
 0x373   :  { %v3489_v47 = vadd.f32 %v4019_v38, %v7390_v35  ;;  %v2427_v51 = vpop.permute.xlu0 %2426 }
 0x374   :  { %3658 = vst.msk [vmem:[%s7963_s3 + $0x40] sm:$0xff] %vm14_vm0, %v3260_v4  ;;  %v2774_v16 = vsel %vm2735_vm6, %v2677_v56, %v2427_v51  ;;  %v3483_v61 = vpop.f32.mrf.mxu1 }
 0x375   :  { %v2523_v32 = vpop.permute.xlu1 %2522  ;;  %3691 = vst.msk [vmem:[%s7963_s3 + $0x148] sm:$0xff] %vm14_vm0, %v3489_v47  ;;  %v3484_v22 = vadd.f32 %v7390_v35, %v3483_v61  ;;  %3984 = vmatprep.mubr.msk.f32.mxu0 %vm2844_vm7, %v2774_v16 }
 0x376   :  { %v2822_v44 = vsel %vm2735_vm6, %v2725_v63, %v2523_v32 }
 0x377   :  { %4056 = vmatprep.mubr.msk.f32.mxu1 %vm2844_vm7, %v2822_v44  ;;  %3690 = vst.msk [vmem:[%s7963_s3 + $0x140] sm:$0xff] %vm14_vm0, %v3484_v22  ;;  %v2429_v28 = vpop.permute.xlu0 %2428 }
 0x378   :  { %v2775_v39 = vsel %vm2735_vm6, %v2678_v46, %v2429_v28 }
 0x379   :  { %v2525_v19 = vpop.permute.xlu1 %2524  ;;  %3985 = vmatmul.mubr.msk.f32.gmra.mxu0 %vm2844_vm7, %v2775_v39 }
 0x37a   :  { %v2823_v41 = vsel %vm2735_vm6, %v2726_v62, %v2525_v19 }
 0x37b   :  { %4057 = vmatmul.mubr.msk.f32.gmra.mxu1 %vm2844_vm7, %v2823_v41  ;;  %v3950_v13 = vpop.f32.mrf.mxu0  ;;  %v2137_v36 = vpop.permute.xlu0 %2136 }
 0x37c   :  { %v3274_v34 = vadd.f32 %v3950_v13, %v7390_v35  ;;  %v2679_v27 = vsel %vm2638_vm5, %v7091_v40, %v2137_v36 }
 0x37d   :  { %v2233_v15 = vpop.permute.xlu1 %2232  ;;  %v3269_v2 = vpop.f32.mrf.mxu0 }
 0x37e   :  { %3660 = vst.msk [vmem:[%s7963_s3 + $0x50] sm:$0xff] %vm14_vm0, %v3274_v34  ;;  %v4022_v17 = vpop.f32.mrf.mxu1  ;;  %v2727_v18 = vsel %vm2638_vm5, %v7095_v5, %v2233_v15 }
 0x37f   :  { %v3498_v58 = vadd.f32 %v4022_v17, %v7390_v35  ;;  %v2139_v59 = vpop.permute.xlu0 %2138 }
 0x380   :  { %v3493_v11 = vpop.f32.mrf.mxu1  ;;  %v2680_v9 = vsel %vm2638_vm5, %v7112_v0, %v2139_v59 }
 0x381   :  { %v2235_v20 = vpop.permute.xlu1 %2234  ;;  %3692 = vst.msk [vmem:[%s7963_s3 + $0x150] sm:$0xff] %vm14_vm0, %v3498_v58 }
 0x382   :  { %v2728_v29 = vsel %vm2638_vm5, %v7116_v3, %v2235_v20 }
 0x383   :  { %v2431_v48 = vpop.permute.xlu0 %2430 }
 0x384   :  { %v2776_v12 = vsel %vm2735_vm6, %v2679_v27, %v2431_v48 }
 0x385   :  { %v2527_v24 = vpop.permute.xlu1 %2526  ;;  %3987 = vmatprep.mubr.msk.f32.mxu0 %vm2844_vm7, %v2776_v12 }
 0x386   :  { %v2824_v54 = vsel %vm2735_vm6, %v2727_v18, %v2527_v24 }
 0x387   :  { %4059 = vmatprep.mubr.msk.f32.mxu1 %vm2844_vm7, %v2824_v54  ;;  %v2433_v40 = vpop.permute.xlu0 %2432 }
 0x388   :  { %v2777_v5 = vsel %vm2735_vm6, %v2680_v9, %v2433_v40 }
 0x389   :  { %v2529_v37 = vpop.permute.xlu1 %2528  ;;  %3988 = vmatmul.mubr.msk.f32.gmra.mxu0 %vm2844_vm7, %v2777_v5  ;;  %v3953_v8 = vpop.f32.mrf.mxu0 }
 0x38a   :  { %v2825_v23 = vsel %vm2735_vm6, %v2728_v29, %v2529_v37 }
 0x38b   :  { %4060 = vmatmul.mubr.msk.f32.gmra.mxu1 %vm2844_vm7, %v2825_v23  ;;  %v4025_v53 = vpop.f32.mrf.mxu1  ;;  %v2141_v52 = vpop.permute.xlu0 %2140 }
 0x38c   :  { %v3278_v7 = vpop.f32.mrf.mxu0  ;;  %v2681_v30 = vsel %vm2638_vm5, %v7158_v25, %v2141_v52 }
 0x38d   :  { %v2237_v10 = vpop.permute.xlu1 %2236  ;;  %v3502_v1 = vpop.f32.mrf.mxu1  ;;  %v3279_v3 = vadd.f32 %v7390_v35, %v3278_v7 }
 0x38e   :  { %v3503_v0 = vadd.f32 %v7390_v35, %v3502_v1  ;;  %v2729_v50 = vsel %vm2638_vm5, %v7162_v26, %v2237_v10  ;;  %v8619_v10 = vld [vmem:[#allocation59_spill] sm:$0xff] }
 0x38f   :  { %3661 = vst.msk [vmem:[%s7963_s3 + $0x58] sm:$0xff] %vm14_vm0, %v3279_v3  ;;  %v2143_v45 = vpop.permute.xlu0 %2142 }
 0x390   :  { %3693 = vst.msk [vmem:[%s7963_s3 + $0x158] sm:$0xff] %vm14_vm0, %v3503_v0  ;;  %v2682_v63 = vsel %vm2638_vm5, %v7179_v49, %v2143_v45 }
 0x391   :  { %v2239_v14 = vpop.permute.xlu1 %2238 }
 0x392   :  { %v2730_v47 = vsel %vm2638_vm5, %v7183_v21, %v2239_v14 }
 0x393   :  { %v2435_v31 = vpop.permute.xlu0 %2434 }
 0x394   :  { %v2778_v38 = vsel %vm2735_vm6, %v2681_v30, %v2435_v31 }
 0x395   :  { %v2531_v4 = vpop.permute.xlu1 %2530  ;;  %3990 = vmatprep.mubr.msk.f32.mxu0 %vm2844_vm7, %v2778_v38 }
 0x396   :  { %v2826_v56 = vsel %vm2735_vm6, %v2729_v50, %v2531_v4 }
 0x397   :  { %4062 = vmatprep.mubr.msk.f32.mxu1 %vm2844_vm7, %v2826_v56  ;;  %v2437_v25 = vpop.permute.xlu0 %2436 }
 0x398   :  { %v2779_v26 = vsel %vm2735_vm6, %v2682_v63, %v2437_v25 }
 0x399   :  { %v2533_v51 = vpop.permute.xlu1 %2532  ;;  %3991 = vmatmul.mubr.msk.f32.gmra.mxu0 %vm2844_vm7, %v2779_v26  ;;  %v3956_v16 = vpop.f32.mrf.mxu0 }
 0x39a   :  { %v2827_v32 = vsel %vm2735_vm6, %v2730_v47, %v2533_v51  ;;  %v3293_v44 = vadd.f32 %v3956_v16, %v7390_v35 }
 0x39b   :  { %4063 = vmatmul.mubr.msk.f32.gmra.mxu1 %vm2844_vm7, %v2827_v32  ;;  %v4028_v61 = vpop.f32.mrf.mxu1  ;;  %v2145_v49 = vpop.permute.xlu0 %2144 }
 0x39c   :  { %v3517_v22 = vadd.f32 %v4028_v61, %v7390_v35  ;;  %v3287_v21 = vpop.f32.mrf.mxu0  ;;  %3663 = vst.msk [vmem:[%s7963_s3 + $0x68] sm:$0xff] %vm14_vm0, %v3293_v44  ;;  %v2683_v13 = vsel %vm2638_vm5, %v7225_v57, %v2145_v49 }
 0x39d   :  { %v2241_v46 = vpop.permute.xlu1 %2240  ;;  %v3511_v62 = vpop.f32.mrf.mxu1  ;;  %v3288_v19 = vadd.f32 %v7390_v35, %v3287_v21 }
 0x39e   :  { %3695 = vst.msk [vmem:[%s7963_s3 + $0x168] sm:$0xff] %vm14_vm0, %v3517_v22  ;;  %v3512_v28 = vadd.f32 %v7390_v35, %v3511_v62  ;;  %v2731_v34 = vsel %vm2638_vm5, %v7229_v55, %v2241_v46 }
 0x39f   :  { %3662 = vst.msk [vmem:[%s7963_s3 + $0x60] sm:$0xff] %vm14_vm0, %v3288_v19  ;;  %v2147_v39 = vpop.permute.xlu0 %2146 }
 0x3a0   :  { %3694 = vst.msk [vmem:[%s7963_s3 + $0x160] sm:$0xff] %vm14_vm0, %v3512_v28  ;;  %v2684_v58 = vsel %vm2638_vm5, %v7245_v43, %v2147_v39 }
 0x3a1   :  { %v2243_v41 = vpop.permute.xlu1 %2242 }
 0x3a2   :  { %v2732_v59 = vsel %vm2638_vm5, %v7249_v33, %v2243_v41 }
 0x3a3   :  { %v2439_v36 = vpop.permute.xlu0 %2438 }
 0x3a4   :  { %v2780_v2 = vsel %vm2735_vm6, %v2683_v13, %v2439_v36 }
 0x3a5   :  { %v2535_v15 = vpop.permute.xlu1 %2534  ;;  %3993 = vmatprep.mubr.msk.f32.mxu0 %vm2844_vm7, %v2780_v2 }
 0x3a6   :  { %v2828_v17 = vsel %vm2735_vm6, %v2731_v34, %v2535_v15 }
 0x3a7   :  { %4065 = vmatprep.mubr.msk.f32.mxu1 %vm2844_vm7, %v2828_v17  ;;  %v2441_v57 = vpop.permute.xlu0 %2440 }
 0x3a8   :  { %v2781_v55 = vsel %vm2735_vm6, %v2684_v58, %v2441_v57 }
 0x3a9   :  { %v2537_v20 = vpop.permute.xlu1 %2536  ;;  %3994 = vmatmul.mubr.msk.f32.gmra.mxu0 %vm2844_vm7, %v2781_v55  ;;  %v3959_v27 = vpop.f32.mrf.mxu0 }
 0x3aa   :  { %v2829_v11 = vsel %vm2735_vm6, %v2732_v59, %v2537_v20  ;;  %v3302_v48 = vadd.f32 %v3959_v27, %v7390_v35 }
 0x3ab   :  { %4066 = vmatmul.mubr.msk.f32.gmra.mxu1 %vm2844_vm7, %v2829_v11  ;;  %v4031_v18 = vpop.f32.mrf.mxu1  ;;  %v2149_v43 = vpop.permute.xlu0 %2148 }
 0x3ac   :  { %v3526_v24 = vadd.f32 %v4031_v18, %v7390_v35  ;;  %v3297_v33 = vpop.f32.mrf.mxu0  ;;  %3664 = vst.msk [vmem:[%s7963_s3 + $0x70] sm:$0xff] %vm14_vm0, %v3302_v48  ;;  %v2685_v40 = vsel %vm2638_vm5, %v7287_v42, %v2149_v43 }
 0x3ad   :  { %v2245_v12 = vpop.permute.xlu1 %2244  ;;  %v3521_v54 = vpop.f32.mrf.mxu1 }
 0x3ae   :  { %3696 = vst.msk [vmem:[%s7963_s3 + $0x170] sm:$0xff] %vm14_vm0, %v3526_v24  ;;  %v2733_v37 = vsel %vm2638_vm5, %v7291_v60, %v2245_v12 }
 0x3af   :  { %v2151_v9 = vpop.permute.xlu0 %2150 }
 0x3b0   :  { %v2686_v52 = vsel %vm2638_vm5, %v7307_v6, %v2151_v9 }
 0x3b1   :  { %v2247_v29 = vpop.permute.xlu1 %2246 }
 0x3b2   :  { %v2734_v1 = vsel %vm2638_vm5, %v8619_v10, %v2247_v29 }
 0x3b3   :  { %v2443_v5 = vpop.permute.xlu0 %2442 }
 0x3b4   :  { %v2782_v8 = vsel %vm2735_vm6, %v2685_v40, %v2443_v5 }
 0x3b5   :  { %v2539_v23 = vpop.permute.xlu1 %2538  ;;  %3996 = vmatprep.mubr.msk.f32.mxu0 %vm2844_vm7, %v2782_v8 }
 0x3b6   :  { %v2830_v53 = vsel %vm2735_vm6, %v2733_v37, %v2539_v23 }
 0x3b7   :  { %4068 = vmatprep.mubr.msk.f32.mxu1 %vm2844_vm7, %v2830_v53  ;;  %v2445_v42 = vpop.permute.xlu0 %2444 }
 0x3b8   :  { %v2783_v60 = vsel %vm2735_vm6, %v2686_v52, %v2445_v42 }
 0x3b9   :  { %v2541_v7 = vpop.permute.xlu1 %2540  ;;  %3997 = vmatmul.mubr.msk.f32.gmra.mxu0 %vm2844_vm7, %v2783_v60  ;;  %v3962_v3 = vpop.f32.mrf.mxu0 }
 0x3ba   :  { %v2831_v0 = vsel %vm2735_vm6, %v2734_v1, %v2541_v7 }
 0x3bb   :  { %4069 = vmatmul.mubr.msk.f32.gmra.mxu1 %vm2844_vm7, %v2831_v0  ;;  %v4034_v45 = vpop.f32.mrf.mxu1  ;;  %v3306_v14 = vpop.f32.mrf.mxu0 }
 0x3bc   :  { %v3307_v50 = vadd.f32 %v7390_v35, %v3306_v14 }
 0x3bd   :  { %v3530_v30 = vpop.f32.mrf.mxu1 }
 0x3be   :  { %v3531_v6 = vadd.f32 %v7390_v35, %v3530_v30  ;;  %3665 = vst.msk [vmem:[%s7963_s3 + $0x78] sm:$0xff] %vm14_vm0, %v3307_v50 }
 0x3c0   :  { %3697 = vst.msk [vmem:[%s7963_s3 + $0x178] sm:$0xff] %vm14_vm0, %v3531_v6 }
 0x3c9   :  { %v3965_v31 = vpop.f32.mrf.mxu0 }
 0x3ca   :  { %v3321_v38 = vadd.f32 %v3965_v31, %v7390_v35 }
 0x3cb   :  { %v4037_v4 = vpop.f32.mrf.mxu1  ;;  %v3315_v63 = vpop.f32.mrf.mxu0 }
 0x3cc   :  { %v3545_v56 = vadd.f32 %v4037_v4, %v7390_v35  ;;  %3667 = vst.msk [vmem:[%s7963_s3 + $0x88] sm:$0xff] %vm14_vm0, %v3321_v38  ;;  %v3316_v25 = vadd.f32 %v7390_v35, %v3315_v63 }
 0x3cd   :  { %v3539_v47 = vpop.f32.mrf.mxu1 }
 0x3ce   :  { %3699 = vst.msk [vmem:[%s7963_s3 + $0x188] sm:$0xff] %vm14_vm0, %v3545_v56  ;;  %v3540_v51 = vadd.f32 %v7390_v35, %v3539_v47  ;;  %3666 = vst.msk [vmem:[%s7963_s3 + $0x80] sm:$0xff] %vm14_vm0, %v3316_v25 }
 0x3d0   :  { %3698 = vst.msk [vmem:[%s7963_s3 + $0x180] sm:$0xff] %vm14_vm0, %v3540_v51 }
 0x3d9   :  { %v3968_v26 = vpop.f32.mrf.mxu0 }
 0x3da   :  { %v3330_v16 = vadd.f32 %v3968_v26, %v7390_v35 }
 0x3db   :  { %v4040_v32 = vpop.f32.mrf.mxu1  ;;  %v3325_v44 = vpop.f32.mrf.mxu0 }
 0x3dc   :  { %v3554_v61 = vadd.f32 %v4040_v32, %v7390_v35  ;;  %3668 = vst.msk [vmem:[%s7963_s3 + $0x90] sm:$0xff] %vm14_vm0, %v3330_v16 }
 0x3dd   :  { %v3549_v22 = vpop.f32.mrf.mxu1 }
 0x3de   :  { %3700 = vst.msk [vmem:[%s7963_s3 + $0x190] sm:$0xff] %vm14_vm0, %v3554_v61 }
 0x3e9   :  { %v3971_v49 = vpop.f32.mrf.mxu0 }
 0x3eb   :  { %v4043_v46 = vpop.f32.mrf.mxu1  ;;  %v3334_v62 = vpop.f32.mrf.mxu0 }
 0x3ec   :  { %v3335_v28 = vadd.f32 %v7390_v35, %v3334_v62 }
 0x3ed   :  { %v3558_v21 = vpop.f32.mrf.mxu1 }
 0x3ee   :  { %v3559_v19 = vadd.f32 %v7390_v35, %v3558_v21  ;;  %3669 = vst.msk [vmem:[%s7963_s3 + $0x98] sm:$0xff] %vm14_vm0, %v3335_v28 }
 0x3f0   :  { %3701 = vst.msk [vmem:[%s7963_s3 + $0x198] sm:$0xff] %vm14_vm0, %v3559_v19 }
 0x3f9   :  { %v3974_v39 = vpop.f32.mrf.mxu0 }
 0x3fa   :  { %v3349_v13 = vadd.f32 %v3974_v39, %v7390_v35 }
 0x3fb   :  { %v4046_v41 = vpop.f32.mrf.mxu1  ;;  %v3343_v36 = vpop.f32.mrf.mxu0 }
 0x3fc   :  { %v3573_v34 = vadd.f32 %v4046_v41, %v7390_v35  ;;  %3671 = vst.msk [vmem:[%s7963_s3 + $0xa8] sm:$0xff] %vm14_vm0, %v3349_v13  ;;  %v3344_v2 = vadd.f32 %v7390_v35, %v3343_v36 }
 0x3fd   :  { %v3567_v15 = vpop.f32.mrf.mxu1 }
 0x3fe   :  { %3703 = vst.msk [vmem:[%s7963_s3 + $0x1a8] sm:$0xff] %vm14_vm0, %v3573_v34  ;;  %v3568_v17 = vadd.f32 %v7390_v35, %v3567_v15  ;;  %3670 = vst.msk [vmem:[%s7963_s3 + $0xa0] sm:$0xff] %vm14_vm0, %v3344_v2 }
 0x400   :  { %3702 = vst.msk [vmem:[%s7963_s3 + $0x1a0] sm:$0xff] %vm14_vm0, %v3568_v17 }
 0x409   :  { %v3977_v58 = vpop.f32.mrf.mxu0 }
 0x40a   :  { %v3358_v57 = vadd.f32 %v3977_v58, %v7390_v35 }
 0x40b   :  { %v4049_v59 = vpop.f32.mrf.mxu1  ;;  %v3353_v55 = vpop.f32.mrf.mxu0 }
 0x40c   :  { %v3582_v20 = vadd.f32 %v4049_v59, %v7390_v35  ;;  %3672 = vst.msk [vmem:[%s7963_s3 + $0xb0] sm:$0xff] %vm14_vm0, %v3358_v57 }
 0x40d   :  { %v3577_v11 = vpop.f32.mrf.mxu1 }
 0x40e   :  { %3704 = vst.msk [vmem:[%s7963_s3 + $0x1b0] sm:$0xff] %vm14_vm0, %v3582_v20 }
 0x419   :  { %v3980_v27 = vpop.f32.mrf.mxu0 }
 0x41b   :  { %v4052_v18 = vpop.f32.mrf.mxu1  ;;  %v3362_v48 = vpop.f32.mrf.mxu0 }
 0x41c   :  { %v3363_v43 = vadd.f32 %v7390_v35, %v3362_v48 }
 0x41d   :  { %v3586_v24 = vpop.f32.mrf.mxu1 }
 0x41e   :  { %v3587_v12 = vadd.f32 %v7390_v35, %v3586_v24  ;;  %3673 = vst.msk [vmem:[%s7963_s3 + $0xb8] sm:$0xff] %vm14_vm0, %v3363_v43 }
 0x420   :  { %3705 = vst.msk [vmem:[%s7963_s3 + $0x1b8] sm:$0xff] %vm14_vm0, %v3587_v12 }
 0x429   :  { %v3983_v54 = vpop.f32.mrf.mxu0 }
 0x42a   :  { %v3377_v9 = vadd.f32 %v3983_v54, %v7390_v35 }
 0x42b   :  { %v4055_v33 = vpop.f32.mrf.mxu1  ;;  %v3371_v40 = vpop.f32.mrf.mxu0 }
 0x42c   :  { %v3601_v29 = vadd.f32 %v4055_v33, %v7390_v35  ;;  %3675 = vst.msk [vmem:[%s7963_s3 + $0xc8] sm:$0xff] %vm14_vm0, %v3377_v9  ;;  %v3372_v5 = vadd.f32 %v7390_v35, %v3371_v40 }
 0x42d   :  { %v3595_v37 = vpop.f32.mrf.mxu1 }
 0x42e   :  { %3707 = vst.msk [vmem:[%s7963_s3 + $0x1c8] sm:$0xff] %vm14_vm0, %v3601_v29  ;;  %v3596_v23 = vadd.f32 %v7390_v35, %v3595_v37  ;;  %3674 = vst.msk [vmem:[%s7963_s3 + $0xc0] sm:$0xff] %vm14_vm0, %v3372_v5 }
 0x430   :  { %3706 = vst.msk [vmem:[%s7963_s3 + $0x1c0] sm:$0xff] %vm14_vm0, %v3596_v23 }
 0x439   :  { %v3986_v8 = vpop.f32.mrf.mxu0 }
 0x43a   :  { %v3386_v52 = vadd.f32 %v3986_v8, %v7390_v35 }
 0x43b   :  { %v4058_v53 = vpop.f32.mrf.mxu1  ;;  %v3381_v1 = vpop.f32.mrf.mxu0 }
 0x43c   :  { %v3610_v10 = vadd.f32 %v4058_v53, %v7390_v35  ;;  %3676 = vst.msk [vmem:[%s7963_s3 + $0xd0] sm:$0xff] %vm14_vm0, %v3386_v52 }
 0x43d   :  { %v3605_v42 = vpop.f32.mrf.mxu1 }
 0x43e   :  { %3708 = vst.msk [vmem:[%s7963_s3 + $0x1d0] sm:$0xff] %vm14_vm0, %v3610_v10 }
 0x449   :  { %v3989_v7 = vpop.f32.mrf.mxu0 }
 0x44b   :  { %v4061_v60 = vpop.f32.mrf.mxu1  ;;  %v3390_v0 = vpop.f32.mrf.mxu0 }
 0x44c   :  { %v3391_v45 = vadd.f32 %v7390_v35, %v3390_v0 }
 0x44d   :  { %v3614_v3 = vpop.f32.mrf.mxu1 }
 0x44e   :  { %v3615_v14 = vadd.f32 %v7390_v35, %v3614_v3  ;;  %3677 = vst.msk [vmem:[%s7963_s3 + $0xd8] sm:$0xff] %vm14_vm0, %v3391_v45 }
 0x450   :  { %3709 = vst.msk [vmem:[%s7963_s3 + $0x1d8] sm:$0xff] %vm14_vm0, %v3615_v14 }
 0x459   :  { %v3992_v30 = vpop.f32.mrf.mxu0 }
 0x45a   :  { %v3405_v6 = vadd.f32 %v3992_v30, %v7390_v35 }
 0x45b   :  { %v4064_v50 = vpop.f32.mrf.mxu1  ;;  %v3399_v4 = vpop.f32.mrf.mxu0 }
 0x45c   :  { %v3629_v31 = vadd.f32 %v4064_v50, %v7390_v35  ;;  %3679 = vst.msk [vmem:[%s7963_s3 + $0xe8] sm:$0xff] %vm14_vm0, %v3405_v6  ;;  %v3400_v56 = vadd.f32 %v7390_v35, %v3399_v4 }
 0x45d   :  { %v3623_v38 = vpop.f32.mrf.mxu1 }
 0x45e   :  { %3711 = vst.msk [vmem:[%s7963_s3 + $0x1e8] sm:$0xff] %vm14_vm0, %v3629_v31  ;;  %v3624_v63 = vadd.f32 %v7390_v35, %v3623_v38  ;;  %3678 = vst.msk [vmem:[%s7963_s3 + $0xe0] sm:$0xff] %vm14_vm0, %v3400_v56 }
 0x460   :  { %3710 = vst.msk [vmem:[%s7963_s3 + $0x1e0] sm:$0xff] %vm14_vm0, %v3624_v63 }
 0x469   :  { %v3995_v47 = vpop.f32.mrf.mxu0 }
 0x46a   :  { %v3414_v51 = vadd.f32 %v3995_v47, %v7390_v35 }
 0x46b   :  { %v4067_v25 = vpop.f32.mrf.mxu1  ;;  %v3409_v32 = vpop.f32.mrf.mxu0 }
 0x46c   :  { %v3638_v26 = vadd.f32 %v4067_v25, %v7390_v35  ;;  %3680 = vst.msk [vmem:[%s7963_s3 + $0xf0] sm:$0xff] %vm14_vm0, %v3414_v51 }
 0x46d   :  { %v3633_v16 = vpop.f32.mrf.mxu1 }
 0x46e   :  { %3712 = vst.msk [vmem:[%s7963_s3 + $0x1f0] sm:$0xff] %vm14_vm0, %v3638_v26 }
 0x479   :  { %v3998_v61 = vpop.f32.mrf.mxu0 }
 0x47b   :  { %v4070_v44 = vpop.f32.mrf.mxu1  ;;  %v3418_v22 = vpop.f32.mrf.mxu0 }
 0x47c   :  { %v3419_v46 = vadd.f32 %v7390_v35, %v3418_v22 }
 0x47d   :  { %v3642_v49 = vpop.f32.mrf.mxu1 }
 0x47e   :  { %v3643_v62 = vadd.f32 %v7390_v35, %v3642_v49  ;;  %3681 = vst.msk [vmem:[%s7963_s3 + $0xf8] sm:$0xff] %vm14_vm0, %v3419_v46 }
 0x480   :  { %3713 = vst.msk [vmem:[%s7963_s3 + $0x1f8] sm:$0xff] %vm14_vm0, %v3643_v62 }

</bundles_post_ra>
